<compile_context>
chip_gen: v6e
topology: v6e:2x2x1
jax: 0.10.0
libtpu: 0.0.40
codegen_flags: <defaults>
</compile_context>

<pallas_src>
import math
import functools

import jax
import jax.numpy as jnp
from jax import lax
from jax.experimental import pallas as pl
from jax.experimental.pallas import tpu as pltpu


def _attn_kernel(q_ref, k_ref, val_ref, vw_ref, qkb_ref, vb_ref, o_ref, *, d_model):
    """One grid step processes BB batches, fully resident in VMEM.

    q_ref   (BB, Lq, D)     query block
    k_ref   (BB, Lk, D)     key block
    val_ref (BB, Lv, D)     value block
    vw_ref  (BB, nhead, D)  v_weight block (batched-matmul pairing: batch b <-> v_weight[b])
    qkb_ref (BB, D, 1)      qk_bias[:, :, None] block (per-batch column bias)
    vb_ref  (nhead, D)      v_bias (shared across batches)
    o_ref   (BB, D, Lq)     output, already transposed (module's transpose(1, 2))
    """
    scale = 1.0 / math.sqrt(d_model)

    # Fold 1/sqrt(d_model) into q (scales D columns) instead of the Lq x Lk matrix.
    q = q_ref[...] * scale

    # qk[b, i, j] = sum_d q[b, i, d] * k[b, j, d]  -- contract last dims (no k.T).
    qk = lax.dot_general(
        q, k_ref[...],
        dimension_numbers=(((2,), (2,)), ((0,), (0,))),
        preferred_element_type=jnp.float32)                    # (BB, Lq, Lk)

    # qk += qk_bias[b][:, None]  (broadcast along the Lk / lane axis; no relayout,
    # the (BB, D, 1) column comes straight from the BlockSpec).
    qk = qk + qkb_ref[...]

    # softmax over the last axis; Dropout(p=0.1) in eval mode == identity.
    m = jnp.max(qk, axis=-1, keepdims=True)
    e = jnp.exp(qk - m)
    s = jnp.sum(e, axis=-1, keepdims=True)
    p = e * pl.reciprocal(s, approx=True)                      # EUP slot, VPU stays free

    # v[b] = value[b] @ v_weight[b] + v_bias
    v = lax.dot_general(
        val_ref[...], vw_ref[...],
        dimension_numbers=(((2,), (1,)), ((0,), (0,))),
        preferred_element_type=jnp.float32)                    # (BB, Lv, D)
    v = v + vb_ref[...]

    # output[b, d, i] = sum_k v[b, k, d] * p[b, i, k]
    # == (softmax(qk) @ v).transpose(1, 2), produced directly in (BB, D, Lq)
    # layout so there is no out.T relayout before the store.
    out = lax.dot_general(
        v, p,
        dimension_numbers=(((1,), (2,)), ((0,), (0,))),
        preferred_element_type=jnp.float32)
    o_ref[...] = out.astype(o_ref.dtype)


def model_forward(query, key, value, v_weight, qk_bias, v_bias):
    B, Lq, D = query.shape
    _, Lk, _ = key.shape
    _, Lv, _ = value.shape
    nhead = qk_bias.shape[0]

    # The torch module's in-place broadcasts / batched matmul require all of
    # these to coincide.
    assert B == nhead == D == Lq == Lk == Lv, (
        "Model is only shape-consistent when batch == nhead == d_model == Lq == Lk == Lv")

    # Collapse the per-batch grid: the whole problem fits VMEM with room to
    # spare.  Keep 2 grid steps (not 1) so the two v7x TensorCores can each
    # take half the batches; on v5e/v6e the extra step costs ~0.35 us.
    num_blocks = 2 if B % 2 == 0 else 1
    BB = B // num_blocks

    # Zero-copy (row-major metadata) reshape so the kernel receives a (BB, D, 1)
    # column that broadcasts along the Lk lane axis without any in-kernel
    # relayout.  With the collapsed grid this stream is fetched only
    # `num_blocks` times, so its cost is negligible.
    qk_bias_col = qk_bias[:, :, None]                           # (nhead, d_model, 1)

    kernel = functools.partial(_attn_kernel, d_model=D)

    return pl.pallas_call(
        kernel,
        out_shape=jax.ShapeDtypeStruct((B, D, Lq), query.dtype),
        grid_spec=pltpu.PrefetchScalarGridSpec(
            num_scalar_prefetch=0,
            grid=(num_blocks,),
            in_specs=[
                pl.BlockSpec((BB, Lq, D), lambda b: (b, 0, 0)),       # query
                pl.BlockSpec((BB, Lk, D), lambda b: (b, 0, 0)),       # key
                pl.BlockSpec((BB, Lv, D), lambda b: (b, 0, 0)),       # value
                pl.BlockSpec((BB, nhead, D), lambda b: (b, 0, 0)),    # v_weight block
                pl.BlockSpec((BB, D, 1), lambda b: (b, 0, 0)),        # qk_bias[:, :, None]
                pl.BlockSpec((nhead, D), lambda b: (0, 0)),           # v_bias (shared)
            ],
            out_specs=pl.BlockSpec((BB, D, Lq), lambda b: (b, 0, 0)),
        ),
        compiler_params=pltpu.CompilerParams(
            dimension_semantics=("parallel",)),
    )(query, key, value, v_weight, qk_bias_col, v_bias)


def reference(query, key, value, v_weight, qk_bias, v_bias):
    d_model = query.shape[-1]
    qk = jnp.matmul(query, jnp.swapaxes(key, -2, -1)) / math.sqrt(d_model)
    qk = qk + qk_bias[:, :, None]
    v = jnp.matmul(value, v_weight) + v_bias
    p = jax.nn.softmax(qk, axis=-1)
    out = jnp.matmul(p, v)
    return jnp.swapaxes(out, 1, 2)


if __name__ == "__main__":
    # B == nhead == d_model == Lq == Lk == Lv (required for shape consistency).
    N = 32
    rng = jax.random.PRNGKey(0)
    k0, k1, k2, k3, k4, k5 = jax.random.split(rng, 6)

    query = jax.random.normal(k0, (N, N, N), jnp.float32)
    key_t = jax.random.normal(k1, (N, N, N), jnp.float32)
    value = jax.random.normal(k2, (N, N, N), jnp.float32)
    # deterministic parameter init (module declares uninitialized Parameters)
    v_weight = jax.random.normal(k3, (N, N, N), jnp.float32) * 0.1   # (d_model, nhead, d_model)
    qk_bias = jax.random.normal(k4, (N, N), jnp.float32) * 0.1       # (nhead, d_model)
    v_bias = jax.random.normal(k5, (N, N), jnp.float32) * 0.1        # (nhead, d_model)

    out = model_forward(query, key_t, value, v_weight, qk_bias, v_bias)
    out = jax.block_until_ready(out)

    ref = reference(query, key_t, value, v_weight, qk_bias, v_bias)
    assert out.shape == (N, N, N)
    # approx (EUP) reciprocal in the softmax denominator introduces ~1e-3-level
    # relative deltas; real bugs would show up as O(0.1+) errors.
    assert jnp.allclose(out, ref, atol=5e-3, rtol=5e-3), "mismatch vs reference"
    print("KERNEL_OK")
</pallas_src>

<mosaic_0001>
module attributes {stable_mosaic.version = 11 : i64} {
  func.func @_attn_kernel(%arg0: i32, %arg1: memref<16x32x32xf32, #tpu.memory_space<vmem>>, %arg2: memref<16x32x32xf32, #tpu.memory_space<vmem>>, %arg3: memref<16x32x32xf32, #tpu.memory_space<vmem>>, %arg4: memref<16x32x32xf32, #tpu.memory_space<vmem>>, %arg5: memref<16x32x1xf32, #tpu.memory_space<vmem>>, %arg6: memref<32x32xf32, #tpu.memory_space<vmem>>, %arg7: memref<16x32x32xf32, #tpu.memory_space<vmem>>) attributes {dimension_semantics = [#tpu.dimension_semantics<parallel>], iteration_bounds = array<i64: 2>, scalar_prefetch = 0 : i64, scratch_operands = 0 : i64, tpu.core_type = #tpu.core_type<tc>, window_params = [{transform_indices = @transform_0, window_bounds = array<i64: 16, 32, 32>}, {transform_indices = @transform_1, window_bounds = array<i64: 16, 32, 32>}, {transform_indices = @transform_2, window_bounds = array<i64: 16, 32, 32>}, {transform_indices = @transform_3, window_bounds = array<i64: 16, 32, 32>}, {transform_indices = @transform_4, window_bounds = array<i64: 16, 32, 1>}, {pipeline_mode = #tpu.pipeline_mode<synchronous>, transform_indices = @transform_5, window_bounds = array<i64: 32, 32>}, {transform_indices = @transform_6, window_bounds = array<i64: 16, 32, 32>}]} {
    %c0 = arith.constant 0 : index
    %c0_0 = arith.constant 0 : index
    %c0_1 = arith.constant 0 : index
    %0 = vector.load %arg1[%c0, %c0_0, %c0_1] : memref<16x32x32xf32, #tpu.memory_space<vmem>>, vector<16x32x32xf32>
    %cst = arith.constant 0.176776692 : f32
    %1 = vector.broadcast %cst : f32 to vector<16x32x32xf32>
    %2 = arith.mulf %0, %1 : vector<16x32x32xf32>
    %c0_2 = arith.constant 0 : index
    %c0_3 = arith.constant 0 : index
    %c0_4 = arith.constant 0 : index
    %3 = vector.load %arg2[%c0_2, %c0_3, %c0_4] : memref<16x32x32xf32, #tpu.memory_space<vmem>>, vector<16x32x32xf32>
    %cst_5 = arith.constant dense<0.000000e+00> : vector<16x32x32xf32>
    %4 = tpu.matmul %2, %3, %cst_5 {dimension_numbers = #tpu.dot_dimension_numbers<[2], [2], [1], [1], [0, 0, 0, 1, 1, 1], [0], [0]>} : vector<16x32x32xf32>, vector<16x32x32xf32>, vector<16x32x32xf32> -> vector<16x32x32xf32>
    %c0_6 = arith.constant 0 : index
    %c0_7 = arith.constant 0 : index
    %c0_8 = arith.constant 0 : index
    %5 = vector.load %arg5[%c0_6, %c0_7, %c0_8] : memref<16x32x1xf32, #tpu.memory_space<vmem>>, vector<16x32x1xf32>
    %6 = vector.broadcast %5 : vector<16x32x1xf32> to vector<16x32x32xf32>
    %7 = arith.addf %4, %6 : vector<16x32x32xf32>
    %cst_9 = arith.constant dense<0xFF800000> : vector<16x32xf32>
    %8 = vector.multi_reduction <maximumf>, %7, %cst_9 [2] : vector<16x32x32xf32> to vector<16x32xf32>
    %9 = vector.shape_cast %8 : vector<16x32xf32> to vector<16x32x1xf32>
    %10 = vector.broadcast %9 : vector<16x32x1xf32> to vector<16x32x32xf32>
    %11 = arith.subf %7, %10 : vector<16x32x32xf32>
    %12 = math.exp %11 : vector<16x32x32xf32>
    %cst_10 = arith.constant dense<0.000000e+00> : vector<16x32xf32>
    %13 = vector.multi_reduction <add>, %12, %cst_10 [2] : vector<16x32x32xf32> to vector<16x32xf32>
    %14 = vector.shape_cast %13 : vector<16x32xf32> to vector<16x32x1xf32>
    %15 = tpu.reciprocal %14 {approx = true} : vector<16x32x1xf32> -> vector<16x32x1xf32>
    %16 = vector.broadcast %15 : vector<16x32x1xf32> to vector<16x32x32xf32>
    %17 = arith.mulf %12, %16 : vector<16x32x32xf32>
    %c0_11 = arith.constant 0 : index
    %c0_12 = arith.constant 0 : index
    %c0_13 = arith.constant 0 : index
    %18 = vector.load %arg3[%c0_11, %c0_12, %c0_13] : memref<16x32x32xf32, #tpu.memory_space<vmem>>, vector<16x32x32xf32>
    %c0_14 = arith.constant 0 : index
    %c0_15 = arith.constant 0 : index
    %c0_16 = arith.constant 0 : index
    %19 = vector.load %arg4[%c0_14, %c0_15, %c0_16] : memref<16x32x32xf32, #tpu.memory_space<vmem>>, vector<16x32x32xf32>
    %cst_17 = arith.constant dense<0.000000e+00> : vector<16x32x32xf32>
    %20 = tpu.matmul %18, %19, %cst_17 {dimension_numbers = #tpu.dot_dimension_numbers<[2], [1], [1], [2], [0, 0, 0, 1, 1, 2], [0], [0]>} : vector<16x32x32xf32>, vector<16x32x32xf32>, vector<16x32x32xf32> -> vector<16x32x32xf32>
    %c0_18 = arith.constant 0 : index
    %c0_19 = arith.constant 0 : index
    %21 = vector.load %arg6[%c0_18, %c0_19] : memref<32x32xf32, #tpu.memory_space<vmem>>, vector<32x32xf32>
    %22 = vector.shape_cast %21 : vector<32x32xf32> to vector<1x32x32xf32>
    %23 = vector.broadcast %22 : vector<1x32x32xf32> to vector<16x32x32xf32>
    %24 = arith.addf %20, %23 : vector<16x32x32xf32>
    %cst_20 = arith.constant dense<0.000000e+00> : vector<16x32x32xf32>
    %25 = tpu.matmul %24, %17, %cst_20 {dimension_numbers = #tpu.dot_dimension_numbers<[1], [2], [2], [1], [0, 0, 0, 2, 1, 1], [0], [0]>} : vector<16x32x32xf32>, vector<16x32x32xf32>, vector<16x32x32xf32> -> vector<16x32x32xf32>
    %c0_21 = arith.constant 0 : index
    %c0_22 = arith.constant 0 : index
    %c0_23 = arith.constant 0 : index
    %26 = vector.load %arg7[%c0_21, %c0_22, %c0_23] : memref<16x32x32xf32, #tpu.memory_space<vmem>>, vector<16x32x32xf32>
    tpu.vector_store %arg7[%c0_21, %c0_22, %c0_23], %25 {strides = array<i32>} : memref<16x32x32xf32, #tpu.memory_space<vmem>>, vector<16x32x32xf32>,
    return
  }
  func.func @transform_0(%arg0: i32) -> (i32, i32, i32) {
    %c0_i32 = arith.constant 0 : i32
    %c0_i32_0 = arith.constant 0 : i32
    %c0_i32_1 = arith.constant 0 : i32
    return %arg0, %c0_i32, %c0_i32_0 : i32, i32, i32
  }
  func.func @transform_1(%arg0: i32) -> (i32, i32, i32) {
    %c0_i32 = arith.constant 0 : i32
    %c0_i32_0 = arith.constant 0 : i32
    %c0_i32_1 = arith.constant 0 : i32
    return %arg0, %c0_i32, %c0_i32_0 : i32, i32, i32
  }
  func.func @transform_2(%arg0: i32) -> (i32, i32, i32) {
    %c0_i32 = arith.constant 0 : i32
    %c0_i32_0 = arith.constant 0 : i32
    %c0_i32_1 = arith.constant 0 : i32
    return %arg0, %c0_i32, %c0_i32_0 : i32, i32, i32
  }
  func.func @transform_3(%arg0: i32) -> (i32, i32, i32) {
    %c0_i32 = arith.constant 0 : i32
    %c0_i32_0 = arith.constant 0 : i32
    %c0_i32_1 = arith.constant 0 : i32
    return %arg0, %c0_i32, %c0_i32_0 : i32, i32, i32
  }
  func.func @transform_4(%arg0: i32) -> (i32, i32, i32) {
    %c0_i32 = arith.constant 0 : i32
    %c0_i32_0 = arith.constant 0 : i32
    %c0_i32_1 = arith.constant 0 : i32
    return %arg0, %c0_i32, %c0_i32_0 : i32, i32, i32
  }
  func.func @transform_5(%arg0: i32) -> (i32, i32) {
    %c0_i32 = arith.constant 0 : i32
    %c0_i32_0 = arith.constant 0 : i32
    %c0_i32_1 = arith.constant 0 : i32
    return %c0_i32, %c0_i32_0 : i32, i32
  }
  func.func @transform_6(%arg0: i32) -> (i32, i32, i32) {
    %c0_i32 = arith.constant 0 : i32
    %c0_i32_0 = arith.constant 0 : i32
    %c0_i32_1 = arith.constant 0 : i32
    return %arg0, %c0_i32, %c0_i32_0 : i32, i32, i32
  }
}

</mosaic_0001>

<bundles_post_ra>
// kernel: tpu_custom_call.1
= control target key start
LH: loop header
LB: loop body
LE: loop exit
PB: predicated region body
PF: predicated region fallthrough
CT: control target
= control target key end

     0   :  { %s11747_s0 = inlined_call_operand.vmem [shape: f32[32,32,32], index: 0, kind: input, shape index: {}]   ;;  %s11748_s1 = inlined_call_operand.hbm [shape: f32[32,32,32], index: 1, kind: input, shape index: {}]   ;;  %s11749_s2 = inlined_call_operand.hbm [shape: f32[32,32,32], index: 2, kind: input, shape index: {}]   ;;  %s11750_s3 = inlined_call_operand.hbm [shape: f32[32,32,32], index: 3, kind: input, shape index: {}]   ;;  %s11751_s4 = inlined_call_operand.vmem [shape: f32[32,32,1], index: 4, kind: input, shape index: {}]   ;;  %s11752_s5 = inlined_call_operand.vmem [shape: f32[32,32], index: 5, kind: input, shape index: {}]   ;;  %s11753_s6 = inlined_call_operand.hbm [shape: f32[32,32,32], index: 6, kind: output, shape index: {}]  }
   0x1   :  { %11825 = sst [smem:[#allocation74_spill]] %s11748_s1 }
   0x2   :  { %11826 = sst [smem:[#allocation75_spill]] %s11749_s2 }
   0x3   :  { %11 = vsyncpa [#allocation3], 0 }
   0x4   :  { %13 = vsyncpa [#allocation3 + $0x1], 0 }
   0x5   :  { %14 = vsyncpa [#allocation6], 0 }
   0x6   :  { %16 = vsyncpa [#allocation6 + $0x1], 0 }
   0x7   :  { %17 = vsyncpa [#allocation4], 0 }
   0x8   :  { %19 = vsyncpa [#allocation4 + $0x1], 0  ;;  %s9524_s21 = smov 0   ;;  %s9526_s22 = smov 0  }
   0x9   :  { %s9528_s23 = smov 0   ;;  %s9530_s24 = smov 0  }
   0xa LB: > { %11827 = sst [smem:[#allocation12_spill]] %s9474_s23  ;;  %s9545_s25 = sadd.s32 4294967295, %s9478_s24   ;;  %s9478_s24 = sphi %s9530_s24, %s12015_s24   ;;  %s9474_s23 = sphi %s9528_s23, %s12020_s23   ;;  %s9470_s22 = sphi %s9526_s22, %s12019_s22   ;;  %s9466_s21 = sphi %s9524_s21, %s12018_s21  }
   0xb   : > { %s7588_s26 = sadd.s32 4294967294, %s9478_s24   ;;  %s9549_s27 = sadd.s32 1, %s9478_s24  }
   0xc   : > { %11828 = sst [smem:[#allocation13_spill]] %s9549_s27  ;;  %s58_s28 = sadd.s32 1, %s9474_s23 }
   0xd   : > { %s55_s29 = ssub.s32 %s9478_s24, %s9549_s27  ;;  %p65_p0 = scmp.ne.s32.totalorder %s9474_s23, %s9470_s22 }
   0xe   : > { %p56_p1 = scmp.eq.s32.totalorder %s55_s29, 0  ;;  %p66_p2 = scmp.eq.s32.totalorder %s9478_s24, 0 }
   0xf   : > { %p71_p3 = scmp.ne.s32.totalorder %s9470_s22, %s9466_s21  ;;  %p72_p4 = scmp.eq.s32.totalorder %s9545_s25, 0 }
  0x10   : > { %s9561_s30 = scalar_select %p56_p1, %s9474_s23, %s58_s28  }
  0x11   : > { %p67_p5 = por %p66_p2, %p65_p0  ;;  %p9563_p6 = por %p72_p4, %p71_p3 }
  0x12   : > { %11829 = sst [smem:[#allocation14_spill]] %s9561_s30  ;;  %p194_p7 = scmp.eq.s32.totalorder %s9545_s25, 1 }
  0x13   : > { %s11830_s7 = scalar_select %p9563_p6, 1, 0 }
  0x14   : > { %p200_p8 = scmp.eq.s32.totalorder %s7588_s26, 1  ;;  %p9028_p10 = scmp.lt.s32.totalorder %s9478_s24, 2 }
  0x15   : > { %p9570_p11 = por %p194_p7, %p65_p0  ;;  %s11754_s10 = sand.u32 1, %s9474_s23  }
  0x16   : > { %p9574_p12 = por %p200_p8, %p71_p3  ;;  %s9580_s11 = sshll.u32 %s9478_s24, 13 }
  0x17   : > { %s11831_s8 = scalar_select %p9570_p11, 1, 0 }
  0x18   : > { %s11832_s9 = scalar_select %p9574_p12, 1, 0 }
  0x19   : > { %s9584_s12 = sshll.u32 %s11754_s10, 9  ;;  %p9586_p13 = pnand %p9028_p10, %p67_p5 }
  0x1a   : > { %s255_s14 = sand.u32 1, %s9478_s24   ;;  %s11834_s2 = sld [smem:[#allocation75_spill]] }
  0x1b   : > { %s259_s18 = scalar_lea.vmem [#allocation5], %s9584_s12  ;;  %s9601_s20 = scalar_lea.sflag [#allocation6], %s255_s14 }
  0x1c   : > { %s267_s19 = sshll.u32 %s259_s18, 4  ;;  %p9607_p2 = pneg %p9586_p13  ;;  %s9598_s19 = int_to_ptr.vmem [resolvable:$true] %s267_s19 }
  0x20   : > { %s9595_s17 = scalar_lea.hbm %s11834_s2, %s9580_s11  ;;  %s9331_s16 = scalar_lea.hbm %s11834_s2, 16384 }
  0x21   : > { %s9326_s26 = scalar_lea.hbm %s9595_s17, 8192  ;;  %p9332_p5 = scmp.lt.s32.totalorder %s9595_s17, %s11834_s2 }
  0x22   : > { %p9327_p1 = scmp.ne.s32.totalorder %s9595_s17, %s9326_s26  ;;  %p9333_p7 = scmp.lt.s32.totalorder %s9331_s16, %s9326_s26 }
  0x24   : > { %p9329_p3 = pnand %p9607_p2, %p9327_p1  ;;  %p9334_p8 = por %p9333_p7, %p9332_p5 }
  0x26   : > { %p9330_p4 = pneg %p9329_p3 }
  0x28   : > { %p9335_p10 = pnand %p9334_p8, %p9330_p4 }
  0x2a   : > { %9338 = shalt.err (!%p9335_p10)
}
  0x2b   : > { %s9339_s14 = scalar_lea.vmem %s9598_s19, 8192  ;;  %s9480_s30 = smov [#allocation5]  }
  0x2c   : > { %p9340_p9 = scmp.ne.s32.totalorder %s9598_s19, %s9339_s14  ;;  %s9344_s29 = sshll.u32 %s9480_s30, 4  ;;  %s9345_s29 = int_to_ptr.vmem [resolvable:$false] %s9344_s29 }
  0x2d   : > { %s9346_s15 = scalar_lea.vmem %s9345_s29, 16384  ;;  %p9347_p0 = scmp.lt.s32.totalorder %s9598_s19, %s9345_s29 }
  0x2e   : > { %p9342_p1 = pnand %p9340_p9, %p9607_p2  ;;  %p9348_p12 = scmp.lt.s32.totalorder %s9346_s15, %s9339_s14 }
  0x30   : > { %p9343_p3 = pneg %p9342_p1  ;;  %p9349_p11 = por %p9348_p12, %p9347_p0 }
  0x32   : > { %p9350_p6 = pnand %p9349_p11, %p9343_p3 }
  0x34   : > { %9353 = shalt.err (!%p9350_p6)
}
  0x35   : > { %s11757_s10 = smov 128   ;;  %s11759_s26 = smov 8  }
  0x36   : > { %9020 = dma.hbm_to_vmem [thread:$0]  (!%p9586_p13), %s9595_s17, 8192, %s9598_s19, %s9601_s20, %s11757_s10, %s11757_s10, %s11759_s26  }
  0x37   : > { %p307_p9 = scmp.lt.s32.totalorder %s9478_s24, 3  ;;  %s11836_s1 = sld [smem:[#allocation74_spill]] }
  0x38   : > { %p11837_p6 = scmp.ge.s32.totalorder %s9478_s24, 1  ;;  %s237_s29 = scalar_lea.vmem [#allocation2], %s9584_s12 }
  0x39   : > { %s245_s15 = sshll.u32 %s237_s29, 4  ;;  %s11839_s2 = sand.u32 1, %s9474_s23   ;;  %s9647_s15 = int_to_ptr.vmem [resolvable:$true] %s245_s15 }
  0x3a   : > { %p9642_p11 = pnand %p11837_p6, %p307_p9  ;;  %s234_s17 = scalar_lea.sflag [#allocation3], %s11839_s2 }
  0x3c   : > { %s11838_s14 = scalar_select %p9642_p11, 1, 0 }
  0x3d   : > { %s9638_s18 = scalar_lea.hbm %s11836_s1, %s9580_s11  ;;  %s9359_s10 = scalar_lea.hbm %s11836_s1, 16384 }
  0x3e   : > { %s9354_s19 = scalar_lea.hbm %s9638_s18, 8192  ;;  %p9360_p5 = scmp.lt.s32.totalorder %s9638_s18, %s11836_s1 }
  0x3f   : > { %p9355_p12 = scmp.ne.s32.totalorder %s9638_s18, %s9354_s19  ;;  %p9361_p7 = scmp.lt.s32.totalorder %s9359_s10, %s9354_s19 }
  0x41   : > { %p9357_p0 = pnand %p9355_p12, %p9607_p2  ;;  %p9362_p8 = por %p9361_p7, %p9360_p5 }
  0x43   : > { %p9358_p4 = pneg %p9357_p0 }
  0x45   : > { %p9363_p10 = pnand %p9362_p8, %p9358_p4 }
  0x47   : > { %9366 = shalt.err (!%p9363_p10)
}
  0x48   : > { %s9367_s2 = scalar_lea.vmem %s9647_s15, 8192  ;;  %s9483_s29 = smov [#allocation2]  }
  0x49   : > { %p9368_p1 = scmp.ne.s32.totalorder %s9647_s15, %s9367_s2  ;;  %s9372_s30 = sshll.u32 %s9483_s29, 4  ;;  %s9373_s30 = int_to_ptr.vmem [resolvable:$false] %s9372_s30 }
  0x4a   : > { %s9374_s16 = scalar_lea.vmem %s9373_s30, 16384  ;;  %p9375_p6 = scmp.lt.s32.totalorder %s9647_s15, %s9373_s30 }
  0x4b   : > { %p9370_p3 = pnand %p9368_p1, %p9607_p2  ;;  %p9376_p12 = scmp.lt.s32.totalorder %s9374_s16, %s9367_s2 }
  0x4d   : > { %p9371_p9 = pneg %p9370_p3  ;;  %p9377_p0 = por %p9376_p12, %p9375_p6 }
  0x4f   : > { %p9378_p11 = pnand %p9377_p0, %p9371_p9 }
  0x51   : > { %9381 = shalt.err (!%p9378_p11)
}
  0x52   : > { %s11840_s27 = smov 8   ;;  %s11841_s10 = smov 128  }
  0x53   : > { %9017 = dma.hbm_to_vmem [thread:$0]  (!%p9586_p13), %s9638_s18, 8192, %s9647_s15, %s234_s17, %s11841_s10, %s11841_s10, %s11840_s27  }
  0x54   : > { %s9678_s29 = scalar_lea.hbm %s11750_s3, %s9580_s11  ;;  %s281_s2 = scalar_lea.vmem [#allocation7], %s9584_s12 }
  0x55   : > { %s289_s30 = sshll.u32 %s281_s2, 4  ;;  %s9382_s16 = scalar_lea.hbm %s9678_s29, 8192  ;;  %s290_s30 = int_to_ptr.vmem [resolvable:$true] %s289_s30 }
  0x56   : > { %p9383_p11 = scmp.ne.s32.totalorder %s9678_s29, %s9382_s16  ;;  %s9387_s18 = scalar_lea.hbm %s11750_s3, 16384 }
  0x57   : > { %p9388_p7 = scmp.lt.s32.totalorder %s9678_s29, %s11750_s3  ;;  %p9389_p8 = scmp.lt.s32.totalorder %s9387_s18, %s9382_s16 }
  0x58   : > { %p9385_p4 = pnand %p9383_p11, %p9607_p2 }
  0x59   : > { %p9390_p10 = por %p9389_p8, %p9388_p7 }
  0x5a   : > { %p9386_p5 = pneg %p9385_p4 }
  0x5c   : > { %p9391_p1 = pnand %p9390_p10, %p9386_p5 }
  0x5e   : > { %9394 = shalt.err (!%p9391_p1)
}
  0x5f   : > { %s9395_s11 = scalar_lea.vmem %s290_s30, 8192  ;;  %s9484_s12 = smov [#allocation7]  }
  0x60   : > { %p9396_p3 = scmp.ne.s32.totalorder %s290_s30, %s9395_s11  ;;  %s9400_s26 = sshll.u32 %s9484_s12, 4  ;;  %s9401_s26 = int_to_ptr.vmem [resolvable:$false] %s9400_s26 }
  0x61   : > { %s9402_s19 = scalar_lea.vmem %s9401_s26, 16384  ;;  %p9403_p12 = scmp.lt.s32.totalorder %s290_s30, %s9401_s26 }
  0x62   : > { %p9398_p9 = pnand %p9396_p3, %p9607_p2  ;;  %p9404_p0 = scmp.lt.s32.totalorder %s9402_s19, %s9395_s11 }
  0x64   : > { %p9399_p6 = pneg %p9398_p9  ;;  %p9405_p11 = por %p9404_p0, %p9403_p12 }
  0x66   : > { %p9406_p4 = pnand %p9405_p11, %p9399_p6 }
  0x68   : > { %9409 = shalt.err (!%p9406_p4)
}
  0x69   : > { %9023 = dma.hbm_to_vmem [thread:$0]  (!%p9586_p13), %s9678_s29, 8192, %s290_s30, %s9601_s20, %s11841_s10, %s11841_s10, %s11840_s27  }
  0x6a   : > { %p11842_p2 = scmp.ne.s32.totalorder %s11838_s14, 0 }
  0x6c   : > { %311 = sbr.rel (%p11842_p2) target bundleno = 1317 (0x525), region = 44 }
  0x71   : > { %s9704_s1 = sand.u32 1, %s9470_s22   ;;  %p11843_p5 = scmp.ne.s32.totalorder %s11830_s7, 0 }
  0x72   : > { %s9707_s23 = sshll.u32 %s9704_s1, 9  ;;  %s314_s28 = scalar_lea.sflag [#allocation3], %s9704_s1 }
  0x73   : > { %s9711_s13 = scalar_lea.vmem [#allocation2], %s9707_s23 }
  0x74   : > { %9453 = dma.done.wait (%p11843_p5), %s314_s28, 8192  }
  0x75   : > { %9455 = vsyncadd (%p11843_p5), %s314_s28, 4294959104  ;;  %s322_s20 = sand.u32 1, %s9545_s25   ;;  %s9719_s27 = scalar_lea.vmem [#allocation5], %s9707_s23 }
  0x76   : > { %s323_s14 = scalar_lea.sflag [#allocation6], %s322_s20 }
  0x77   : > { %9457 = dma.done.wait (%p11843_p5), %s323_s14, 16384  }
  0x78   : > { %9459 = vsyncadd (%p11843_p5), %s323_s14, 4294950912  ;;  %s7608_s10 = sshll.u32 %s9545_s25, 4  ;;  %v9485_v0 = vmov 0   ;;  %vm980_vm0 = vcmask 261120   ;;  %v535_v1 = vld [vmem:[%s9711_s13 + $0x18] sm:$0xff]  ;;  %v534_v3 = vld [vmem:[%s9711_s13 + $0x10] sm:$0xff] }
  0x79   : > { %p387_p13 = scmp.lt.s32.totalorder %s7608_s10, 31  ;;  %9069 = vset.pattern.permute.xlu1 %v9485_v0  ;;  %9068 = vset.pattern.permute.xlu0 %v9485_v0  ;;  %v539_v2 = vld [vmem:[%s9711_s13 + $0x38] sm:$0xff]  ;;  %v538_v4 = vld [vmem:[%s9711_s13 + $0x30] sm:$0xff]  ;;  %v533_v8 = vld [vmem:[%s9711_s13 + $0x8] sm:$0xff]  ;;  %s10323_s17 = scalar_lea.vmem [#allocation7], %s9707_s23 }
  0x7a   : > { %8334 = vmatprep.subr.msk.mxu0 %vm980_vm0, %v535_v1  ;;  %8348 = vmatprep.subr.msk.mxu1 %vm980_vm0, %v539_v2  ;;  %v537_v9 = vld [vmem:[%s9711_s13 + $0x28] sm:$0xff]  ;;  %v532_v12 = vld [vmem:[%s9711_s13] sm:$0xff]  ;;  %v543_v18 = vld [vmem:[%s9711_s13 + $0x58] sm:$0xff]  ;;  %p12012_p8 = scmp.ne.s32.totalorder %s11831_s8, 0  ;;  %s9486_s7 = smov [#allocation8]  }
  0x7b   : > { %s12022_s10 = smov (!%p387_p13, %s7608_s10), 31  ;;  %8335 = vmatpush3.xpose.msk.msra.mxu0 %vm980_vm0, %v535_v1  ;;  %8349 = vmatpush3.xpose.msk.msra.mxu1 %vm980_vm0, %v539_v2  ;;  %v536_v13 = vld [vmem:[%s9711_s13 + $0x20] sm:$0xff]  ;;  %v547_v19 = vld [vmem:[%s9711_s13 + $0x78] sm:$0xff]  ;;  %v542_v32 = vld [vmem:[%s9711_s13 + $0x50] sm:$0xff]  ;;  %s9414_s18 = sshll.u32 %s9486_s7, 4  ;;  %s9415_s18 = int_to_ptr.vmem [resolvable:$false] %s9414_s18 }
  0x7c   : > { %s7946_s29 = sshll.u32 %s12022_s10, 5  ;;  %8336 = vmatprep.subr.msk.mxu0 %vm980_vm0, %v534_v3  ;;  %8350 = vmatprep.subr.msk.mxu1 %vm980_vm0, %v538_v4  ;;  %v546_v33 = vld [vmem:[%s9711_s13 + $0x70] sm:$0xff]  ;;  %v541_v36 = vld [vmem:[%s9711_s13 + $0x48] sm:$0xff]  ;;  %v540_v42 = vld [vmem:[%s9711_s13 + $0x40] sm:$0xff] }
  0x7d   : > { %s9729_s16 = scalar_lea.vmem %s11747_s0, %s7946_s29  ;;  %s9743_s15 = scalar_lea.vmem %s11751_s4, %s7946_s29  ;;  %v545_v37 = vld [vmem:[%s9711_s13 + $0x68] sm:$0xff]  ;;  %v544_v43 = vld [vmem:[%s9711_s13 + $0x60] sm:$0xff]  ;;  %v551_v48 = vld [vmem:[%s9711_s13 + $0x98] sm:$0xff] }
  0x7e   : > { %v404_v5 = vld [vmem:[%s9729_s16] sm:$0xff]  ;;  %v598_v11 = vld [vmem:[%s9743_s15 + $0x10] sm:$0xff]  ;;  %v599_v14 = vld [vmem:[%s9743_s15 + $0x18] sm:$0xff] }
  0x7f   : > { %v468_v6 = vmul.f32 0.17677669, %v404_v5  ;;  %v408_v7 = vld [vmem:[%s9729_s16 + $0x20] sm:$0xff]  ;;  %8337 = vmatpush3.xpose.msk.msra.mxu0 %vm980_vm0, %v534_v3  ;;  %8351 = vmatpush3.xpose.msk.msra.mxu1 %vm980_vm0, %v538_v4  ;;  %v405_v16 = vld [vmem:[%s9729_s16 + $0x8] sm:$0xff]  ;;  %v406_v20 = vld [vmem:[%s9729_s16 + $0x10] sm:$0xff] }
  0x80   : > { %v472_v10 = vmul.f32 0.17677669, %v408_v7  ;;  %8338 = vmatprep.subr.msk.mxu0 %vm980_vm0, %v533_v8  ;;  %8352 = vmatprep.subr.msk.mxu1 %vm980_vm0, %v537_v9  ;;  %v596_v15 = vld [vmem:[%s9743_s15] sm:$0xff]  ;;  %v409_v17 = vld [vmem:[%s9729_s16 + $0x28] sm:$0xff]  ;;  %v410_v21 = vld [vmem:[%s9729_s16 + $0x30] sm:$0xff] }
  0x81   : > { %8342 = vmatprep.mubr.msk.f32.mxu0 %vm980_vm0, %v468_v6  ;;  %672 = vperm.xlu1 %9069, %v598_v11   ;;  %v469_v22 = vmul.f32 0.17677669, %v405_v16  ;;  %v473_v23 = vmul.f32 0.17677669, %v409_v17  ;;  %v601_v24 = vld [vmem:[%s9743_s15 + $0x28] sm:$0xff]  ;;  %v407_v26 = vld [vmem:[%s9729_s16 + $0x18] sm:$0xff] }
  0x82   : > { %8356 = vmatprep.mubr.msk.f32.mxu1 %vm980_vm0, %v472_v10  ;;  %662 = vperm.xlu0 %9068, %v596_v15   ;;  %v597_v25 = vld [vmem:[%s9743_s15 + $0x8] sm:$0xff]  ;;  %v411_v27 = vld [vmem:[%s9729_s16 + $0x38] sm:$0xff]  ;;  %v470_v28 = vmul.f32 0.17677669, %v406_v20  ;;  %v474_v29 = vmul.f32 0.17677669, %v410_v21 }
  0x83   : > { %8339 = vmatpush3.xpose.msk.msra.mxu0 %vm980_vm0, %v533_v8  ;;  %8353 = vmatpush3.xpose.msk.msra.mxu1 %vm980_vm0, %v537_v9  ;;  %v471_v30 = vmul.f32 0.17677669, %v407_v26  ;;  %v475_v31 = vmul.f32 0.17677669, %v411_v27  ;;  %v412_v34 = vld [vmem:[%s9729_s16 + $0x40] sm:$0xff]  ;;  %v603_v38 = vld [vmem:[%s9743_s15 + $0x38] sm:$0xff] }
  0x84   : > { %8340 = vmatprep.subr.msk.mxu0 %vm980_vm0, %v532_v12  ;;  %8354 = vmatprep.subr.msk.mxu1 %vm980_vm0, %v536_v13  ;;  %v416_v35 = vld [vmem:[%s9729_s16 + $0x60] sm:$0xff]  ;;  %v476_v40 = vmul.f32 0.17677669, %v412_v34  ;;  %v605_v44 = vld [vmem:[%s9743_s15 + $0x48] sm:$0xff]  ;;  %v602_v45 = vld [vmem:[%s9743_s15 + $0x30] sm:$0xff] }
  0x85   : > { %677 = vperm.xlu1 %9069, %v599_v14   ;;  %v600_v39 = vld [vmem:[%s9743_s15 + $0x20] sm:$0xff]  ;;  %v480_v41 = vmul.f32 0.17677669, %v416_v35  ;;  %v413_v46 = vld [vmem:[%s9729_s16 + $0x48] sm:$0xff]  ;;  %v555_v49 = vld [vmem:[%s9711_s13 + $0xb8] sm:$0xff] }
  0x86   : > { %667 = vperm.xlu0 %9068, %v597_v25   ;;  %v417_v47 = vld [vmem:[%s9729_s16 + $0x68] sm:$0xff]  ;;  %v414_v50 = vld [vmem:[%s9729_s16 + $0x50] sm:$0xff]  ;;  %v477_v52 = vmul.f32 0.17677669, %v413_v46  ;;  %v607_v54 = vld [vmem:[%s9743_s15 + $0x58] sm:$0xff] }
  0x87   : > { %8341 = vmatpush3.xpose.msk.msra.mxu0 %vm980_vm0, %v532_v12  ;;  %8355 = vmatpush3.xpose.msk.msra.mxu1 %vm980_vm0, %v536_v13  ;;  %v418_v51 = vld [vmem:[%s9729_s16 + $0x70] sm:$0xff]  ;;  %v481_v53 = vmul.f32 0.17677669, %v417_v47  ;;  %v604_v55 = vld [vmem:[%s9743_s15 + $0x40] sm:$0xff]  ;;  %v415_v56 = vld [vmem:[%s9729_s16 + $0x58] sm:$0xff] }
  0x88   : > { %8362 = vmatprep.subr.msk.mxu0 %vm980_vm0, %v543_v18  ;;  %8376 = vmatprep.subr.msk.mxu1 %vm980_vm0, %v547_v19  ;;  %v419_v57 = vld [vmem:[%s9729_s16 + $0x78] sm:$0xff]  ;;  %v478_v58 = vmul.f32 0.17677669, %v414_v50  ;;  %v482_v59 = vmul.f32 0.17677669, %v418_v51  ;;  %v550_v62 = vld [vmem:[%s9711_s13 + $0x90] sm:$0xff] }
  0x89   : > { %687 = vperm.xlu1 %9069, %v601_v24   ;;  %v479_v60 = vmul.f32 0.17677669, %v415_v56  ;;  %v483_v61 = vmul.f32 0.17677669, %v419_v57  ;;  %v554_v63 = vld [vmem:[%s9711_s13 + $0xb0] sm:$0xff]  ;;  %v420_v0 = vld [vmem:[%s9729_s16 + $0x80] sm:$0xff] }
  0x8a   : > { %8343 = vmatmul.mubr.msk.f32.vlgmr.msra.gmra.mxu0 %vm980_vm0, %v469_v22  ;;  %8357 = vmatmul.mubr.msk.f32.vlgmr.msra.gmra.mxu1 %vm980_vm0, %v473_v23  ;;  %v424_v1 = vld [vmem:[%s9729_s16 + $0xa0] sm:$0xff]  ;;  %v549_v2 = vld [vmem:[%s9711_s13 + $0x88] sm:$0xff]  ;;  %v606_v5 = vld [vmem:[%s9743_s15 + $0x50] sm:$0xff]  ;;  %v484_v6 = vmul.f32 0.17677669, %v420_v0 }
  0x8b   : > { %8363 = vmatpush3.xpose.msk.msra.mxu0 %vm980_vm0, %v543_v18  ;;  %8377 = vmatpush3.xpose.msk.msra.mxu1 %vm980_vm0, %v547_v19  ;;  %v553_v3 = vld [vmem:[%s9711_s13 + $0xa8] sm:$0xff]  ;;  %v488_v7 = vmul.f32 0.17677669, %v424_v1  ;;  %v548_v8 = vld [vmem:[%s9711_s13 + $0x80] sm:$0xff]  ;;  %v611_v10 = vld [vmem:[%s9743_s15 + $0x78] sm:$0xff] }
  0x8c   : > { %8345 = vmatprep.mubr.msk.f32.mxu0 %vm980_vm0, %v470_v28  ;;  %8359 = vmatprep.mubr.msk.f32.mxu1 %vm980_vm0, %v474_v29  ;;  %v609_v4 = vld [vmem:[%s9743_s15 + $0x68] sm:$0xff]  ;;  %v552_v9 = vld [vmem:[%s9711_s13 + $0xa0] sm:$0xff]  ;;  %v559_v14 = vld [vmem:[%s9711_s13 + $0xd8] sm:$0xff] }
  0x8d   : > { %8364 = vmatprep.subr.msk.mxu0 %vm980_vm0, %v542_v32  ;;  %8378 = vmatprep.subr.msk.mxu1 %vm980_vm0, %v546_v33  ;;  %v608_v11 = vld [vmem:[%s9743_s15 + $0x60] sm:$0xff]  ;;  %v421_v12 = vld [vmem:[%s9729_s16 + $0x88] sm:$0xff]  ;;  %v563_v15 = vld [vmem:[%s9711_s13 + $0xf8] sm:$0xff] }
  0x8e   : > { %8346 = vmatmul.mubr.msk.f32.gmra.mxu0 %vm980_vm0, %v471_v30  ;;  %8360 = vmatmul.mubr.msk.f32.gmra.mxu1 %vm980_vm0, %v475_v31  ;;  %v425_v13 = vld [vmem:[%s9729_s16 + $0xa8] sm:$0xff]  ;;  %v422_v16 = vld [vmem:[%s9729_s16 + $0x90] sm:$0xff]  ;;  %v485_v18 = vmul.f32 0.17677669, %v421_v12  ;;  %v423_v22 = vld [vmem:[%s9729_s16 + $0x98] sm:$0xff] }
  0x8f   : > { %8365 = vmatpush3.xpose.msk.msra.mxu0 %vm980_vm0, %v542_v32  ;;  %8379 = vmatpush3.xpose.msk.msra.mxu1 %vm980_vm0, %v546_v33  ;;  %v426_v17 = vld [vmem:[%s9729_s16 + $0xb0] sm:$0xff]  ;;  %v489_v19 = vmul.f32 0.17677669, %v425_v13  ;;  %v613_v20 = vld [vmem:[%s9743_s15 + $0x88] sm:$0xff]  ;;  %v427_v23 = vld [vmem:[%s9729_s16 + $0xb8] sm:$0xff] }
  0x90   : > { %8366 = vmatprep.subr.msk.mxu0 %vm980_vm0, %v541_v36  ;;  %8380 = vmatprep.subr.msk.mxu1 %vm980_vm0, %v545_v37  ;;  %v610_v21 = vld [vmem:[%s9743_s15 + $0x70] sm:$0xff]  ;;  %v486_v24 = vmul.f32 0.17677669, %v422_v16  ;;  %v490_v25 = vmul.f32 0.17677669, %v426_v17  ;;  %v428_v30 = vld [vmem:[%s9729_s16 + $0xc0] sm:$0xff] }
  0x91   : > { %697 = vperm.xlu1 %9069, %v603_v38   ;;  %682 = vperm.xlu0 %9068, %v600_v39   ;;  %v487_v26 = vmul.f32 0.17677669, %v423_v22  ;;  %v491_v27 = vmul.f32 0.17677669, %v427_v23  ;;  %v558_v28 = vld [vmem:[%s9711_s13 + $0xd0] sm:$0xff]  ;;  %v432_v31 = vld [vmem:[%s9729_s16 + $0xe0] sm:$0xff] }
  0x92   : > { %8370 = vmatprep.mubr.msk.f32.mxu0 %vm980_vm0, %v476_v40  ;;  %8384 = vmatprep.mubr.msk.f32.mxu1 %vm980_vm0, %v480_v41  ;;  %v562_v29 = vld [vmem:[%s9711_s13 + $0xf0] sm:$0xff]  ;;  %v615_v32 = vld [vmem:[%s9743_s15 + $0x98] sm:$0xff]  ;;  %v612_v33 = vld [vmem:[%s9743_s15 + $0x80] sm:$0xff] }
  0x93   : > { %8367 = vmatpush3.xpose.msk.msra.mxu0 %vm980_vm0, %v541_v36  ;;  %8381 = vmatpush3.xpose.msk.msra.mxu1 %vm980_vm0, %v545_v37  ;;  %v557_v34 = vld [vmem:[%s9711_s13 + $0xc8] sm:$0xff]  ;;  %v492_v36 = vmul.f32 0.17677669, %v428_v30  ;;  %v496_v37 = vmul.f32 0.17677669, %v432_v31  ;;  %v614_v39 = vld [vmem:[%s9743_s15 + $0x90] sm:$0xff] }
  0x94   : > { %8368 = vmatprep.subr.msk.mxu0 %vm980_vm0, %v540_v42  ;;  %8382 = vmatprep.subr.msk.mxu1 %vm980_vm0, %v544_v43  ;;  %v561_v35 = vld [vmem:[%s9711_s13 + $0xe8] sm:$0xff]  ;;  %v556_v40 = vld [vmem:[%s9711_s13 + $0xc0] sm:$0xff]  ;;  %v430_v46 = vld [vmem:[%s9729_s16 + $0xd0] sm:$0xff] }
  0x95   : > { %707 = vperm.xlu1 %9069, %v605_v44   ;;  %692 = vperm.xlu0 %9068, %v602_v45   ;;  %v617_v38 = vld [vmem:[%s9743_s15 + $0xa8] sm:$0xff]  ;;  %v560_v41 = vld [vmem:[%s9711_s13 + $0xe0] sm:$0xff]  ;;  %v434_v47 = vld [vmem:[%s9729_s16 + $0xf0] sm:$0xff] }
  0x96   : > { %v429_v44 = vld [vmem:[%s9729_s16 + $0xc8] sm:$0xff]  ;;  %v431_v50 = vld [vmem:[%s9729_s16 + $0xd8] sm:$0xff]  ;;  %v624_v1 = vld [vmem:[%s9743_s15 + $0xe0] sm:$0xff] }
  0x97   : > { %8369 = vmatpush3.xpose.msk.msra.mxu0 %vm980_vm0, %v540_v42  ;;  %8383 = vmatpush3.xpose.msk.msra.mxu1 %vm980_vm0, %v544_v43  ;;  %v619_v42 = vld [vmem:[%s9743_s15 + $0xb8] sm:$0xff]  ;;  %v616_v43 = vld [vmem:[%s9743_s15 + $0xa0] sm:$0xff]  ;;  %v433_v45 = vld [vmem:[%s9729_s16 + $0xe8] sm:$0xff]  ;;  %v495_v56 = vmul.f32 0.17677669, %v431_v50 }
  0x98   : > { %8390 = vmatprep.subr.msk.mxu0 %vm980_vm0, %v551_v48  ;;  %8404 = vmatprep.subr.msk.mxu1 %vm980_vm0, %v555_v49  ;;  %v435_v51 = vld [vmem:[%s9729_s16 + $0xf8] sm:$0xff]  ;;  %v441_v16 = vld [vmem:[%s9729_s16 + $0x128] sm:$0xff]  ;;  %v572_v30 = vld [vmem:[%s9711_s13 + $0x140] sm:$0xff] }
  0x99   : > { %717 = vperm.xlu1 %9069, %v607_v54   ;;  %702 = vperm.xlu0 %9068, %v604_v55   ;;  %v494_v54 = vmul.f32 0.17677669, %v430_v46  ;;  %v498_v55 = vmul.f32 0.17677669, %v434_v47  ;;  %v499_v57 = vmul.f32 0.17677669, %v435_v51 }
  0x9a   : > { %8371 = vmatmul.mubr.msk.f32.vlgmr.msra.gmra.mxu0 %vm980_vm0, %v477_v52  ;;  %8385 = vmatmul.mubr.msk.f32.vlgmr.msra.gmra.mxu1 %vm980_vm0, %v481_v53  ;;  %v621_v52 = vld [vmem:[%s9743_s15 + $0xc8] sm:$0xff]  ;;  %v618_v53 = vld [vmem:[%s9743_s15 + $0xb0] sm:$0xff]  ;;  %v627_v0 = vld [vmem:[%s9743_s15 + $0xf8] sm:$0xff] }
  0x9b   : > { %8391 = vmatpush3.xpose.msk.msra.mxu0 %vm980_vm0, %v551_v48  ;;  %8405 = vmatpush3.xpose.msk.msra.mxu1 %vm980_vm0, %v555_v49  ;;  %v493_v48 = vmul.f32 0.17677669, %v429_v44  ;;  %v497_v49 = vmul.f32 0.17677669, %v433_v45  ;;  %v575_v13 = vld [vmem:[%s9711_s13 + $0x158] sm:$0xff]  ;;  %v573_v22 = vld [vmem:[%s9711_s13 + $0x148] sm:$0xff] }
  0x9c   : > { %8373 = vmatprep.mubr.msk.f32.mxu0 %vm980_vm0, %v478_v58  ;;  %8387 = vmatprep.mubr.msk.f32.mxu1 %vm980_vm0, %v482_v59  ;;  %v623_v58 = vld [vmem:[%s9743_s15 + $0xd8] sm:$0xff]  ;;  %v620_v59 = vld [vmem:[%s9743_s15 + $0xc0] sm:$0xff]  ;;  %v577_v23 = vld [vmem:[%s9711_s13 + $0x168] sm:$0xff] }
  0x9d   : > { %8392 = vmatprep.subr.msk.mxu0 %vm980_vm0, %v550_v62  ;;  %8406 = vmatprep.subr.msk.mxu1 %vm980_vm0, %v554_v63  ;;  %v576_v31 = vld [vmem:[%s9711_s13 + $0x160] sm:$0xff]  ;;  %v586_v44 = vld [vmem:[%s9711_s13 + $0x1b0] sm:$0xff]  ;;  %v581_v46 = vld [vmem:[%s9711_s13 + $0x188] sm:$0xff] }
  0x9e   : > { %8374 = vmatmul.mubr.msk.f32.gmra.mxu0 %vm980_vm0, %v479_v60  ;;  %8388 = vmatmul.mubr.msk.f32.gmra.mxu1 %vm980_vm0, %v483_v61  ;;  %v625_v60 = vld [vmem:[%s9743_s15 + $0xe8] sm:$0xff]  ;;  %v622_v61 = vld [vmem:[%s9743_s15 + $0xd0] sm:$0xff] }
  0x9f   : > { %8393 = vmatpush3.xpose.msk.msra.mxu0 %vm980_vm0, %v550_v62  ;;  %8407 = vmatpush3.xpose.msk.msra.mxu1 %vm980_vm0, %v554_v63  ;;  %v567_v62 = vld [vmem:[%s9711_s13 + $0x118] sm:$0xff]  ;;  %v446_v45 = vld [vmem:[%s9729_s16 + $0x150] sm:$0xff]  ;;  %v585_v47 = vld [vmem:[%s9711_s13 + $0x1a8] sm:$0xff] }
  0xa0   : > { %8394 = vmatprep.subr.msk.mxu0 %vm980_vm0, %v549_v2  ;;  %8408 = vmatprep.subr.msk.mxu1 %vm980_vm0, %v553_v3  ;;  %v571_v63 = vld [vmem:[%s9711_s13 + $0x138] sm:$0xff]  ;;  %v450_v51 = vld [vmem:[%s9729_s16 + $0x170] sm:$0xff] }
  0xa1   : > { %727 = vperm.xlu1 %9069, %v609_v4   ;;  %712 = vperm.xlu0 %9068, %v606_v5   ;;  %v626_v4 = vld [vmem:[%s9743_s15 + $0xf0] sm:$0xff]  ;;  %v565_v5 = vld [vmem:[%s9711_s13 + $0x108] sm:$0xff] }
  0xa2   : > { %8398 = vmatprep.mubr.msk.f32.mxu0 %vm980_vm0, %v484_v6  ;;  %8412 = vmatprep.mubr.msk.f32.mxu1 %vm980_vm0, %v488_v7  ;;  %v569_v6 = vld [vmem:[%s9711_s13 + $0x128] sm:$0xff]  ;;  %v564_v7 = vld [vmem:[%s9711_s13 + $0x100] sm:$0xff] }
  0xa3   : > { %8395 = vmatpush3.xpose.msk.msra.mxu0 %vm980_vm0, %v549_v2  ;;  %8409 = vmatpush3.xpose.msk.msra.mxu1 %vm980_vm0, %v553_v3  ;;  %v566_v2 = vld [vmem:[%s9711_s13 + $0x110] sm:$0xff] }
  0xa4   : > { %8396 = vmatprep.subr.msk.mxu0 %vm980_vm0, %v548_v8  ;;  %8410 = vmatprep.subr.msk.mxu1 %vm980_vm0, %v552_v9  ;;  %v570_v3 = vld [vmem:[%s9711_s13 + $0x130] sm:$0xff] }
  0xa5   : > { %737 = vperm.xlu1 %9069, %v611_v10   ;;  %722 = vperm.xlu0 %9068, %v608_v11   ;;  %v440_v10 = vld [vmem:[%s9729_s16 + $0x120] sm:$0xff] }
  0xa6   : > { %v504_v12 = vmul.f32 0.17677669, %v440_v10 }
  0xa7   : > { %8397 = vmatpush3.xpose.msk.msra.mxu0 %vm980_vm0, %v548_v8  ;;  %8411 = vmatpush3.xpose.msk.msra.mxu1 %vm980_vm0, %v552_v9  ;;  %v568_v8 = vld [vmem:[%s9711_s13 + $0x120] sm:$0xff] }
  0xa8   : > { %8418 = vmatprep.subr.msk.mxu0 %vm980_vm0, %v559_v14  ;;  %8432 = vmatprep.subr.msk.mxu1 %vm980_vm0, %v563_v15  ;;  %v436_v9 = vld [vmem:[%s9729_s16 + $0x100] sm:$0xff] }
  0xa9   : > { %747 = vperm.xlu1 %9069, %v613_v20   ;;  %732 = vperm.xlu0 %9068, %v610_v21   ;;  %v500_v11 = vmul.f32 0.17677669, %v436_v9  ;;  %v578_v20 = vld [vmem:[%s9711_s13 + $0x170] sm:$0xff] }
  0xaa   : > { %8399 = vmatmul.mubr.msk.f32.vlgmr.msra.gmra.mxu0 %vm980_vm0, %v485_v18  ;;  %8413 = vmatmul.mubr.msk.f32.vlgmr.msra.gmra.mxu1 %vm980_vm0, %v489_v19  ;;  %v505_v18 = vmul.f32 0.17677669, %v441_v16  ;;  %v574_v19 = vld [vmem:[%s9711_s13 + $0x150] sm:$0xff] }
  0xab   : > { %8419 = vmatpush3.xpose.msk.msra.mxu0 %vm980_vm0, %v559_v14  ;;  %8433 = vmatpush3.xpose.msk.msra.mxu1 %vm980_vm0, %v563_v15  ;;  %v579_v14 = vld [vmem:[%s9711_s13 + $0x178] sm:$0xff]  ;;  %v437_v15 = vld [vmem:[%s9729_s16 + $0x108] sm:$0xff]  ;;  %v438_v21 = vld [vmem:[%s9729_s16 + $0x110] sm:$0xff] }
  0xac   : > { %8401 = vmatprep.mubr.msk.f32.mxu0 %vm980_vm0, %v486_v24  ;;  %8415 = vmatprep.mubr.msk.f32.mxu1 %vm980_vm0, %v490_v25  ;;  %v501_v17 = vmul.f32 0.17677669, %v437_v15  ;;  %v502_v24 = vmul.f32 0.17677669, %v438_v21  ;;  %v439_v25 = vld [vmem:[%s9729_s16 + $0x118] sm:$0xff]  ;;  %v464_v15 = vld [vmem:[%s9729_s16 + $0x1e0] sm:$0xff] }
  0xad   : > { %8420 = vmatprep.subr.msk.mxu0 %vm980_vm0, %v558_v28  ;;  %8434 = vmatprep.subr.msk.mxu1 %vm980_vm0, %v562_v29  ;;  %v528_v16 = vmul.f32 0.17677669, %v464_v15 }
  0xae   : > { %8402 = vmatmul.mubr.msk.f32.gmra.mxu0 %vm980_vm0, %v487_v26  ;;  %8416 = vmatmul.mubr.msk.f32.gmra.mxu1 %vm980_vm0, %v491_v27  ;;  %v503_v26 = vmul.f32 0.17677669, %v439_v25  ;;  %v442_v27 = vld [vmem:[%s9729_s16 + $0x130] sm:$0xff]  ;;  %v460_v25 = vld [vmem:[%s9729_s16 + $0x1c0] sm:$0xff] }
  0xaf   : > { %757 = vperm.xlu1 %9069, %v615_v32   ;;  %742 = vperm.xlu0 %9068, %v612_v33   ;;  %v444_v33 = vld [vmem:[%s9729_s16 + $0x140] sm:$0xff] }
  0xb0   : > { %8421 = vmatpush3.xpose.msk.msra.mxu0 %vm980_vm0, %v558_v28  ;;  %8435 = vmatpush3.xpose.msk.msra.mxu1 %vm980_vm0, %v562_v29  ;;  %v506_v28 = vmul.f32 0.17677669, %v442_v27  ;;  %v443_v29 = vld [vmem:[%s9729_s16 + $0x138] sm:$0xff]  ;;  %v461_v27 = vld [vmem:[%s9729_s16 + $0x1c8] sm:$0xff] }
  0xb1   : > { %8422 = vmatprep.subr.msk.mxu0 %vm980_vm0, %v557_v34  ;;  %8436 = vmatprep.subr.msk.mxu1 %vm980_vm0, %v561_v35  ;;  %v507_v32 = vmul.f32 0.17677669, %v443_v29  ;;  %v462_v29 = vld [vmem:[%s9729_s16 + $0x1d0] sm:$0xff] }
  0xb2   : > { %8426 = vmatprep.mubr.msk.f32.mxu0 %vm980_vm0, %v492_v36  ;;  %8440 = vmatprep.mubr.msk.f32.mxu1 %vm980_vm0, %v496_v37  ;;  %v583_v37 = vld [vmem:[%s9711_s13 + $0x198] sm:$0xff] }
  0xb3   : > { %767 = vperm.xlu1 %9069, %v617_v38   ;;  %752 = vperm.xlu0 %9068, %v614_v39   ;;  %v587_v38 = vld [vmem:[%s9711_s13 + $0x1b8] sm:$0xff]  ;;  %v445_v39 = vld [vmem:[%s9729_s16 + $0x148] sm:$0xff] }
  0xb4   : > { %8423 = vmatpush3.xpose.msk.msra.mxu0 %vm980_vm0, %v557_v34  ;;  %8437 = vmatpush3.xpose.msk.msra.mxu1 %vm980_vm0, %v561_v35  ;;  %v448_v34 = vld [vmem:[%s9729_s16 + $0x160] sm:$0xff]  ;;  %v508_v35 = vmul.f32 0.17677669, %v444_v33 }
  0xb5   : > { %8424 = vmatprep.subr.msk.mxu0 %vm980_vm0, %v556_v40  ;;  %8438 = vmatprep.subr.msk.mxu1 %vm980_vm0, %v560_v41  ;;  %v512_v36 = vmul.f32 0.17677669, %v448_v34 }
  0xb7   : > { %777 = vperm.xlu1 %9069, %v619_v42   ;;  %762 = vperm.xlu0 %9068, %v616_v43   ;;  %v582_v43 = vld [vmem:[%s9711_s13 + $0x190] sm:$0xff] }
  0xb8   : > { %8425 = vmatpush3.xpose.msk.msra.mxu0 %vm980_vm0, %v556_v40  ;;  %8439 = vmatpush3.xpose.msk.msra.mxu1 %vm980_vm0, %v560_v41  ;;  %v449_v40 = vld [vmem:[%s9729_s16 + $0x168] sm:$0xff]  ;;  %v509_v41 = vmul.f32 0.17677669, %v445_v39 }
  0xb9   : > { %8446 = vmatprep.subr.msk.mxu0 %vm980_vm0, %v567_v62  ;;  %8460 = vmatprep.subr.msk.mxu1 %vm980_vm0, %v571_v63  ;;  %v513_v42 = vmul.f32 0.17677669, %v449_v40 }
  0xbb   : > { %8427 = vmatmul.mubr.msk.f32.vlgmr.msra.gmra.mxu0 %vm980_vm0, %v493_v48  ;;  %8441 = vmatmul.mubr.msk.f32.vlgmr.msra.gmra.mxu1 %vm980_vm0, %v497_v49  ;;  %v510_v48 = vmul.f32 0.17677669, %v446_v45  ;;  %v447_v49 = vld [vmem:[%s9729_s16 + $0x158] sm:$0xff] }
  0xbc   : > { %787 = vperm.xlu1 %9069, %v621_v52   ;;  %772 = vperm.xlu0 %9068, %v618_v53   ;;  %v511_v50 = vmul.f32 0.17677669, %v447_v49  ;;  %v514_v52 = vmul.f32 0.17677669, %v450_v51  ;;  %v451_v53 = vld [vmem:[%s9729_s16 + $0x178] sm:$0xff] }
  0xbd   : > { %8429 = vmatprep.mubr.msk.f32.mxu0 %vm980_vm0, %v494_v54  ;;  %8443 = vmatprep.mubr.msk.f32.mxu1 %vm980_vm0, %v498_v55  ;;  %v515_v54 = vmul.f32 0.17677669, %v451_v53  ;;  %v580_v55 = vld [vmem:[%s9711_s13 + $0x180] sm:$0xff] }
  0xbe   : > { %8447 = vmatpush3.xpose.msk.msra.mxu0 %vm980_vm0, %v567_v62  ;;  %8461 = vmatpush3.xpose.msk.msra.mxu1 %vm980_vm0, %v571_v63  ;;  %v595_v63 = vld [vmem:[%s9711_s13 + $0x1f8] sm:$0xff] }
  0xbf   : > { %8430 = vmatmul.mubr.msk.f32.gmra.mxu0 %vm980_vm0, %v495_v56  ;;  %8444 = vmatmul.mubr.msk.f32.gmra.mxu1 %vm980_vm0, %v499_v57  ;;  %v584_v56 = vld [vmem:[%s9711_s13 + $0x1a0] sm:$0xff] }
  0xc0   : > { %797 = vperm.xlu1 %9069, %v623_v58   ;;  %782 = vperm.xlu0 %9068, %v620_v59   ;;  %v452_v57 = vld [vmem:[%s9729_s16 + $0x180] sm:$0xff]  ;;  %v453_v59 = vld [vmem:[%s9729_s16 + $0x188] sm:$0xff] }
  0xc1   : > { %8448 = vmatprep.subr.msk.mxu0 %vm980_vm0, %v566_v2  ;;  %8462 = vmatprep.subr.msk.mxu1 %vm980_vm0, %v570_v3  ;;  %v516_v58 = vmul.f32 0.17677669, %v452_v57 }
  0xc2   : > { %8449 = vmatpush3.xpose.msk.msra.mxu0 %vm980_vm0, %v566_v2  ;;  %8463 = vmatpush3.xpose.msk.msra.mxu1 %vm980_vm0, %v570_v3  ;;  %v454_v2 = vld [vmem:[%s9729_s16 + $0x190] sm:$0xff] }
  0xc3   : > { %8450 = vmatprep.subr.msk.mxu0 %vm980_vm0, %v565_v5  ;;  %8464 = vmatprep.subr.msk.mxu1 %vm980_vm0, %v569_v6  ;;  %v518_v3 = vmul.f32 0.17677669, %v454_v2 }
  0xc4   : > { %807 = vperm.xlu1 %9069, %v625_v60   ;;  %792 = vperm.xlu0 %9068, %v622_v61   ;;  %v456_v60 = vld [vmem:[%s9729_s16 + $0x1a0] sm:$0xff]  ;;  %v517_v61 = vmul.f32 0.17677669, %v453_v59 }
  0xc5   : > { %8454 = vmatprep.mubr.msk.f32.mxu0 %vm980_vm0, %v500_v11  ;;  %8468 = vmatprep.mubr.msk.f32.mxu1 %vm980_vm0, %v504_v12  ;;  %v520_v62 = vmul.f32 0.17677669, %v456_v60  ;;  %v591_v11 = vld [vmem:[%s9711_s13 + $0x1d8] sm:$0xff]  ;;  %v593_v12 = vld [vmem:[%s9711_s13 + $0x1e8] sm:$0xff] }
  0xc6   : > { %8451 = vmatpush3.xpose.msk.msra.mxu0 %vm980_vm0, %v565_v5  ;;  %8465 = vmatpush3.xpose.msk.msra.mxu1 %vm980_vm0, %v569_v6  ;;  %v594_v6 = vld [vmem:[%s9711_s13 + $0x1f0] sm:$0xff] }
  0xc7   : > { %8452 = vmatprep.subr.msk.mxu0 %vm980_vm0, %v564_v7  ;;  %8466 = vmatprep.subr.msk.mxu1 %vm980_vm0, %v568_v8 }
  0xc8   : > { %817 = vperm.xlu1 %9069, %v627_v0   ;;  %802 = vperm.xlu0 %9068, %v624_v1   ;;  %v457_v0 = vld [vmem:[%s9729_s16 + $0x1a8] sm:$0xff] }
  0xc9   : > { %v521_v1 = vmul.f32 0.17677669, %v457_v0 }
  0xca   : > { %8453 = vmatpush3.xpose.msk.msra.mxu0 %vm980_vm0, %v564_v7  ;;  %8467 = vmatpush3.xpose.msk.msra.mxu1 %vm980_vm0, %v568_v8  ;;  %v458_v7 = vld [vmem:[%s9729_s16 + $0x1b0] sm:$0xff]  ;;  %v459_v8 = vld [vmem:[%s9729_s16 + $0x1b8] sm:$0xff] }
  0xcb   : > { %8474 = vmatprep.subr.msk.mxu0 %vm980_vm0, %v575_v13  ;;  %8488 = vmatprep.subr.msk.mxu1 %vm980_vm0, %v579_v14  ;;  %v522_v9 = vmul.f32 0.17677669, %v458_v7  ;;  %v523_v10 = vmul.f32 0.17677669, %v459_v8 }
  0xcc   : > { %812 = vperm.xlu0 %9068, %v626_v4   ;;  %v455_v4 = vld [vmem:[%s9729_s16 + $0x198] sm:$0xff] }
  0xcd   : > { %8455 = vmatmul.mubr.msk.f32.vlgmr.msra.gmra.mxu0 %vm980_vm0, %v501_v17  ;;  %8469 = vmatmul.mubr.msk.f32.vlgmr.msra.gmra.mxu1 %vm980_vm0, %v505_v18  ;;  %v519_v5 = vmul.f32 0.17677669, %v455_v4  ;;  %v465_v17 = vld [vmem:[%s9729_s16 + $0x1e8] sm:$0xff] }
  0xce   : > { %8475 = vmatpush3.xpose.msk.msra.mxu0 %vm980_vm0, %v575_v13  ;;  %8489 = vmatpush3.xpose.msk.msra.mxu1 %vm980_vm0, %v579_v14  ;;  %v590_v13 = vld [vmem:[%s9711_s13 + $0x1d0] sm:$0xff]  ;;  %v592_v14 = vld [vmem:[%s9711_s13 + $0x1e0] sm:$0xff]  ;;  %v529_v18 = vmul.f32 0.17677669, %v465_v17 }
  0xcf   : > { %8476 = vmatprep.subr.msk.mxu0 %vm980_vm0, %v574_v19  ;;  %8490 = vmatprep.subr.msk.mxu1 %vm980_vm0, %v578_v20 }
  0xd0   : > { %8457 = vmatprep.mubr.msk.f32.mxu0 %vm980_vm0, %v502_v24  ;;  %8471 = vmatprep.mubr.msk.f32.mxu1 %vm980_vm0, %v506_v28  ;;  %v588_v24 = vld [vmem:[%s9711_s13 + $0x1c0] sm:$0xff]  ;;  %v525_v28 = vmul.f32 0.17677669, %v461_v27 }
  0xd1   : > { %8458 = vmatmul.mubr.msk.f32.gmra.mxu0 %vm980_vm0, %v503_v26  ;;  %8472 = vmatmul.mubr.msk.f32.gmra.mxu1 %vm980_vm0, %v507_v32  ;;  %v524_v26 = vmul.f32 0.17677669, %v460_v25 }
  0xd2   : > { %8477 = vmatpush3.xpose.msk.msra.mxu0 %vm980_vm0, %v574_v19  ;;  %8491 = vmatpush3.xpose.msk.msra.mxu1 %vm980_vm0, %v578_v20  ;;  %v589_v19 = vld [vmem:[%s9711_s13 + $0x1c8] sm:$0xff]  ;;  %v466_v20 = vld [vmem:[%s9729_s16 + $0x1f0] sm:$0xff] }
  0xd3   : > { %8478 = vmatprep.subr.msk.mxu0 %vm980_vm0, %v573_v22  ;;  %8492 = vmatprep.subr.msk.mxu1 %vm980_vm0, %v577_v23  ;;  %v530_v21 = vmul.f32 0.17677669, %v466_v20 }
  0xd4   : > { %8482 = vmatprep.mubr.msk.f32.mxu0 %vm980_vm0, %v508_v35  ;;  %8496 = vmatprep.mubr.msk.f32.mxu1 %vm980_vm0, %v512_v36 }
  0xd6   : > { %8479 = vmatpush3.xpose.msk.msra.mxu0 %vm980_vm0, %v573_v22  ;;  %8493 = vmatpush3.xpose.msk.msra.mxu1 %vm980_vm0, %v577_v23  ;;  %v467_v22 = vld [vmem:[%s9729_s16 + $0x1f8] sm:$0xff] }
  0xd7   : > { %8480 = vmatprep.subr.msk.mxu0 %vm980_vm0, %v572_v30  ;;  %8494 = vmatprep.subr.msk.mxu1 %vm980_vm0, %v576_v31  ;;  %v531_v23 = vmul.f32 0.17677669, %v467_v22 }
  0xda   : > { %8481 = vmatpush3.xpose.msk.msra.mxu0 %vm980_vm0, %v572_v30  ;;  %8495 = vmatpush3.xpose.msk.msra.mxu1 %vm980_vm0, %v576_v31  ;;  %v526_v30 = vmul.f32 0.17677669, %v462_v29  ;;  %v463_v31 = vld [vmem:[%s9729_s16 + $0x1d8] sm:$0xff] }
  0xdb   : > { %8502 = vmatprep.subr.msk.mxu0 %vm980_vm0, %v583_v37  ;;  %8516 = vmatprep.subr.msk.mxu1 %vm980_vm0, %v587_v38  ;;  %v527_v32 = vmul.f32 0.17677669, %v463_v31 }
  0xdd   : > { %8483 = vmatmul.mubr.msk.f32.vlgmr.msra.gmra.mxu0 %vm980_vm0, %v509_v41  ;;  %8497 = vmatmul.mubr.msk.f32.vlgmr.msra.gmra.mxu1 %vm980_vm0, %v513_v42 }
  0xde   : > { %8503 = vmatpush3.xpose.msk.msra.mxu0 %vm980_vm0, %v583_v37  ;;  %8517 = vmatpush3.xpose.msk.msra.mxu1 %vm980_vm0, %v587_v38 }
  0xdf   : > { %8504 = vmatprep.subr.msk.mxu0 %vm980_vm0, %v582_v43  ;;  %8518 = vmatprep.subr.msk.mxu1 %vm980_vm0, %v586_v44 }
  0xe0   : > { %8485 = vmatprep.mubr.msk.f32.mxu0 %vm980_vm0, %v510_v48  ;;  %8499 = vmatprep.mubr.msk.f32.mxu1 %vm980_vm0, %v514_v52 }
  0xe1   : > { %8486 = vmatmul.mubr.msk.f32.gmra.mxu0 %vm980_vm0, %v511_v50  ;;  %8500 = vmatmul.mubr.msk.f32.gmra.mxu1 %vm980_vm0, %v515_v54 }
  0xe2   : > { %8505 = vmatpush3.xpose.msk.msra.mxu0 %vm980_vm0, %v582_v43  ;;  %8519 = vmatpush3.xpose.msk.msra.mxu1 %vm980_vm0, %v586_v44 }
  0xe3   : > { %8506 = vmatprep.subr.msk.mxu0 %vm980_vm0, %v581_v46  ;;  %8520 = vmatprep.subr.msk.mxu1 %vm980_vm0, %v585_v47 }
  0xe4   : > { %8510 = vmatprep.mubr.msk.f32.mxu0 %vm980_vm0, %v516_v58  ;;  %8524 = vmatprep.mubr.msk.f32.mxu1 %vm980_vm0, %v520_v62 }
  0xe6   : > { %8507 = vmatpush3.xpose.msk.msra.mxu0 %vm980_vm0, %v581_v46  ;;  %8521 = vmatpush3.xpose.msk.msra.mxu1 %vm980_vm0, %v585_v47 }
  0xe7   : > { %8508 = vmatprep.subr.msk.mxu0 %vm980_vm0, %v580_v55  ;;  %8522 = vmatprep.subr.msk.mxu1 %vm980_vm0, %v584_v56 }
  0xea   : > { %8509 = vmatpush3.xpose.msk.msra.mxu0 %vm980_vm0, %v580_v55  ;;  %8523 = vmatpush3.xpose.msk.msra.mxu1 %vm980_vm0, %v584_v56 }
  0xeb   : > { %8544 = vmatprep.subr.msk.mxu1 %vm980_vm0, %v595_v63  ;;  %8530 = vmatprep.subr.msk.mxu0 %vm980_vm0, %v591_v11 }
  0xed   : > { %8511 = vmatmul.mubr.msk.f32.vlgmr.msra.gmra.mxu0 %vm980_vm0, %v517_v61  ;;  %8525 = vmatmul.mubr.msk.f32.vlgmr.msra.gmra.mxu1 %vm980_vm0, %v521_v1 }
  0xee   : > { %8545 = vmatpush3.xpose.msk.msra.mxu1 %vm980_vm0, %v595_v63  ;;  %8513 = vmatprep.mubr.msk.f32.mxu0 %vm980_vm0, %v518_v3 }
  0xef   : > { %8546 = vmatprep.subr.msk.mxu1 %vm980_vm0, %v594_v6  ;;  %8527 = vmatprep.mubr.msk.f32.mxu1 %vm980_vm0, %v522_v9 }
  0xf0   : > { %8531 = vmatpush3.xpose.msk.msra.mxu0 %vm980_vm0, %v591_v11 }
  0xf1   : > { %8514 = vmatmul.mubr.msk.f32.gmra.mxu0 %vm980_vm0, %v519_v5  ;;  %8528 = vmatmul.mubr.msk.f32.gmra.mxu1 %vm980_vm0, %v523_v10 }
  0xf2   : > { %8547 = vmatpush3.xpose.msk.msra.mxu1 %vm980_vm0, %v594_v6  ;;  %8532 = vmatprep.subr.msk.mxu0 %vm980_vm0, %v590_v13 }
  0xf3   : > { %8548 = vmatprep.subr.msk.mxu1 %vm980_vm0, %v593_v12  ;;  %8552 = vmatprep.mubr.msk.f32.mxu1 %vm980_vm0, %v528_v16 }
  0xf4   : > { %8533 = vmatpush3.xpose.msk.msra.mxu0 %vm980_vm0, %v590_v13  ;;  %8538 = vmatprep.mubr.msk.f32.mxu0 %vm980_vm0, %v524_v26 }
  0xf5   : > { %8534 = vmatprep.subr.msk.mxu0 %vm980_vm0, %v589_v19 }
  0xf6   : > { %8549 = vmatpush3.xpose.msk.msra.mxu1 %vm980_vm0, %v593_v12 }
  0xf7   : > { %8550 = vmatprep.subr.msk.mxu1 %vm980_vm0, %v592_v14 }
  0xf8   : > { %8535 = vmatpush3.xpose.msk.msra.mxu0 %vm980_vm0, %v589_v19 }
  0xf9   : > { %8536 = vmatprep.subr.msk.mxu0 %vm980_vm0, %v588_v24 }
  0xfa   : > { %8551 = vmatpush3.xpose.msk.msra.mxu1 %vm980_vm0, %v592_v14 }
  0xfc   : > { %8537 = vmatpush3.xpose.msk.msra.mxu0 %vm980_vm0, %v588_v24  ;;  %v673_v33 = vpop.permute.xlu1 %672 }
  0xfd   : > { %8553 = vmatmul.mubr.msk.f32.vlgmr.msra.gmra.mxu1 %vm980_vm0, %v529_v18  ;;  %v663_v34 = vpop.permute.xlu0 %662 }
  0xfe   : > { %8555 = vmatprep.mubr.msk.f32.mxu1 %vm980_vm0, %v530_v21 }
  0xff   : > { %8539 = vmatmul.mubr.msk.f32.vlgmr.msra.gmra.mxu0 %vm980_vm0, %v525_v28 }
 0x100   : > { %8541 = vmatprep.mubr.msk.f32.mxu0 %vm980_vm0, %v526_v30  ;;  %v678_v35 = vpop.permute.xlu1 %677 }
 0x101   : > { %8556 = vmatmul.mubr.msk.f32.gmra.mxu1 %vm980_vm0, %v531_v23  ;;  %v668_v36 = vpop.permute.xlu0 %667 }
 0x103   : > { %8542 = vmatmul.mubr.msk.f32.gmra.mxu0 %vm980_vm0, %v527_v32 }
 0x104   : > { %v688_v37 = vpop.permute.xlu1 %687 }
 0x10c   : > { %v683_v38 = vpop.permute.xlu0 %682  ;;  %v698_v39 = vpop.permute.xlu1 %697 }
 0x110   : > { %v693_v40 = vpop.permute.xlu0 %692  ;;  %v708_v41 = vpop.permute.xlu1 %707 }
 0x114   : > { %v703_v42 = vpop.permute.xlu0 %702  ;;  %v10088_v43 = vpop.permute.xlu1 %717 }
 0x11c   : > { %v10090_v44 = vpop.permute.xlu0 %712  ;;  %v728_v45 = vpop.permute.xlu1 %727 }
 0x120   : > { %v723_v52 = vpop.permute.xlu0 %722  ;;  %v738_v59 = vpop.permute.xlu1 %737 }
 0x124   : > { %v733_v2 = vpop.permute.xlu0 %732  ;;  %v10112_v3 = vpop.permute.xlu1 %747 }
 0x12a   : > { %v10122_v8 = vpop.permute.xlu0 %742  ;;  %v758_v13 = vpop.permute.xlu1 %757 }
 0x12e   : > { %v753_v22 = vpop.permute.xlu0 %752  ;;  %v768_v24 = vpop.permute.xlu1 %767 }
 0x132   : > { %v763_v29 = vpop.permute.xlu0 %762 }
 0x14a   : > { %v8344_v46 = vpop.f32.mrf.mxu0  ;;  %v8358_v47 = vpop.f32.mrf.mxu1 }
 0x14b   : > { %v10092_v48 = vadd.f32 %v8344_v46, %v668_v36  ;;  %v10094_v49 = vadd.f32 %v8358_v47, %v688_v37 }
 0x14c   : > { %v1071_v50 = vpop.f32.mrf.mxu0  ;;  %v1180_v51 = vpop.f32.mrf.mxu1 }
 0x14d   : > { %v10096_v53 = vadd.f32 %v1071_v50, %v663_v34  ;;  %v10098_v54 = vadd.f32 %v1180_v51, %v683_v38  ;;  %v2740_v55 = vsel %vm980_vm0, %v10094_v49, -inf  ;;  %v2728_v56 = vsel %vm980_vm0, %v10092_v48, -inf }
 0x14e   : > { %2741 = vmax.xlane.f32.xlu1 %v2740_v55  ;;  %v8361_v57 = vpop.f32.mrf.mxu1  ;;  %2729 = vmax.xlane.f32.xlu0 %v2728_v56  ;;  %v8347_v58 = vpop.f32.mrf.mxu0 }
 0x14f   : > { %v10104_v60 = vadd.f32 %v8361_v57, %v698_v39  ;;  %v10106_v61 = vadd.f32 %v8347_v58, %v678_v35  ;;  %v2737_v62 = vsel %vm980_vm0, %v10098_v54, -inf  ;;  %v2725_v63 = vsel %vm980_vm0, %v10096_v53, -inf  ;;  %v773_v39 = vpop.permute.xlu0 %772 }
 0x150   : > { %v1081_v0 = vpop.f32.mrf.mxu0  ;;  %v1190_v1 = vpop.f32.mrf.mxu1 }
 0x151   : > { %v10114_v4 = vadd.f32 %v1081_v0, %v673_v33  ;;  %v10116_v5 = vadd.f32 %v1190_v1, %v693_v40  ;;  %v2734_v6 = vsel %vm980_vm0, %v10106_v61, -inf  ;;  %v2746_v7 = vsel %vm980_vm0, %v10104_v60, -inf  ;;  %v778_v33 = vpop.permute.xlu1 %777 }
 0x152   : > { %2738 = vmax.xlane.f32.xlu1 %v2737_v62  ;;  %2726 = vmax.xlane.f32.xlu0 %v2725_v63 }
 0x153   : > { %v2743_v9 = vsel %vm980_vm0, %v10116_v5, -inf  ;;  %v2731_v10 = vsel %vm980_vm0, %v10114_v4, -inf  ;;  %v10170_v57 = vpop.permute.xlu0 %782 }
 0x156   : > { %2735 = vmax.xlane.f32.xlu1 %v2734_v6  ;;  %2747 = vmax.xlane.f32.xlu0 %v2746_v7 }
 0x15a   : > { %v8386_v11 = vpop.f32.mrf.mxu1  ;;  %2744 = vmax.xlane.f32.xlu1 %v2743_v9  ;;  %v8372_v12 = vpop.f32.mrf.mxu0  ;;  %2732 = vmax.xlane.f32.xlu0 %v2731_v10 }
 0x15b   : > { %v10128_v14 = vadd.f32 %v8386_v11, %v728_v45  ;;  %v10130_v15 = vadd.f32 %v8372_v12, %v708_v41 }
 0x15c   : > { %v1289_v16 = vpop.f32.mrf.mxu0  ;;  %v1398_v17 = vpop.f32.mrf.mxu1 }
 0x15d   : > { %v10132_v18 = vadd.f32 %v1289_v16, %v703_v42  ;;  %v2764_v19 = vsel %vm980_vm0, %v10128_v14, -inf  ;;  %v2752_v20 = vsel %vm980_vm0, %v10130_v15, -inf  ;;  %v10140_v25 = vadd.f32 %v1398_v17, %v723_v52  ;;  %v788_v42 = vpop.permute.xlu1 %787 }
 0x15e   : > { %v8389_v21 = vpop.f32.mrf.mxu1  ;;  %2765 = vmax.xlane.f32.xlu1 %v2764_v19  ;;  %2753 = vmax.xlane.f32.xlu0 %v2752_v20  ;;  %v8375_v28 = vpop.f32.mrf.mxu0 }
 0x15f   : > { %v10138_v23 = vadd.f32 %v8389_v21, %v738_v59  ;;  %v2749_v26 = vsel %vm980_vm0, %v10132_v18, -inf  ;;  %v10147_v30 = vadd.f32 %v8375_v28, %v10088_v43  ;;  %v2761_v31 = vsel %vm980_vm0, %v10140_v25, -inf }
 0x160   : > { %v1299_v32 = vpop.f32.mrf.mxu0  ;;  %v1408_v34 = vpop.f32.mrf.mxu1 }
 0x161   : > { %v2770_v27 = vsel %vm980_vm0, %v10138_v23, -inf  ;;  %v10152_v35 = vadd.f32 %v1299_v32, %v10090_v44  ;;  %v2758_v36 = vsel %vm980_vm0, %v10147_v30, -inf  ;;  %v10156_v43 = vadd.f32 %v1408_v34, %v733_v2  ;;  %v798_v59 = vpop.permute.xlu1 %797  ;;  %v793_v2 = vpop.permute.xlu0 %792 }
 0x162   : > { %2750 = vmax.xlane.f32.xlu1 %v2749_v26  ;;  %2771 = vmax.xlane.f32.xlu0 %v2770_v27 }
 0x163   : > { %v2755_v45 = vsel %vm980_vm0, %v10152_v35, -inf  ;;  %v2767_v55 = vsel %vm980_vm0, %v10156_v43, -inf }
 0x165   : > { %v808_v10 = vpop.permute.xlu1 %807  ;;  %v10200_v20 = vpop.permute.xlu0 %802 }
 0x166   : > { %2762 = vmax.xlane.f32.xlu1 %v2761_v31 }
 0x169   : > { %v813_v34 = vpop.permute.xlu0 %812 }
 0x16a   : > { %v8400_v37 = vpop.f32.mrf.mxu0  ;;  %v8414_v38 = vpop.f32.mrf.mxu1  ;;  %2759 = vmax.xlane.f32.xlu1 %v2758_v36 }
 0x16b   : > { %v10173_v62 = vadd.f32 %v8400_v37, %v10112_v3  ;;  %v10181_v6 = vadd.f32 %v8414_v38, %v768_v24  ;;  %v818_v24 = vpop.permute.xlu1 %817 }
 0x16c   : > { %v1507_v40 = vpop.f32.mrf.mxu0  ;;  %v1616_v41 = vpop.f32.mrf.mxu1 }
 0x16d   : > { %11844 = vst [vmem:[#allocation15_spill] sm:$0xff] %v10181_v6  ;;  %v10184_v7 = vadd.f32 %v1507_v40, %v10122_v8  ;;  %v2776_v9 = vsel %vm980_vm0, %v10173_v62, -inf  ;;  %v2788_v8 = vsel %vm980_vm0, %v10181_v6, -inf }
 0x16e   : > { %v8403_v46 = vpop.f32.mrf.mxu0  ;;  %v8417_v47 = vpop.f32.mrf.mxu1  ;;  %2756 = vmax.xlane.f32.xlu1 %v2755_v45 }
 0x16f   : > { %v10160_v44 = vadd.f32 %v8403_v46, %v758_v13  ;;  %v10162_v51 = vadd.f32 %v8417_v47, %v778_v33  ;;  %11845 = vst [vmem:[#allocation16_spill] sm:$0xff] %v10184_v7  ;;  %v10190_v13 = vadd.f32 %v1616_v41, %v763_v29  ;;  %v2773_v19 = vsel %vm980_vm0, %v10184_v7, -inf  ;;  %v629_v46 = vld [vmem:[%s9743_s15 + $0x108] sm:$0xff]  ;;  %v628_v47 = vld [vmem:[%s9743_s15 + $0x100] sm:$0xff] }
 0x170   : > { %v1517_v50 = vpop.f32.mrf.mxu0  ;;  %v1626_v58 = vpop.f32.mrf.mxu1 }
 0x171   : > { %v10164_v52 = vadd.f32 %v1517_v50, %v753_v22  ;;  %v2782_v56 = vsel %vm980_vm0, %v10160_v44, -inf  ;;  %v10175_v63 = vadd.f32 %v1626_v58, %v773_v39  ;;  %v2794_v0 = vsel %vm980_vm0, %v10162_v51, -inf  ;;  %11846 = vst [vmem:[#allocation17_spill] sm:$0xff] %v10190_v13  ;;  %v631_v50 = vld [vmem:[%s9743_s15 + $0x118] sm:$0xff]  ;;  %v632_v58 = vld [vmem:[%s9743_s15 + $0x120] sm:$0xff] }
 0x172   : > { %2768 = vmax.xlane.f32.xlu1 %v2767_v55  ;;  %2783 = vmax.xlane.f32.xlu0 %v2782_v56  ;;  %v2785_v29 = vsel %vm980_vm0, %v10190_v13, -inf  ;;  %v630_v55 = vld [vmem:[%s9743_s15 + $0x110] sm:$0xff]  ;;  %v633_v56 = vld [vmem:[%s9743_s15 + $0x128] sm:$0xff] }
 0x173   : > { %v2779_v1 = vsel %vm980_vm0, %v10164_v52, -inf  ;;  %v2791_v3 = vsel %vm980_vm0, %v10175_v63, -inf  ;;  %v3438_v13 = vld [vmem:[%s9719_s27 + $0x48] sm:$0xff] }
 0x176   : > { %2795 = vmax.xlane.f32.xlu1 %v2794_v0  ;;  %2780 = vmax.xlane.f32.xlu0 %v2779_v1  ;;  %v634_v0 = vld [vmem:[%s9743_s15 + $0x130] sm:$0xff]  ;;  %v637_v1 = vld [vmem:[%s9743_s15 + $0x148] sm:$0xff] }
 0x17a   : > { %2792 = vmax.xlane.f32.xlu1 %v2791_v3  ;;  %2777 = vmax.xlane.f32.xlu0 %v2776_v9  ;;  %v643_v3 = vld [vmem:[%s9743_s15 + $0x178] sm:$0xff]  ;;  %v638_v9 = vld [vmem:[%s9743_s15 + $0x150] sm:$0xff] }
 0x17b   : > { %v8428_v11 = vpop.f32.mrf.mxu0  ;;  %v8442_v12 = vpop.f32.mrf.mxu1 }
 0x17c   : > { %v10216_v38 = vadd.f32 %v8428_v11, %v788_v42  ;;  %v10220_v40 = vadd.f32 %v8442_v12, %v808_v10  ;;  %v641_v10 = vld [vmem:[%s9743_s15 + $0x168] sm:$0xff]  ;;  %v639_v11 = vld [vmem:[%s9743_s15 + $0x158] sm:$0xff] }
 0x17d   : > { %v10192_v16 = vpop.f32.mrf.mxu0  ;;  %v10194_v17 = vpop.f32.mrf.mxu1  ;;  %v647_v12 = vld [vmem:[%s9743_s15 + $0x198] sm:$0xff] }
 0x17e   : > { %2789 = vmax.xlane.f32.xlu1 %v2788_v8  ;;  %2774 = vmax.xlane.f32.xlu0 %v2773_v19  ;;  %11851 = vst [vmem:[#allocation22_spill] sm:$0xff] %v10216_v38  ;;  %11852 = vst [vmem:[#allocation23_spill] sm:$0xff] %v10220_v40  ;;  %v2800_v45 = vsel %vm980_vm0, %v10216_v38, -inf  ;;  %v2812_v42 = vsel %vm980_vm0, %v10220_v40, -inf  ;;  %v642_v8 = vld [vmem:[%s9743_s15 + $0x170] sm:$0xff]  ;;  %v3497_v40 = vld [vmem:[%s10323_s17 + $0x20] sm:$0xff] }
 0x17f   : > { %v8431_v21 = vpop.f32.mrf.mxu0  ;;  %v8445_v22 = vpop.f32.mrf.mxu1  ;;  %v650_v19 = vld [vmem:[%s9743_s15 + $0x1b0] sm:$0xff] }
 0x180   : > { %v10202_v26 = vadd.f32 %v8431_v21, %v798_v59  ;;  %v10204_v27 = vadd.f32 %v8445_v22, %v818_v24  ;;  %v635_v59 = vld [vmem:[%s9743_s15 + $0x138] sm:$0xff]  ;;  %v640_v21 = vld [vmem:[%s9743_s15 + $0x160] sm:$0xff]  ;;  %v649_v22 = vld [vmem:[%s9743_s15 + $0x1a8] sm:$0xff] }
 0x181   : > { %v1735_v28 = vpop.f32.mrf.mxu0  ;;  %v1844_v32 = vpop.f32.mrf.mxu1  ;;  %v651_v24 = vld [vmem:[%s9743_s15 + $0x1b8] sm:$0xff] }
 0x182   : > { %11847 = vst [vmem:[#allocation18_spill] sm:$0xff] %v10202_v26  ;;  %11848 = vst [vmem:[#allocation19_spill] sm:$0xff] %v10204_v27  ;;  %v10208_v31 = vadd.f32 %v1735_v28, %v793_v2  ;;  %2786 = vmax.xlane.f32.xlu1 %v2785_v29  ;;  %v2806_v33 = vsel %vm980_vm0, %v10202_v26, -inf  ;;  %v10212_v36 = vadd.f32 %v1844_v32, %v813_v34  ;;  %v2818_v37 = vsel %vm980_vm0, %v10204_v27, -inf  ;;  %v636_v2 = vld [vmem:[%s9743_s15 + $0x140] sm:$0xff]  ;;  %v646_v29 = vld [vmem:[%s9743_s15 + $0x190] sm:$0xff] }
 0x183   : > { %2807 = vmax.xlane.f32.xlu0 %v2806_v33  ;;  %v648_v28 = vld [vmem:[%s9743_s15 + $0x1a0] sm:$0xff]  ;;  %v659_v32 = vld [vmem:[%s9743_s15 + $0x1f8] sm:$0xff]  ;;  %v645_v33 = vld [vmem:[%s9743_s15 + $0x188] sm:$0xff] }
 0x184   : > { %11849 = vst [vmem:[#allocation20_spill] sm:$0xff] %v10208_v31  ;;  %11850 = vst [vmem:[#allocation21_spill] sm:$0xff] %v10212_v36  ;;  %v2803_v39 = vsel %vm980_vm0, %v10208_v31, -inf  ;;  %v2815_v41 = vsel %vm980_vm0, %v10212_v36, -inf  ;;  %v658_v34 = vld [vmem:[%s9743_s15 + $0x1f0] sm:$0xff]  ;;  %v3432_v27 = vld [vmem:[%s9719_s27 + $0x18] sm:$0xff] }
 0x186   : > { %2819 = vmax.xlane.f32.xlu1 %v2818_v37  ;;  %v644_v37 = vld [vmem:[%s9743_s15 + $0x180] sm:$0xff] }
 0x187   : > { %2804 = vmax.xlane.f32.xlu0 %v2803_v39  ;;  %v657_v39 = vld [vmem:[%s9743_s15 + $0x1e8] sm:$0xff] }
 0x18a   : > { %2816 = vmax.xlane.f32.xlu1 %v2815_v41  ;;  %v655_v41 = vld [vmem:[%s9743_s15 + $0x1d8] sm:$0xff] }
 0x18b   : > { %2801 = vmax.xlane.f32.xlu0 %v2800_v45  ;;  %v656_v45 = vld [vmem:[%s9743_s15 + $0x1e0] sm:$0xff] }
 0x18e   : > { %2813 = vmax.xlane.f32.xlu1 %v2812_v42  ;;  %v654_v42 = vld [vmem:[%s9743_s15 + $0x1d0] sm:$0xff] }
 0x19f   : > { %827 = vperm.xlu1 %9069, %v629_v46  }
 0x1a1   : > { %822 = vperm.xlu0 %9068, %v628_v47  }
 0x1a3   : > { %837 = vperm.xlu1 %9069, %v631_v50   ;;  %v653_v50 = vld [vmem:[%s9743_s15 + $0x1c8] sm:$0xff] }
 0x1a5   : > { %832 = vperm.xlu0 %9068, %v630_v55  }
 0x1a7   : > { %847 = vperm.xlu1 %9069, %v633_v56   ;;  %v652_v56 = vld [vmem:[%s9743_s15 + $0x1c0] sm:$0xff]  ;;  %s9416_s15 = scalar_lea.vmem %s9415_s18, 16384 }
 0x1a9   : > { %842 = vperm.xlu0 %9068, %v632_v58  }
 0x1ab   : > { %857 = vperm.xlu1 %9069, %v635_v59  }
 0x1ad   : > { %852 = vperm.xlu0 %9068, %v634_v0  }
 0x1af   : > { %867 = vperm.xlu1 %9069, %v637_v1  }
 0x1b1   : > { %862 = vperm.xlu0 %9068, %v636_v2  }
 0x1b3   : > { %897 = vperm.xlu1 %9069, %v643_v3  }
 0x1b5   : > { %872 = vperm.xlu0 %9068, %v638_v9  }
 0x1b7   : > { %887 = vperm.xlu1 %9069, %v641_v10  }
 0x1b9   : > { %877 = vperm.xlu0 %9068, %v639_v11  }
 0x1bb   : > { %917 = vperm.xlu1 %9069, %v647_v12  }
 0x1bd   : > { %892 = vperm.xlu0 %9068, %v642_v8   ;;  %v10288_v8 = vadd.f32 %v10194_v17, %v10200_v20 }
 0x1bf   : > { %932 = vperm.xlu1 %9069, %v650_v19   ;;  %11853 = vst [vmem:[#allocation24_spill] sm:$0xff] %v10288_v8 }
 0x1c1   : > { %882 = vperm.xlu0 %9068, %v640_v21  }
 0x1c3   : > { %927 = vperm.xlu1 %9069, %v649_v22   ;;  %v2809_v22 = vsel %vm980_vm0, %v10288_v8, -inf  ;;  %v3493_v8 = vld [vmem:[%s10323_s17] sm:$0xff] }
 0x1c5   : > { %937 = vperm.xlu0 %9068, %v651_v24   ;;  %v10298_v24 = vadd.f32 %v10192_v16, %v10170_v57 }
 0x1c7   : > { %922 = vperm.xlu1 %9069, %v648_v28   ;;  %11854 = vst [vmem:[#allocation25_spill] sm:$0xff] %v10298_v24  ;;  %v2797_v17 = vsel %vm980_vm0, %v10298_v24, -inf  ;;  %v3429_v24 = vld [vmem:[%s9719_s27] sm:$0xff] }
 0x1c8   : > { %8566 = vmatprep.mubr.msk.f32.mxu0 %vm980_vm0, %v3429_v24  ;;  %v3431_v24 = vld [vmem:[%s9719_s27 + $0x10] sm:$0xff] }
 0x1c9   : > { %912 = vperm.xlu0 %9068, %v646_v29  }
 0x1cb   : > { %977 = vperm.xlu1 %9069, %v659_v32  }
 0x1cd   : > { %907 = vperm.xlu0 %9068, %v645_v33  }
 0x1cf   : > { %972 = vperm.xlu1 %9069, %v658_v34  }
 0x1d1   : > { %902 = vperm.xlu0 %9068, %v644_v37  }
 0x1d3   : > { %967 = vperm.xlu1 %9069, %v657_v39  }
 0x1d5   : > { %957 = vperm.xlu0 %9068, %v655_v41   ;;  %v3496_v41 = vld [vmem:[%s10323_s17 + $0x18] sm:$0xff] }
 0x1d6   : > { %8558 = vmatprep.subr.mxu0 %v3496_v41 }
 0x1d7   : > { %v10258_v46 = vpop.xlane.xlu1 %2741  ;;  %962 = vperm.xlu1 %9069, %v656_v45   ;;  %v10260_v47 = vpop.xlane.xlu0 %2729  ;;  %v3500_v45 = vld [vmem:[%s10323_s17 + $0x38] sm:$0xff]  ;;  %8559 = vmatpush3.msra.mxu0 %v3496_v41 }
 0x1d8   : > { %8572 = vmatprep.subr.mxu1 %v3500_v45 }
 0x1d9   : > { %952 = vperm.xlu0 %9068, %v654_v42   ;;  %8573 = vmatpush3.msra.mxu1 %v3500_v45  ;;  %v3495_v42 = vld [vmem:[%s10323_s17 + $0x10] sm:$0xff]  ;;  %v3433_v45 = vld [vmem:[%s9719_s27 + $0x20] sm:$0xff] }
 0x1da   : > { %8560 = vmatprep.subr.mxu0 %v3495_v42  ;;  %8580 = vmatprep.mubr.msk.f32.mxu1 %vm980_vm0, %v3433_v45 }
 0x1db   : > { %v10263_v55 = vpop.xlane.xlu1 %2738  ;;  %v10266_v58 = vpop.xlane.xlu0 %2726  ;;  %8561 = vmatpush3.msra.mxu0 %v3495_v42  ;;  %v3430_v42 = vld [vmem:[%s9719_s27 + $0x8] sm:$0xff] }
 0x1dd   : > { %947 = vperm.xlu0 %9068, %v653_v50   ;;  %v3499_v50 = vld [vmem:[%s10323_s17 + $0x30] sm:$0xff] }
 0x1de   : > { %8574 = vmatprep.subr.mxu1 %v3499_v50 }
 0x1df   : > { %v10268_v59 = vpop.xlane.xlu1 %2735  ;;  %v10272_v1 = vpop.xlane.xlu0 %2747  ;;  %8575 = vmatpush3.msra.mxu1 %v3499_v50  ;;  %v3434_v50 = vld [vmem:[%s9719_s27 + $0x28] sm:$0xff] }
 0x1e1   : > { %942 = vperm.xlu0 %9068, %v652_v56  }
 0x1e3   : > { %v10270_v0 = vpop.xlane.xlu1 %2744  ;;  %v10276_v3 = vpop.xlane.xlu0 %2732 }
 0x1e4   : > { %v2919_v7 = vsub.f32 %v10114_v4, %v10276_v3 }
 0x1e7   : > { %v10274_v2 = vpop.xlane.xlu1 %2765  ;;  %v10282_v11 = vpop.xlane.xlu0 %2753 }
 0x1eb   : > { %v10278_v9 = vpop.xlane.xlu1 %2750  ;;  %v10290_v19 = vpop.xlane.xlu0 %2771 }
 0x1ef   : > { %v10280_v10 = vpop.xlane.xlu1 %2762 }
 0x1f3   : > { %v10284_v12 = vpop.xlane.xlu1 %2759 }
 0x1f7   : > { %v10292_v21 = vpop.xlane.xlu1 %2756 }
 0x1fb   : > { %2810 = vmax.xlane.f32.xlu1 %v2809_v22  ;;  %v10300_v28 = vpop.xlane.xlu1 %2768  ;;  %v10302_v29 = vpop.xlane.xlu0 %2783  ;;  %v3494_v22 = vld [vmem:[%s10323_s17 + $0x8] sm:$0xff] }
 0x1fc   : > { %8562 = vmatprep.subr.mxu0 %v3494_v22 }
 0x1fd   : > { %8563 = vmatpush3.msra.mxu0 %v3494_v22  ;;  %v8456_v22 = vpop.f32.mrf.mxu0 }
 0x1fe   : > { %8564 = vmatprep.subr.mxu0 %v3493_v8 }
 0x1ff   : > { %v10304_v32 = vpop.xlane.xlu1 %2795  ;;  %v10308_v20 = vpop.xlane.xlu0 %2780  ;;  %8565 = vmatpush3.msra.mxu0 %v3493_v8 }
 0x200   : > { %2798 = vmax.xlane.f32.xlu0 %v2797_v17  ;;  %v3498_v17 = vld [vmem:[%s10323_s17 + $0x28] sm:$0xff]  ;;  %8567 = vmatmul.mubr.msk.f32.vlgmr.msra.gmra.mxu0 %vm980_vm0, %v3430_v42 }
 0x201   : > { %8576 = vmatprep.subr.mxu1 %v3498_v17  ;;  %8569 = vmatprep.mubr.msk.f32.mxu0 %vm980_vm0, %v3431_v24 }
 0x202   : > { %8577 = vmatpush3.msra.mxu1 %v3498_v17 }
 0x203   : > { %v10310_v33 = vpop.xlane.xlu1 %2792  ;;  %v10312_v34 = vpop.xlane.xlu0 %2777  ;;  %8578 = vmatprep.subr.mxu1 %v3497_v40 }
 0x204   : > { %8579 = vmatpush3.msra.mxu1 %v3497_v40  ;;  %v1943_v40 = vpop.f32.mrf.mxu0  ;;  %8570 = vmatmul.mubr.msk.f32.gmra.mxu0 %vm980_vm0, %v3432_v27 }
 0x205   : > { %8581 = vmatmul.mubr.msk.f32.vlgmr.msra.gmra.mxu1 %vm980_vm0, %v3434_v50  ;;  %v3436_v50 = vld [vmem:[%s9719_s27 + $0x38] sm:$0xff] }
 0x206   : > { %v8459_v24 = vpop.f32.mrf.mxu0 }
 0x207   : > { %v10314_v37 = vpop.xlane.xlu1 %2789  ;;  %v10316_v57 = vpop.xlane.xlu0 %2774 }
 0x208   : > { %11855 = vst [vmem:[#allocation26_spill] sm:$0xff] %v10314_v37 }
 0x20b   : > { %v10318_v16 = vpop.xlane.xlu1 %2786 }
 0x20c   : > { %11856 = vst [vmem:[#allocation27_spill] sm:$0xff] %v10318_v16  ;;  %v10320_v39 = vpop.xlane.xlu0 %2807  ;;  %v3442_v16 = vld [vmem:[%s9719_s27 + $0x68] sm:$0xff] }
 0x20d   : > { %11857 = vst [vmem:[#allocation28_spill] sm:$0xff] %v10320_v39 }
 0x20f   : > { %v10329_v56 = vpop.xlane.xlu1 %2819 }
 0x210   : > { %11858 = vst [vmem:[#allocation29_spill] sm:$0xff] %v10329_v56  ;;  %v10336_v41 = vpop.xlane.xlu0 %2804  ;;  %v3504_v56 = vld [vmem:[%s10323_s17 + $0x58] sm:$0xff] }
 0x211   : > { %11859 = vst [vmem:[#allocation30_spill] sm:$0xff] %v10336_v41  ;;  %8586 = vmatprep.subr.mxu0 %v3504_v56  ;;  %v10369_v41 = vpop.f32.mrf.mxu1 }
 0x212   : > { %8587 = vmatpush3.msra.mxu0 %v3504_v56  ;;  %v3501_v56 = vld [vmem:[%s10323_s17 + $0x40] sm:$0xff] }
 0x213   : > { %v10339_v36 = vpop.xlane.xlu1 %2816 }
 0x214   : > { %11860 = vst [vmem:[#allocation31_spill] sm:$0xff] %v10339_v36  ;;  %v10349_v8 = vpop.xlane.xlu0 %2801  ;;  %v3435_v36 = vld [vmem:[%s9719_s27 + $0x30] sm:$0xff] }
 0x215   : > { %11862 = vst [vmem:[#allocation33_spill] sm:$0xff] %v10349_v8  ;;  %8583 = vmatprep.mubr.msk.f32.mxu1 %vm980_vm0, %v3435_v36  ;;  %v3503_v8 = vld [vmem:[%s10323_s17 + $0x50] sm:$0xff] }
 0x216   : > { %8584 = vmatmul.mubr.msk.f32.gmra.mxu1 %vm980_vm0, %v3436_v50  ;;  %8588 = vmatprep.subr.mxu0 %v3503_v8 }
 0x217   : > { %v10347_v17 = vpop.xlane.xlu1 %2813  ;;  %8589 = vmatpush3.msra.mxu0 %v3503_v8  ;;  %v3505_v8 = vld [vmem:[%s10323_s17 + $0x60] sm:$0xff] }
 0x218   : > { %11861 = vst [vmem:[#allocation32_spill] sm:$0xff] %v10347_v17  ;;  %v3508_v17 = vld [vmem:[%s10323_s17 + $0x78] sm:$0xff] }
 0x219   : > { %8600 = vmatprep.subr.mxu1 %v3508_v17 }
 0x21a   : > { %8601 = vmatpush3.msra.mxu1 %v3508_v17 }
 0x21b   : > { %v828_v45 = vpop.permute.xlu1 %827 }
 0x21c   : > { %v10355_v38 = vadd.f32 %v8456_v22, %v828_v45  ;;  %v823_v42 = vpop.permute.xlu0 %822  ;;  %v3507_v22 = vld [vmem:[%s10323_s17 + $0x70] sm:$0xff] }
 0x21d   : > { %v10364_v31 = vadd.f32 %v1943_v40, %v823_v42  ;;  %v3502_v40 = vld [vmem:[%s10323_s17 + $0x48] sm:$0xff]  ;;  %8602 = vmatprep.subr.mxu1 %v3507_v22 }
 0x21e   : > { %11863 = vst [vmem:[#allocation34_spill] sm:$0xff] %v10355_v38  ;;  %v2824_v36 = vsel %vm980_vm0, %v10355_v38, -inf  ;;  %v3506_v42 = vld [vmem:[%s10323_s17 + $0x68] sm:$0xff]  ;;  %8603 = vmatpush3.msra.mxu1 %v3507_v22  ;;  %8590 = vmatprep.subr.mxu0 %v3502_v40  ;;  %v1953_v22 = vpop.f32.mrf.mxu0 }
 0x21f   : > { %11864 = vst [vmem:[#allocation35_spill] sm:$0xff] %v10364_v31  ;;  %2825 = vmax.xlane.f32.xlu1 %v2824_v36  ;;  %v838_v45 = vpop.permute.xlu1 %837  ;;  %v2821_v36 = vsel %vm980_vm0, %v10364_v31, -inf  ;;  %8604 = vmatprep.subr.mxu1 %v3506_v42  ;;  %v3441_v31 = vld [vmem:[%s9719_s27 + $0x60] sm:$0xff] }
 0x220   : > { %v10371_v27 = vadd.f32 %v8459_v24, %v838_v45  ;;  %v833_v50 = vpop.permute.xlu0 %832  ;;  %v10380_v24 = vpop.f32.mrf.mxu1  ;;  %8591 = vmatpush3.msra.mxu0 %v3502_v40  ;;  %8605 = vmatpush3.msra.mxu1 %v3506_v42 }
 0x221   : > { %8592 = vmatprep.subr.mxu0 %v3501_v56  ;;  %8606 = vmatprep.subr.mxu1 %v3505_v8  ;;  %v10394_v40 = vpop.f32.mrf.mxu0  ;;  %v10399_v42 = vadd.f32 %v1953_v22, %v833_v50  ;;  %v3444_v50 = vld [vmem:[%s9719_s27 + $0x78] sm:$0xff] }
 0x222   : > { %11865 = vst [vmem:[#allocation36_spill] sm:$0xff] %v10371_v27  ;;  %v2830_v38 = vsel %vm980_vm0, %v10371_v27, -inf  ;;  %v3437_v27 = vld [vmem:[%s9719_s27 + $0x40] sm:$0xff]  ;;  %8593 = vmatpush3.msra.mxu0 %v3501_v56  ;;  %v8473_v26 = vpop.f32.mrf.mxu1  ;;  %8607 = vmatpush3.msra.mxu1 %v3505_v8  ;;  %v3439_v56 = vld [vmem:[%s9719_s27 + $0x50] sm:$0xff]  ;;  %v3512_v22 = vld [vmem:[%s10323_s17 + $0x98] sm:$0xff] }
 0x223   : > { %v10382_v17 = vpop.permute.xlu1 %847  ;;  %2831 = vmax.xlane.f32.xlu0 %v2830_v38  ;;  %2822 = vmax.xlane.f32.xlu1 %v2821_v36  ;;  %11867 = vst [vmem:[#allocation38_spill] sm:$0xff] %v10399_v42  ;;  %v3443_v8 = vld [vmem:[%s9719_s27 + $0x70] sm:$0xff] }
 0x224   : > { %v10385_v45 = vpop.permute.xlu0 %842  ;;  %8594 = vmatprep.mubr.msk.f32.mxu0 %vm980_vm0, %v3437_v27  ;;  %8608 = vmatprep.mubr.msk.f32.mxu1 %vm980_vm0, %v3441_v31  ;;  %v10407_v31 = vpop.f32.mrf.mxu0 }
 0x225   : > { %8595 = vmatmul.mubr.msk.f32.vlgmr.msra.gmra.mxu0 %vm980_vm0, %v3438_v13  ;;  %8609 = vmatmul.mubr.msk.f32.vlgmr.msra.gmra.mxu1 %vm980_vm0, %v3442_v16  ;;  %v3440_v16 = vld [vmem:[%s9719_s27 + $0x58] sm:$0xff]  ;;  %v10449_v4 = vadd.f32 %v10380_v24, %v10385_v45 }
 0x226   : > { %8597 = vmatprep.mubr.msk.f32.mxu0 %vm980_vm0, %v3439_v56  ;;  %8611 = vmatprep.mubr.msk.f32.mxu1 %vm980_vm0, %v3443_v8  ;;  %v3511_v56 = vld [vmem:[%s10323_s17 + $0x90] sm:$0xff]  ;;  %v3520_v45 = vld [vmem:[%s10323_s17 + $0xd8] sm:$0xff] }
 0x227   : > { %v858_v39 = vpop.permute.xlu1 %857  ;;  %8614 = vmatprep.subr.mxu0 %v3512_v22 }
 0x228   : > { %v10392_v38 = vadd.f32 %v8473_v26, %v858_v39  ;;  %v853_v36 = vpop.permute.xlu0 %852  ;;  %v2920_v26 = vsub.f32 %v10106_v61, %v10268_v59  ;;  %v2062_v39 = vpop.f32.mrf.mxu1  ;;  %v3516_v61 = vld [vmem:[%s10323_s17 + $0xb8] sm:$0xff]  ;;  %8615 = vmatpush3.msra.mxu0 %v3512_v22 }
 0x229   : > { %8598 = vmatmul.mubr.msk.f32.gmra.mxu0 %vm980_vm0, %v3440_v16  ;;  %8612 = vmatmul.mubr.msk.f32.gmra.mxu1 %vm980_vm0, %v3444_v50  ;;  %v10419_v59 = vadd.f32 %v2062_v39, %v853_v36  ;;  %v8487_v16 = vpop.f32.mrf.mxu0  ;;  %v3510_v36 = vld [vmem:[%s10323_s17 + $0x88] sm:$0xff] }
 0x22a   : > { %11866 = vst [vmem:[#allocation37_spill] sm:$0xff] %v10392_v38  ;;  %v2842_v27 = vsel %vm980_vm0, %v10392_v38, -inf  ;;  %8628 = vmatprep.subr.mxu1 %v3516_v61  ;;  %v3515_v38 = vld [vmem:[%s10323_s17 + $0xb0] sm:$0xff]  ;;  %v2987_v8 = vmul.f32 1.442695, %v2920_v26  ;;  %v10425_v6 = vpop.f32.mrf.mxu1  ;;  %8616 = vmatprep.subr.mxu0 %v3511_v56  ;;  %v3514_v39 = vld [vmem:[%s10323_s17 + $0xa8] sm:$0xff]  ;;  %v10433_v26 = vadd.f32 %v10369_v41, %v10382_v17 }
 0x22b   : > { %2843 = vmax.xlane.f32.xlu0 %v2842_v27  ;;  %11868 = vst [vmem:[#allocation39_spill] sm:$0xff] %v10419_v59  ;;  %v2827_v27 = vsel %vm980_vm0, %v10399_v42, -inf  ;;  %8629 = vmatpush3.msra.mxu1 %v3516_v61  ;;  %v868_v37 = vpop.permute.xlu1 %867  ;;  %v2924_v42 = vsub.f32 %v10104_v60, %v10272_v1  ;;  %v2839_v22 = vsel %vm980_vm0, %v10419_v59, -inf  ;;  %v3509_v61 = vld [vmem:[%s10323_s17 + $0x80] sm:$0xff]  ;;  %v2171_v1 = vpop.f32.mrf.mxu0 }
 0x22c   : > { %v10409_v13 = vpop.permute.xlu0 %862  ;;  %8630 = vmatprep.subr.mxu1 %v3515_v38  ;;  %8617 = vmatpush3.msra.mxu0 %v3511_v56  ;;  %9070 = vpow2.f32 %v2987_v8  ;;  %v10441_v56 = vpop.f32.mrf.mxu1  ;;  %v3445_v60 = vld [vmem:[%s9719_s27 + $0x80] sm:$0xff]  ;;  %v2836_v3 = vsel %vm980_vm0, %v10433_v26, -inf }
 0x22d   : > { %8631 = vmatpush3.msra.mxu1 %v3515_v38  ;;  %8618 = vmatprep.subr.mxu0 %v3510_v36  ;;  %v3449_v38 = vld [vmem:[%s9719_s27 + $0xa0] sm:$0xff]  ;;  %v2995_v8 = vmul.f32 1.442695, %v2924_v42  ;;  %v3519_v42 = vld [vmem:[%s10323_s17 + $0xd0] sm:$0xff] }
 0x22e   : > { %8632 = vmatprep.subr.mxu1 %v3514_v39  ;;  %8619 = vmatpush3.msra.mxu0 %v3510_v36  ;;  %v3446_v36 = vld [vmem:[%s9719_s27 + $0x88] sm:$0xff] }
 0x22f   : > { %2828 = vmax.xlane.f32.xlu0 %v2827_v27  ;;  %v3513_v27 = vld [vmem:[%s10323_s17 + $0xa0] sm:$0xff]  ;;  %8633 = vmatpush3.msra.mxu1 %v3514_v39  ;;  %v2985_v39 = vmul.f32 1.442695, %v2919_v7  ;;  %v3447_v7 = vld [vmem:[%s9719_s27 + $0x90] sm:$0xff]  ;;  %9072 = vpow2.f32 %v2995_v8  ;;  %v3448_v8 = vld [vmem:[%s9719_s27 + $0x98] sm:$0xff] }
 0x230   : > { %v873_v50 = vpop.permute.xlu0 %872  ;;  %8620 = vmatprep.subr.mxu0 %v3509_v61  ;;  %8634 = vmatprep.subr.mxu1 %v3513_v27 }
 0x231   : > { %8621 = vmatpush3.msra.mxu0 %v3509_v61  ;;  %8622 = vmatprep.mubr.msk.f32.mxu0 %vm980_vm0, %v3445_v60  ;;  %v10456_v59 = vadd.f32 %v2171_v1, %v873_v50  ;;  %v2923_v50 = vsub.f32 %v10116_v5, %v10270_v0  ;;  %v2918_v60 = vsub.f32 %v10092_v48, %v10260_v47  ;;  %9074 = vpow2.f32 %v2985_v39  ;;  %v3518_v0 = vld [vmem:[%s10323_s17 + $0xc8] sm:$0xff]  ;;  %v3517_v48 = vld [vmem:[%s10323_s17 + $0xc0] sm:$0xff] }
 0x232   : > { %8635 = vmatpush3.msra.mxu1 %v3513_v27  ;;  %8636 = vmatprep.mubr.msk.f32.mxu1 %vm980_vm0, %v3449_v38  ;;  %v2833_v27 = vsel %vm980_vm0, %v10449_v4, -inf  ;;  %v10476_v1 = vadd.f32 %v10394_v40, %v868_v37 }
 0x233   : > { %2840 = vmax.xlane.f32.xlu0 %v2839_v22  ;;  %v8501_v22 = vpop.f32.mrf.mxu1  ;;  %8623 = vmatmul.mubr.msk.f32.vlgmr.msra.gmra.mxu0 %vm980_vm0, %v3446_v36  ;;  %v2851_v5 = vsel %vm980_vm0, %v10456_v59, -inf  ;;  %v2993_v47 = vmul.f32 1.442695, %v2923_v50  ;;  %v2983_v39 = vmul.f32 1.442695, %v2918_v60  ;;  %v3528_v50 = vld [vmem:[%s10323_s17 + $0x118] sm:$0xff] }
 0x234   : > { %v878_v41 = vpop.permute.xlu0 %877  ;;  %8642 = vmatprep.subr.mxu0 %v3520_v45  ;;  %8625 = vmatprep.mubr.msk.f32.mxu0 %vm980_vm0, %v3447_v7  ;;  %v10497_v7 = vpop.f32.mrf.mxu0 }
 0x235   : > { %v10444_v17 = vadd.f32 %v8487_v16, %v878_v41  ;;  %v3450_v16 = vld [vmem:[%s9719_s27 + $0xa8] sm:$0xff]  ;;  %v898_v41 = vpop.permute.xlu1 %897  ;;  %8643 = vmatpush3.msra.mxu0 %v3520_v45  ;;  %v2280_v36 = vpop.f32.mrf.mxu1  ;;  %v3453_v45 = vld [vmem:[%s9719_s27 + $0xc0] sm:$0xff]  ;;  %9076 = vpow2.f32 %v2993_v47 }
 0x236   : > { %8637 = vmatmul.mubr.msk.f32.vlgmr.msra.gmra.mxu1 %vm980_vm0, %v3450_v16  ;;  %v10468_v61 = vadd.f32 %v8501_v22, %v898_v41  ;;  %8644 = vmatprep.subr.mxu0 %v3519_v42  ;;  %v3452_v16 = vld [vmem:[%s9719_s27 + $0xb8] sm:$0xff]  ;;  %v2848_v41 = vsel %vm980_vm0, %v10476_v1, -inf  ;;  %9078 = vpow2.f32 %v2983_v39 }
 0x237   : > { %2837 = vmax.xlane.f32.xlu0 %v2836_v3  ;;  %v2854_v24 = vsel %vm980_vm0, %v10444_v17, -inf  ;;  %v3451_v3 = vld [vmem:[%s9719_s27 + $0xb0] sm:$0xff]  ;;  %8645 = vmatpush3.msra.mxu0 %v3519_v42 }
 0x238   : > { %2855 = vmax.xlane.f32.xlu1 %v2854_v24  ;;  %v893_v38 = vpop.permute.xlu0 %892  ;;  %8639 = vmatprep.mubr.msk.f32.mxu1 %vm980_vm0, %v3451_v3  ;;  %v2866_v40 = vsel %vm980_vm0, %v10468_v61, -inf  ;;  %v3524_v24 = vld [vmem:[%s10323_s17 + $0xf8] sm:$0xff] }
 0x239   : > { %v10485_v37 = vadd.f32 %v2280_v36, %v893_v38  ;;  %8646 = vmatprep.subr.mxu0 %v3518_v0  ;;  %8626 = vmatmul.mubr.msk.f32.gmra.mxu0 %vm980_vm0, %v3448_v8  ;;  %v888_v22 = vpop.permute.xlu1 %887  ;;  %v10495_v42 = vpop.eup %9070  ;;  %v2917_v8 = vsub.f32 %v10096_v53, %v10266_v58  ;;  %v3527_v36 = vld [vmem:[%s10323_s17 + $0x110] sm:$0xff]  ;;  %v3522_v53 = vld [vmem:[%s10323_s17 + $0xe8] sm:$0xff] }
 0x23a   : > { %8647 = vmatpush3.msra.mxu0 %v3518_v0  ;;  %8640 = vmatmul.mubr.msk.f32.gmra.mxu1 %vm980_vm0, %v3452_v16  ;;  %v10504_v60 = vadd.f32 %v10425_v6, %v888_v22  ;;  %v3523_v0 = vld [vmem:[%s10323_s17 + $0xf0] sm:$0xff]  ;;  %v3118_v6 = vsel %vm980_vm0, %v10495_v42, 0.0  ;;  %v3526_v16 = vld [vmem:[%s10323_s17 + $0x108] sm:$0xff] }
 0x23b   : > { %2834 = vmax.xlane.f32.xlu0 %v2833_v27  ;;  %8648 = vmatprep.subr.mxu0 %v3517_v48  ;;  %v2922_v27 = vsub.f32 %v10094_v49, %v10258_v46  ;;  %v2863_v38 = vsel %vm980_vm0, %v10485_v37, -inf  ;;  %v10515_v49 = vadd.f32 %v10407_v31, %v10409_v13  ;;  %v10519_v46 = vpop.f32.mrf.mxu0  ;;  %v3455_v13 = vld [vmem:[%s9719_s27 + $0xd0] sm:$0xff]  ;;  %v2981_v47 = vmul.f32 1.442695, %v2917_v8 }
 0x23c   : > { %2852 = vmax.xlane.f32.xlu1 %v2851_v5  ;;  %8649 = vmatpush3.msra.mxu0 %v3517_v48  ;;  %v3454_v5 = vld [vmem:[%s9719_s27 + $0xc8] sm:$0xff]  ;;  %v883_v3 = vpop.permute.xlu0 %882  ;;  %v2860_v31 = vsel %vm980_vm0, %v10504_v60, -inf  ;;  %v10527_v48 = vpop.eup %9072  ;;  %v2928_v8 = vsub.f32 %v10147_v30, %v10284_v12 }
 0x23d   : > { %8656 = vmatprep.subr.mxu1 %v3524_v24  ;;  %8650 = vmatprep.mubr.msk.f32.mxu0 %vm980_vm0, %v3453_v45  ;;  %v2991_v58 = vmul.f32 1.442695, %v2922_v27  ;;  %v8515_v22 = vpop.f32.mrf.mxu0  ;;  %v10535_v45 = vpop.f32.mrf.mxu1  ;;  %v2921_v27 = vsub.f32 %v10098_v54, %v10263_v55  ;;  %v3457_v55 = vld [vmem:[%s9719_s27 + $0xe0] sm:$0xff] }
 0x23e   : > { %8657 = vmatpush3.msra.mxu1 %v3524_v24  ;;  %8670 = vmatprep.subr.mxu0 %v3528_v50  ;;  %v10532_v39 = vpop.eup %9074  ;;  %v3456_v24 = vld [vmem:[%s9719_s27 + $0xd8] sm:$0xff] }
 0x23f   : > { %2867 = vmax.xlane.f32.xlu0 %v2866_v40  ;;  %8651 = vmatmul.mubr.msk.f32.vlgmr.msra.gmra.mxu0 %vm980_vm0, %v3454_v5  ;;  %v2845_v40 = vsel %vm980_vm0, %v10515_v49, -inf  ;;  %9080 = vpow2.f32 %v2991_v58  ;;  %v3115_v54 = vsel %vm980_vm0, %v10532_v39, 0.0  ;;  %v2989_v30 = vmul.f32 1.442695, %v2921_v27  ;;  %v3532_v58 = vld [vmem:[%s10323_s17 + $0x138] sm:$0xff] }
 0x240   : > { %2849 = vmax.xlane.f32.xlu1 %v2848_v41  ;;  %8658 = vmatprep.subr.mxu1 %v3523_v0  ;;  %v918_v41 = vpop.permute.xlu1 %917  ;;  %v938_v5 = vpop.permute.xlu0 %937  ;;  %9082 = vpow2.f32 %v2981_v47  ;;  %v2932_v27 = vsub.f32 %v10138_v23, %v10290_v19  ;;  %v3459_v19 = vld [vmem:[%s9719_s27 + $0xf0] sm:$0xff] }
 0x241   : > { %8671 = vmatpush3.msra.mxu0 %v3528_v50  ;;  %8659 = vmatpush3.msra.mxu1 %v3523_v0  ;;  %v3521_v50 = vld [vmem:[%s10323_s17 + $0xe0] sm:$0xff]  ;;  %v3130_v0 = vsel %vm980_vm0, %v10527_v48, 0.0  ;;  %9084 = vpow2.f32 %v2989_v30 }
 0x242   : > { %8672 = vmatprep.subr.mxu0 %v3527_v36  ;;  %8660 = vmatprep.subr.mxu1 %v3522_v53  ;;  %v3011_v30 = vmul.f32 1.442695, %v2932_v27  ;;  %v2931_v27 = vsub.f32 %v10156_v43, %v10300_v28 }
 0x243   : > { %2864 = vmax.xlane.f32.xlu0 %v2863_v38  ;;  %8673 = vmatpush3.msra.mxu0 %v3527_v36  ;;  %v10542_v38 = vadd.f32 %v10441_v56, %v883_v3  ;;  %v3525_v56 = vld [vmem:[%s10323_s17 + $0x100] sm:$0xff]  ;;  %v3458_v3 = vld [vmem:[%s9719_s27 + $0xe8] sm:$0xff]  ;;  %v10556_v36 = vpop.f32.mrf.mxu1 }
 0x244   : > { %3119 = vadd.xlane.f32.xlu1 %v3118_v6  ;;  %8653 = vmatprep.mubr.msk.f32.mxu0 %vm980_vm0, %v3455_v13  ;;  %v10548_v6 = vadd.f32 %v8515_v22, %v918_v41  ;;  %v3003_v13 = vmul.f32 1.442695, %v2928_v8  ;;  %v2389_v41 = vpop.f32.mrf.mxu0 }
 0x245   : > { %8661 = vmatpush3.msra.mxu1 %v3522_v53  ;;  %8674 = vmatprep.subr.mxu0 %v3526_v16  ;;  %v2857_v12 = vsel %vm980_vm0, %v10542_v38, -inf  ;;  %v3461_v53 = vld [vmem:[%s9719_s27 + $0x100] sm:$0xff] }
 0x246   : > { %8654 = vmatmul.mubr.msk.f32.gmra.mxu0 %vm980_vm0, %v3456_v24  ;;  %8662 = vmatprep.subr.mxu1 %v3521_v50  ;;  %v2878_v47 = vsel %vm980_vm0, %v10548_v6, -inf  ;;  %v913_v24 = vpop.permute.xlu0 %912  ;;  %9086 = vpow2.f32 %v3003_v13 }
 0x247   : > { %2861 = vmax.xlane.f32.xlu0 %v2860_v31  ;;  %8675 = vmatpush3.msra.mxu0 %v3526_v16  ;;  %v10563_v31 = vpop.eup %9076  ;;  %v3462_v16 = vld [vmem:[%s9719_s27 + $0x108] sm:$0xff]  ;;  %9088 = vpow2.f32 %v3011_v30  ;;  %v3544_v30 = vld [vmem:[%s10323_s17 + $0x198] sm:$0xff] }
 0x248   : > { %2846 = vmax.xlane.f32.xlu1 %v2845_v40  ;;  %8663 = vmatpush3.msra.mxu1 %v3521_v50  ;;  %v3536_v40 = vld [vmem:[%s10323_s17 + $0x158] sm:$0xff]  ;;  %v10570_v22 = vpop.eup %9078  ;;  %v8529_v50 = vpop.f32.mrf.mxu1  ;;  %v3127_v8 = vsel %vm980_vm0, %v10563_v31, 0.0 }
 0x249   : > { %8664 = vmatprep.mubr.msk.f32.mxu1 %vm980_vm0, %v3457_v55  ;;  %8676 = vmatprep.subr.mxu0 %v3525_v56  ;;  %v3535_v55 = vld [vmem:[%s10323_s17 + $0x150] sm:$0xff]  ;;  %v3112_v23 = vsel %vm980_vm0, %v10570_v22, 0.0 }
 0x24a   : > { %8665 = vmatmul.mubr.msk.f32.vlgmr.msra.gmra.mxu1 %vm980_vm0, %v3458_v3  ;;  %8677 = vmatpush3.msra.mxu0 %v3525_v56  ;;  %v2927_v56 = vsub.f32 %v10152_v35, %v10292_v21  ;;  %v10584_v3 = vadd.f32 %v2389_v41, %v913_v24  ;;  %v3530_v21 = vld [vmem:[%s10323_s17 + $0x128] sm:$0xff]  ;;  %v3464_v41 = vld [vmem:[%s9719_s27 + $0x118] sm:$0xff] }
 0x24b   : > { %3131 = vadd.xlane.f32.xlu0 %v3130_v0  ;;  %8678 = vmatprep.mubr.msk.f32.mxu0 %vm980_vm0, %v3461_v53  ;;  %v10575_v0 = vadd.f32 %v8529_v50, %v938_v5  ;;  %v3463_v5 = vld [vmem:[%s9719_s27 + $0x110] sm:$0xff]  ;;  %v908_v50 = vpop.permute.xlu0 %907 }
 0x24c   : > { %3116 = vadd.xlane.f32.xlu1 %v3115_v54  ;;  %8684 = vmatprep.subr.mxu1 %v3532_v58  ;;  %v3531_v54 = vld [vmem:[%s10323_s17 + $0x130] sm:$0xff]  ;;  %v10594_v53 = vpop.eup %9080  ;;  %v3001_v13 = vmul.f32 1.442695, %v2927_v56  ;;  %v3533_v56 = vld [vmem:[%s10323_s17 + $0x140] sm:$0xff]  ;;  %v10617_v43 = vadd.f32 %v10497_v7, %v908_v50  ;;  %v3540_v7 = vld [vmem:[%s10323_s17 + $0x178] sm:$0xff]  ;;  %v2930_v50 = vsub.f32 %v10128_v14, %v10274_v2 }
 0x24d   : > { %8698 = vmatprep.subr.mxu0 %v3536_v40  ;;  %8679 = vmatmul.mubr.msk.f32.vlgmr.msra.gmra.mxu0 %vm980_vm0, %v3462_v16  ;;  %v2890_v35 = vsel %vm980_vm0, %v10575_v0, -inf  ;;  %v3460_v16 = vld [vmem:[%s9719_s27 + $0xf8] sm:$0xff]  ;;  %v10601_v24 = vpop.eup %9082 }
 0x24e   : > { %8685 = vmatpush3.msra.mxu1 %v3532_v58  ;;  %8699 = vmatpush3.msra.mxu0 %v3536_v40  ;;  %v2498_v58 = vpop.f32.mrf.mxu1  ;;  %v2875_v40 = vsel %vm980_vm0, %v10584_v3, -inf  ;;  %9090 = vpow2.f32 %v3001_v13  ;;  %v3109_v28 = vsel %vm980_vm0, %v10601_v24, 0.0 }
 0x24f   : > { %2858 = vmax.xlane.f32.xlu0 %v2857_v12  ;;  %8686 = vmatprep.subr.mxu1 %v3531_v54  ;;  %v3534_v12 = vld [vmem:[%s10323_s17 + $0x148] sm:$0xff] }
 0x250   : > { %2879 = vmax.xlane.f32.xlu1 %v2878_v47  ;;  %8700 = vmatprep.subr.mxu0 %v3535_v55  ;;  %v933_v47 = vpop.permute.xlu1 %932 }
 0x251   : > { %8687 = vmatpush3.msra.mxu1 %v3531_v54  ;;  %8701 = vmatpush3.msra.mxu0 %v3535_v55  ;;  %v3124_v54 = vsel %vm980_vm0, %v10594_v53, 0.0  ;;  %v3529_v55 = vld [vmem:[%s10323_s17 + $0x120] sm:$0xff] }
 0x252   : > { %8667 = vmatprep.mubr.msk.f32.mxu1 %vm980_vm0, %v3459_v19  ;;  %8681 = vmatprep.mubr.msk.f32.mxu0 %vm980_vm0, %v3463_v5  ;;  %v3465_v19 = vld [vmem:[%s9719_s27 + $0x120] sm:$0xff] }
 0x253   : > { %3128 = vadd.xlane.f32.xlu0 %v3127_v8  ;;  %8688 = vmatprep.subr.mxu1 %v3530_v21  ;;  %v10606_v8 = vadd.f32 %v2498_v58, %v933_v47  ;;  %v3469_v5 = vld [vmem:[%s9719_s27 + $0x140] sm:$0xff]  ;;  %v3466_v58 = vld [vmem:[%s9719_s27 + $0x128] sm:$0xff] }
 0x254   : > { %3113 = vadd.xlane.f32.xlu1 %v3112_v23  ;;  %8702 = vmatprep.subr.mxu0 %v3534_v12  ;;  %v2926_v23 = vsub.f32 %v10130_v15, %v10282_v11  ;;  %v3009_v15 = vmul.f32 1.442695, %v2931_v27  ;;  %v3470_v47 = vld [vmem:[%s9719_s27 + $0x148] sm:$0xff] }
 0x255   : > { %8668 = vmatmul.mubr.msk.f32.gmra.mxu1 %vm980_vm0, %v3460_v16  ;;  %8682 = vmatmul.mubr.msk.f32.gmra.mxu0 %vm980_vm0, %v3464_v41  ;;  %v2887_v11 = vsel %vm980_vm0, %v10606_v8, -inf  ;;  %v10636_v16 = vpop.f32.mrf.mxu0  ;;  %v903_v41 = vpop.permute.xlu0 %902 }
 0x256   : > { %8689 = vmatpush3.msra.mxu1 %v3530_v21  ;;  %8703 = vmatpush3.msra.mxu0 %v3534_v12  ;;  %v2999_v13 = vmul.f32 1.442695, %v2926_v23  ;;  %v928_v21 = vpop.permute.xlu1 %927  ;;  %v2872_v12 = vsel %vm980_vm0, %v10617_v43, -inf  ;;  %9092 = vpow2.f32 %v3009_v15  ;;  %v2925_v23 = vsub.f32 %v10132_v18, %v10278_v9  ;;  %v3471_v18 = vld [vmem:[%s9719_s27 + $0x150] sm:$0xff] }
 0x257   : > { %2891 = vmax.xlane.f32.xlu0 %v2890_v35  ;;  %8690 = vmatprep.subr.mxu1 %v3529_v55  ;;  %v10627_v35 = vpop.eup %9084  ;;  %v10642_v27 = vadd.f32 %v10535_v45, %v928_v21  ;;  %v10653_v14 = vadd.f32 %v10519_v46, %v903_v41  ;;  %v10657_v45 = vpop.f32.mrf.mxu0  ;;  %v3007_v9 = vmul.f32 1.442695, %v2930_v50  ;;  %v3468_v21 = vld [vmem:[%s9719_s27 + $0x138] sm:$0xff]  ;;  %v2929_v50 = vsub.f32 %v10140_v25, %v10280_v10 }
 0x258   : > { %2876 = vmax.xlane.f32.xlu1 %v2875_v40  ;;  %8704 = vmatprep.subr.mxu0 %v3533_v56  ;;  %v10634_v40 = vpop.eup %9086  ;;  %9094 = vpow2.f32 %v2999_v13 }
 0x259   : > { %8691 = vmatpush3.msra.mxu1 %v3529_v55  ;;  %8705 = vmatpush3.msra.mxu0 %v3533_v56  ;;  %v3539_v55 = vld [vmem:[%s10323_s17 + $0x170] sm:$0xff]  ;;  %v3142_v2 = vsel %vm980_vm0, %v10634_v40, 0.0  ;;  %v2884_v46 = vsel %vm980_vm0, %v10642_v27, -inf  ;;  %v10665_v15 = vpop.eup %9088  ;;  %v2869_v13 = vsel %vm980_vm0, %v10653_v14, -inf  ;;  %v958_v41 = vpop.permute.xlu0 %957  ;;  %9096 = vpow2.f32 %v3007_v9  ;;  %v3548_v9 = vld [vmem:[%s10323_s17 + $0x1b8] sm:$0xff] }
 0x25a   : > { %8692 = vmatprep.mubr.msk.f32.mxu1 %vm980_vm0, %v3465_v19  ;;  %8706 = vmatprep.mubr.msk.f32.mxu0 %vm980_vm0, %v3469_v5  ;;  %v3543_v56 = vld [vmem:[%s10323_s17 + $0x190] sm:$0xff]  ;;  %v3538_v19 = vld [vmem:[%s10323_s17 + $0x168] sm:$0xff] }
 0x25b   : > { %3125 = vadd.xlane.f32.xlu0 %v3124_v54  ;;  %8712 = vmatprep.subr.mxu1 %v3540_v7  ;;  %v3121_v54 = vsel %vm980_vm0, %v10627_v35, 0.0  ;;  %v3542_v5 = vld [vmem:[%s10323_s17 + $0x188] sm:$0xff] }
 0x25c   : > { %3110 = vadd.xlane.f32.xlu1 %v3109_v28  ;;  %8726 = vmatprep.subr.mxu0 %v3544_v30  ;;  %v3467_v28 = vld [vmem:[%s9719_s27 + $0x130] sm:$0xff] }
 0x25d   : > { %8693 = vmatmul.mubr.msk.f32.vlgmr.msra.gmra.mxu1 %vm980_vm0, %v3466_v58  ;;  %8707 = vmatmul.mubr.msk.f32.vlgmr.msra.gmra.mxu0 %vm980_vm0, %v3470_v47  ;;  %v10674_v58 = vpop.eup %9090  ;;  %v8543_v47 = vpop.f32.mrf.mxu0 }
 0x25e   : > { %8713 = vmatpush3.msra.mxu1 %v3540_v7  ;;  %8727 = vmatpush3.msra.mxu0 %v3544_v30  ;;  %v10667_v7 = vpop.f32.mrf.mxu1  ;;  %v923_v30 = vpop.permute.xlu1 %922  ;;  %v10692_v10 = vadd.f32 %v8543_v47, %v958_v41 }
 0x25f   : > { %2888 = vmax.xlane.f32.xlu0 %v2887_v11  ;;  %8714 = vmatprep.subr.mxu1 %v3539_v55  ;;  %v2997_v11 = vmul.f32 1.442695, %v2925_v23  ;;  %v3541_v23 = vld [vmem:[%s10323_s17 + $0x180] sm:$0xff]  ;;  %v2607_v41 = vpop.f32.mrf.mxu0 }
 0x260   : > { %2873 = vmax.xlane.f32.xlu1 %v2872_v12  ;;  %8728 = vmatprep.subr.mxu0 %v3543_v56  ;;  %v3472_v12 = vld [vmem:[%s9719_s27 + $0x158] sm:$0xff]  ;;  %v10690_v25 = vpop.f32.mrf.mxu1 }
 0x261   : > { %8715 = vmatpush3.msra.mxu1 %v3539_v55  ;;  %8729 = vmatpush3.msra.mxu0 %v3543_v56  ;;  %v3154_v55 = vsel %vm980_vm0, %v10665_v15, 0.0  ;;  %v3537_v56 = vld [vmem:[%s10323_s17 + $0x160] sm:$0xff]  ;;  %9098 = vpow2.f32 %v2997_v11 }
 0x262   : > { %8695 = vmatprep.mubr.msk.f32.mxu1 %vm980_vm0, %v3467_v28  ;;  %8709 = vmatprep.mubr.msk.f32.mxu0 %vm980_vm0, %v3471_v18  ;;  %v3473_v28 = vld [vmem:[%s9719_s27 + $0x160] sm:$0xff] }
 0x263   : > { %3122 = vadd.xlane.f32.xlu0 %v3121_v54  ;;  %8716 = vmatprep.subr.mxu1 %v3538_v19  ;;  %v10680_v54 = vadd.f32 %v10556_v36, %v923_v30  ;;  %v3139_v36 = vsel %vm980_vm0, %v10674_v58, 0.0  ;;  %v3477_v18 = vld [vmem:[%s9719_s27 + $0x180] sm:$0xff]  ;;  %v10702_v11 = vpop.eup %9092 }
 0x264   : > { %3143 = vadd.xlane.f32.xlu1 %v3142_v2  ;;  %8730 = vmatprep.subr.mxu0 %v3542_v5  ;;  %v2936_v2 = vsub.f32 %v10160_v44, %v10302_v29  ;;  %v3005_v44 = vmul.f32 1.442695, %v2929_v50  ;;  %v953_v50 = vpop.permute.xlu0 %952 }
 0x265   : > { %8696 = vmatmul.mubr.msk.f32.gmra.mxu1 %vm980_vm0, %v3468_v21  ;;  %8710 = vmatmul.mubr.msk.f32.gmra.mxu0 %vm980_vm0, %v3472_v12  ;;  %v2881_v29 = vsel %vm980_vm0, %v10680_v54, -inf  ;;  %v3474_v21 = vld [vmem:[%s9719_s27 + $0x168] sm:$0xff]  ;;  %v10709_v47 = vpop.eup %9094 }
 0x266   : > { %8717 = vmatpush3.msra.mxu1 %v3538_v19  ;;  %8731 = vmatpush3.msra.mxu0 %v3542_v5  ;;  %v3019_v30 = vmul.f32 1.442695, %v2936_v2  ;;  %v8557_v19 = vpop.f32.mrf.mxu1  ;;  %v2902_v5 = vsel %vm980_vm0, %v10692_v10, -inf  ;;  %v3478_v12 = vld [vmem:[%s9719_s27 + $0x188] sm:$0xff]  ;;  %9100 = vpow2.f32 %v3005_v44  ;;  %v3547_v2 = vld [vmem:[%s10323_s17 + $0x1b0] sm:$0xff] }
 0x267   : > { %2885 = vmax.xlane.f32.xlu0 %v2884_v46  ;;  %8718 = vmatprep.subr.mxu1 %v3537_v56  ;;  %v3552_v46 = vld [vmem:[%s10323_s17 + $0x1d8] sm:$0xff]  ;;  %v3479_v44 = vld [vmem:[%s9719_s27 + $0x190] sm:$0xff] }
 0x268   : > { %2870 = vmax.xlane.f32.xlu1 %v2869_v13  ;;  %8732 = vmatprep.subr.mxu0 %v3541_v23  ;;  %v978_v13 = vpop.permute.xlu1 %977  ;;  %9102 = vpow2.f32 %v3019_v30  ;;  %v3550_v30 = vld [vmem:[%s10323_s17 + $0x1c8] sm:$0xff] }
 0x269   : > { %8719 = vmatpush3.msra.mxu1 %v3537_v56  ;;  %8733 = vmatpush3.msra.mxu0 %v3541_v23  ;;  %v10714_v56 = vadd.f32 %v8557_v19, %v978_v13  ;;  %v3151_v23 = vsel %vm980_vm0, %v10702_v11, 0.0  ;;  %v10734_v19 = vpop.eup %9096 }
 0x26a   : > { %8720 = vmatprep.mubr.msk.f32.mxu1 %vm980_vm0, %v3473_v28  ;;  %8734 = vmatprep.mubr.msk.f32.mxu0 %vm980_vm0, %v3477_v18  ;;  %v2935_v28 = vsub.f32 %v10164_v52, %v10308_v20  ;;  %v10724_v18 = vadd.f32 %v2607_v41, %v953_v50  ;;  %v3546_v20 = vld [vmem:[%s10323_s17 + $0x1a8] sm:$0xff]  ;;  %v3480_v41 = vld [vmem:[%s9719_s27 + $0x198] sm:$0xff] }
 0x26b   : > { %3155 = vadd.xlane.f32.xlu0 %v3154_v55  ;;  %8740 = vmatprep.subr.mxu1 %v3548_v9  ;;  %v2940_v55 = vsub.f32 %v10162_v51, %v10304_v32  ;;  %v3136_v51 = vsel %vm980_vm0, %v10709_v47, 0.0  ;;  %v3475_v32 = vld [vmem:[%s9719_s27 + $0x170] sm:$0xff]  ;;  %v2914_v52 = vsel %vm980_vm0, %v10714_v56, -inf }
 0x26c   : > { %3140 = vadd.xlane.f32.xlu1 %v3139_v36  ;;  %8754 = vmatprep.subr.mxu0 %v3552_v46  ;;  %v3551_v36 = vld [vmem:[%s10323_s17 + $0x1d0] sm:$0xff]  ;;  %v3017_v13 = vmul.f32 1.442695, %v2935_v28  ;;  %v3545_v28 = vld [vmem:[%s10323_s17 + $0x1a0] sm:$0xff] }
 0x26d   : > { %8721 = vmatmul.mubr.msk.f32.vlgmr.msra.gmra.mxu1 %vm980_vm0, %v3474_v21  ;;  %8735 = vmatmul.mubr.msk.f32.vlgmr.msra.gmra.mxu0 %vm980_vm0, %v3478_v12  ;;  %v2899_v21 = vsel %vm980_vm0, %v10724_v18, -inf  ;;  %v3476_v12 = vld [vmem:[%s9719_s27 + $0x178] sm:$0xff] }
 0x26e   : > { %8741 = vmatpush3.msra.mxu1 %v3548_v9  ;;  %8755 = vmatpush3.msra.mxu0 %v3552_v46  ;;  %v2934_v9 = vsub.f32 %v10173_v62, %v10312_v34  ;;  %v2716_v46 = vpop.f32.mrf.mxu1  ;;  %v10743_v50 = vpop.eup %9098  ;;  %v2939_v62 = vsub.f32 %v10175_v63, %v10310_v33  ;;  %v11869_v34 = vld [vmem:[#allocation16_spill] sm:$0xff] }
 0x26f   : > { %2882 = vmax.xlane.f32.xlu0 %v2881_v29  ;;  %8742 = vmatprep.subr.mxu1 %v3547_v2  ;;  %v3027_v29 = vmul.f32 1.442695, %v2940_v55  ;;  %v948_v55 = vpop.permute.xlu0 %947 }
 0x270   : > { %2903 = vmax.xlane.f32.xlu1 %v2902_v5  ;;  %8756 = vmatprep.subr.mxu0 %v3551_v36  ;;  %v973_v5 = vpop.permute.xlu1 %972  ;;  %v3015_v63 = vmul.f32 1.442695, %v2934_v9  ;;  %v10759_v33 = vadd.f32 %v10636_v16, %v948_v55 }
 0x271   : > { %8743 = vmatpush3.msra.mxu1 %v3547_v2  ;;  %8757 = vmatpush3.msra.mxu0 %v3551_v36  ;;  %9104 = vpow2.f32 %v3027_v29  ;;  %v10750_v2 = vadd.f32 %v2716_v46, %v973_v5  ;;  %v3148_v36 = vsel %vm980_vm0, %v10734_v19, 0.0  ;;  %v3485_v29 = vld [vmem:[%s9719_s27 + $0x1c0] sm:$0xff]  ;;  %v3556_v5 = vld [vmem:[%s10323_s17 + $0x1f8] sm:$0xff] }
 0x272   : > { %8723 = vmatprep.mubr.msk.f32.mxu1 %vm980_vm0, %v3475_v32  ;;  %8737 = vmatprep.mubr.msk.f32.mxu0 %vm980_vm0, %v3479_v44  ;;  %9106 = vpow2.f32 %v3017_v13  ;;  %v3481_v32 = vld [vmem:[%s9719_s27 + $0x1a0] sm:$0xff]  ;;  %v3025_v44 = vmul.f32 1.442695, %v2939_v62  ;;  %v2896_v62 = vsel %vm980_vm0, %v10759_v33, -inf }
 0x273   : > { %3152 = vadd.xlane.f32.xlu0 %v3151_v23  ;;  %8744 = vmatprep.subr.mxu1 %v3546_v20  ;;  %v2933_v23 = vsub.f32 %v11869_v34, %v10316_v57  ;;  %v3133_v57 = vsel %vm980_vm0, %v10743_v50, 0.0  ;;  %v11871_v13 = vld [vmem:[#allocation15_spill] sm:$0xff]  ;;  %v2911_v46 = vsel %vm980_vm0, %v10750_v2, -inf  ;;  %9108 = vpow2.f32 %v3015_v63  ;;  %v3486_v34 = vld [vmem:[%s9719_s27 + $0x1c8] sm:$0xff]  ;;  %v11875_v63 = vld [vmem:[#allocation17_spill] sm:$0xff] }
 0x274   : > { %3137 = vadd.xlane.f32.xlu1 %v3136_v51  ;;  %8758 = vmatprep.subr.mxu0 %v3550_v30  ;;  %v3549_v51 = vld [vmem:[%s10323_s17 + $0x1c0] sm:$0xff]  ;;  %v968_v55 = vpop.permute.xlu1 %967  ;;  %9110 = vpow2.f32 %v3025_v44  ;;  %v3483_v44 = vld [vmem:[%s9719_s27 + $0x1b0] sm:$0xff] }
 0x275   : > { %8724 = vmatmul.mubr.msk.f32.gmra.mxu1 %vm980_vm0, %v3476_v12  ;;  %8738 = vmatmul.mubr.msk.f32.gmra.mxu0 %vm980_vm0, %v3480_v41  ;;  %v3013_v16 = vmul.f32 1.442695, %v2933_v23  ;;  %v11873_v12 = vld [vmem:[#allocation18_spill] sm:$0xff] }
 0x276   : > { %8745 = vmatpush3.msra.mxu1 %v3546_v20  ;;  %8759 = vmatpush3.msra.mxu0 %v3550_v30  ;;  %v3482_v20 = vld [vmem:[%s9719_s27 + $0x1a8] sm:$0xff] }
 0x277   : > { %2915 = vmax.xlane.f32.xlu0 %v2914_v52  ;;  %8746 = vmatprep.subr.mxu1 %v3545_v28  ;;  %v11870_v52 = vld [vmem:[#allocation26_spill] sm:$0xff]  ;;  %v11872_v30 = vld [vmem:[#allocation28_spill] sm:$0xff]  ;;  %9112 = vpow2.f32 %v3013_v16 }
 0x278   : > { %2900 = vmax.xlane.f32.xlu1 %v2899_v21  ;;  %8760 = vmatprep.subr.mxu0 %v3549_v51  ;;  %v2938_v9 = vsub.f32 %v11871_v13, %v11870_v52  ;;  %v10771_v21 = vpop.eup %9100  ;;  %v2944_v41 = vsub.f32 %v11873_v12, %v11872_v30  ;;  %v11876_v30 = vld [vmem:[#allocation30_spill] sm:$0xff]  ;;  %v11877_v12 = vld [vmem:[#allocation20_spill] sm:$0xff] }
 0x279   : > { %8747 = vmatpush3.msra.mxu1 %v3545_v28  ;;  %8761 = vmatpush3.msra.mxu0 %v3549_v51  ;;  %v10779_v23 = vpop.eup %9102  ;;  %v3555_v28 = vld [vmem:[%s10323_s17 + $0x1f0] sm:$0xff]  ;;  %v11874_v51 = vld [vmem:[#allocation27_spill] sm:$0xff]  ;;  %v3145_v13 = vsel %vm980_vm0, %v10771_v21, 0.0  ;;  %v3484_v16 = vld [vmem:[%s9719_s27 + $0x1b8] sm:$0xff] }
 0x27a   : > { %8748 = vmatprep.mubr.msk.f32.mxu1 %vm980_vm0, %v3481_v32  ;;  %8762 = vmatprep.mubr.msk.f32.mxu0 %vm980_vm0, %v3485_v29  ;;  %v3023_v52 = vmul.f32 1.442695, %v2938_v9  ;;  %v10787_v32 = vadd.f32 %v10667_v7, %v968_v55  ;;  %v3554_v29 = vld [vmem:[%s10323_s17 + $0x1e8] sm:$0xff]  ;;  %v3166_v7 = vsel %vm980_vm0, %v10779_v23, 0.0  ;;  %v11879_v55 = vld [vmem:[#allocation19_spill] sm:$0xff] }
 0x27b   : > { %3149 = vadd.xlane.f32.xlu0 %v3148_v36  ;;  %v943_v36 = vpop.permute.xlu0 %942  ;;  %8768 = vmatprep.subr.mxu1 %v3556_v5 }
 0x27c   : > { %3134 = vadd.xlane.f32.xlu1 %v3133_v57  ;;  %v2937_v57 = vsub.f32 %v11875_v63, %v11874_v51  ;;  %8749 = vmatmul.mubr.msk.f32.vlgmr.msra.gmra.mxu1 %vm980_vm0, %v3482_v20  ;;  %v10797_v9 = vadd.f32 %v10657_v45, %v943_v36  ;;  %9114 = vpow2.f32 %v3023_v52  ;;  %v2908_v45 = vsel %vm980_vm0, %v10787_v32, -inf  ;;  %v3489_v36 = vld [vmem:[%s9719_s27 + $0x1e0] sm:$0xff]  ;;  %v11880_v63 = vld [vmem:[#allocation33_spill] sm:$0xff] }
 0x27d   : > { %8763 = vmatmul.mubr.msk.f32.vlgmr.msra.gmra.mxu0 %vm980_vm0, %v3486_v34  ;;  %8769 = vmatpush3.msra.mxu1 %v3556_v5  ;;  %v3553_v5 = vld [vmem:[%s10323_s17 + $0x1e0] sm:$0xff] }
 0x27e   : > { %8770 = vmatprep.subr.mxu1 %v3555_v28  ;;  %v3021_v20 = vmul.f32 1.442695, %v2937_v57  ;;  %8751 = vmatprep.mubr.msk.f32.mxu1 %vm980_vm0, %v3483_v44  ;;  %v10810_v51 = vpop.eup %9104  ;;  %v11881_v57 = vld [vmem:[#allocation22_spill] sm:$0xff]  ;;  %v963_v44 = vpop.permute.xlu1 %962  ;;  %v2893_v52 = vsel %vm980_vm0, %v10797_v9, -inf }
 0x27f   : > { %2912 = vmax.xlane.f32.xlu0 %v2911_v46  ;;  %v3035_v46 = vmul.f32 1.442695, %v2944_v41  ;;  %8771 = vmatpush3.msra.mxu1 %v3555_v28  ;;  %v11878_v41 = vld [vmem:[#allocation29_spill] sm:$0xff] }
 0x280   : > { %2897 = vmax.xlane.f32.xlu1 %v2896_v62  ;;  %v2943_v62 = vsub.f32 %v11877_v12, %v11876_v30  ;;  %8772 = vmatprep.subr.mxu1 %v3554_v29  ;;  %v2948_v34 = vsub.f32 %v11879_v55, %v11878_v41  ;;  %v3490_v30 = vld [vmem:[%s9719_s27 + $0x1e8] sm:$0xff]  ;;  %v10817_v12 = vpop.eup %9106  ;;  %v10823_v55 = vadd.f32 %v10690_v25, %v963_v44  ;;  %v3487_v25 = vld [vmem:[%s9719_s27 + $0x1d0] sm:$0xff] }
 0x281   : > { %8752 = vmatmul.mubr.msk.f32.gmra.mxu1 %vm980_vm0, %v3484_v16  ;;  %9116 = vpow2.f32 %v3035_v46  ;;  %11882 = vst [vmem:[#allocation16_spill] sm:$0xff] %v10817_v12  ;;  %v11884_v16 = vld [vmem:[#allocation21_spill] sm:$0xff]  ;;  %8765 = vmatprep.mubr.msk.f32.mxu0 %vm980_vm0, %v3487_v25 }
 0x282   : > { %v3033_v28 = vmul.f32 1.442695, %v2943_v62  ;;  %8773 = vmatpush3.msra.mxu1 %v3554_v29  ;;  %9118 = vpow2.f32 %v3021_v20  ;;  %8776 = vmatprep.mubr.msk.f32.mxu1 %vm980_vm0, %v3489_v36  ;;  %v3043_v46 = vmul.f32 1.442695, %v2948_v34  ;;  %v11883_v62 = vld [vmem:[#allocation31_spill] sm:$0xff]  ;;  %v3178_v29 = vsel %vm980_vm0, %v10810_v51, 0.0  ;;  %v10831_v36 = vpop.eup %9108 }
 0x283   : > { %3146 = vadd.xlane.f32.xlu0 %v3145_v13  ;;  %v2942_v13 = vsub.f32 %v11881_v57, %v11880_v63  ;;  %8774 = vmatprep.subr.mxu1 %v3553_v5  ;;  %v2947_v41 = vsub.f32 %v11884_v16, %v11883_v62  ;;  %v3163_v34 = vsel %vm980_vm0, %v10817_v12, 0.0  ;;  %11886 = vst [vmem:[#allocation26_spill] sm:$0xff] %v10831_v36  ;;  %v3491_v63 = vld [vmem:[%s9719_s27 + $0x1f0] sm:$0xff]  ;;  %v10835_v57 = vpop.eup %9110  ;;  %v3492_v62 = vld [vmem:[%s9719_s27 + $0x1f8] sm:$0xff] }
 0x284   : > { %3167 = vadd.xlane.f32.xlu1 %v3166_v7  ;;  %8775 = vmatpush3.msra.mxu1 %v3553_v5  ;;  %9120 = vpow2.f32 %v3033_v28  ;;  %v11888_v28 = vld [vmem:[#allocation23_spill] sm:$0xff]  ;;  %v10845_v16 = vpop.eup %9112 }
 0x285   : > { %8777 = vmatmul.mubr.msk.f32.vlgmr.msra.gmra.mxu1 %vm980_vm0, %v3490_v30  ;;  %v3031_v20 = vmul.f32 1.442695, %v2942_v13  ;;  %9122 = vpow2.f32 %v3043_v46  ;;  %v3041_v44 = vmul.f32 1.442695, %v2947_v41  ;;  %v2905_v13 = vsel %vm980_vm0, %v10823_v55, -inf  ;;  %11889 = vst [vmem:[#allocation15_spill] sm:$0xff] %v10845_v16 }
 0x286   : > { %8779 = vmatprep.mubr.msk.f32.mxu1 %vm980_vm0, %v3491_v63  ;;  %v3160_v46 = vsel %vm980_vm0, %v10831_v36, 0.0  ;;  %v3175_v63 = vsel %vm980_vm0, %v10835_v57, 0.0 }
 0x287   : > { %2909 = vmax.xlane.f32.xlu0 %v2908_v45  ;;  %v11885_v45 = vld [vmem:[#allocation25_spill] sm:$0xff]  ;;  %9124 = vpow2.f32 %v3031_v20  ;;  %v3157_v20 = vsel %vm980_vm0, %v10845_v16, 0.0 }
 0x288   : > { %2894 = vmax.xlane.f32.xlu1 %v2893_v52  ;;  %v11887_v52 = vld [vmem:[#allocation32_spill] sm:$0xff]  ;;  %9126 = vpow2.f32 %v3041_v44 }
 0x289   : > { %v2799_v7 = vpop.xlane.xlu0 %2798  ;;  %v2946_v30 = vsub.f32 %v11888_v28, %v11887_v52  ;;  %8780 = vmatmul.mubr.msk.f32.gmra.mxu1 %vm980_vm0, %v3492_v62  ;;  %v10854_v52 = vpop.eup %9114 }
 0x28a   : > { %v2941_v5 = vsub.f32 %v11885_v45, %v2799_v7  ;;  %v3488_v7 = vld [vmem:[%s9719_s27 + $0x1d8] sm:$0xff]  ;;  %11891 = vst [vmem:[#allocation28_spill] sm:$0xff] %v10854_v52  ;;  %s11567_s27 = scalar_lea.vmem [#allocation8], %s9707_s23  ;;  %s7949_s23 = sshll.u32 %s9545_s25, 13 }
 0x28b   : > { %3179 = vadd.xlane.f32.xlu0 %v3178_v29  ;;  %v2811_v29 = vpop.xlane.xlu1 %2810  ;;  %8766 = vmatmul.mubr.msk.f32.gmra.mxu0 %vm980_vm0, %v3488_v7  ;;  %v3039_v41 = vmul.f32 1.442695, %v2946_v30  ;;  %v3172_v30 = vsel %vm980_vm0, %v10854_v52, 0.0  ;;  %s7448_s10 = sshll.u32 %s11567_s27, 4  ;;  %s11696_s30 = scalar_lea.hbm %s11753_s6, %s7949_s23  ;;  %s11698_s10 = int_to_ptr.vmem [resolvable:$true] %s7448_s10 }
 0x28c   : > { %3164 = vadd.xlane.f32.xlu1 %v3163_v34  ;;  %v3029_v45 = vmul.f32 1.442695, %v2941_v5  ;;  %v11890_v34 = vld [vmem:[#allocation24_spill] sm:$0xff]  ;;  %s7434_s25 = scalar_lea.sflag [#allocation4], %s9704_s1  ;;  %s9410_s16 = scalar_lea.vmem %s11698_s10, 8192 }
 0x28d   : > { %v2945_v25 = vsub.f32 %v11890_v34, %v2811_v29  ;;  %p9411_p7 = scmp.ne.s32.totalorder %s11698_s10, %s9410_s16  ;;  %p9417_p3 = scmp.lt.s32.totalorder %s11698_s10, %s9415_s18 }
 0x28e   : > { %9128 = vpow2.f32 %v3029_v45  ;;  %v10858_v5 = vpop.eup %9116  ;;  %p9418_p9 = scmp.lt.s32.totalorder %s9416_s15, %s9410_s16 }
 0x28f   : > { %2906 = vmax.xlane.f32.xlu0 %v2905_v13  ;;  %11892 = vst [vmem:[#allocation18_spill] sm:$0xff] %v10858_v5  ;;  %v10860_v28 = vpop.eup %9118  ;;  %9130 = vpow2.f32 %v3039_v41  ;;  %v3037_v44 = vmul.f32 1.442695, %v2945_v25  ;;  %v3190_v13 = vsel %vm980_vm0, %v10858_v5, 0.0  ;;  %p9412_p10 = pnand %p9411_p7, %p12012_p8 }
 0x290   : > { %3161 = vadd.xlane.f32.xlu1 %v3160_v46  ;;  %11893 = vst [vmem:[#allocation27_spill] sm:$0xff] %v10860_v28  ;;  %v3169_v62 = vsel %vm980_vm0, %v10860_v28, 0.0  ;;  %v11904_v28 = vld [vmem:[#allocation34_spill] sm:$0xff]  ;;  %p9419_p6 = por %p9418_p9, %p9417_p3 }
 0x291   : > { %v10866_v7 = vpop.eup %9120  ;;  %9132 = vpow2.f32 %v3037_v44  ;;  %p9413_p1 = pneg %p9412_p10 }
 0x292   : > { %11894 = vst [vmem:[#allocation17_spill] sm:$0xff] %v10866_v7  ;;  %v10870_v29 = vpop.eup %9122  ;;  %v3187_v45 = vsel %vm980_vm0, %v10866_v7, 0.0 }
 0x293   : > { %3176 = vadd.xlane.f32.xlu0 %v3175_v63  ;;  %11895 = vst [vmem:[#allocation30_spill] sm:$0xff] %v10870_v29  ;;  %v3202_v41 = vsel %vm980_vm0, %v10870_v29, 0.0  ;;  %p9420_p12 = pnand %p9419_p6, %p9413_p1 }
 0x294   : > { %3158 = vadd.xlane.f32.xlu1 %v3157_v20  ;;  %v10874_v46 = vpop.eup %9124 }
 0x295   : > { %11896 = vst [vmem:[#allocation20_spill] sm:$0xff] %v10874_v46  ;;  %v10878_v34 = vpop.eup %9126  ;;  %v3184_v25 = vsel %vm980_vm0, %v10874_v46, 0.0 }
 0x296   : > { %11897 = vst [vmem:[#allocation29_spill] sm:$0xff] %v10878_v34  ;;  %v3199_v20 = vsel %vm980_vm0, %v10878_v34, 0.0  ;;  %v11902_v34 = vld [vmem:[#allocation37_spill] sm:$0xff] }
 0x297   : > { %3173 = vadd.xlane.f32.xlu0 %v3172_v30 }
 0x298   : > { %3191 = vadd.xlane.f32.xlu1 %v3190_v13 }
 0x29b   : > { %3170 = vadd.xlane.f32.xlu0 %v3169_v62  ;;  %v10882_v63 = vpop.eup %9128 }
 0x29c   : > { %3188 = vadd.xlane.f32.xlu1 %v3187_v45  ;;  %11898 = vst [vmem:[#allocation19_spill] sm:$0xff] %v10882_v63  ;;  %v10886_v44 = vpop.eup %9130  ;;  %v3181_v30 = vsel %vm980_vm0, %v10882_v63, 0.0 }
 0x29d   : > { %11899 = vst [vmem:[#allocation33_spill] sm:$0xff] %v10886_v44  ;;  %v3196_v13 = vsel %vm980_vm0, %v10886_v44, 0.0  ;;  %v11903_v44 = vld [vmem:[#allocation38_spill] sm:$0xff] }
 0x29e   : > { %v10892_v62 = vpop.eup %9132 }
 0x29f   : > { %3203 = vadd.xlane.f32.xlu0 %v3202_v41  ;;  %11900 = vst [vmem:[#allocation22_spill] sm:$0xff] %v10892_v62  ;;  %v3193_v45 = vsel %vm980_vm0, %v10892_v62, 0.0 }
 0x2a0   : > { %3185 = vadd.xlane.f32.xlu1 %v3184_v25  ;;  %v11901_v25 = vld [vmem:[#allocation36_spill] sm:$0xff] }
 0x2a3   : > { %3200 = vadd.xlane.f32.xlu0 %v3199_v20 }
 0x2a4   : > { %3182 = vadd.xlane.f32.xlu1 %v3181_v30 }
 0x2a7   : > { %3197 = vadd.xlane.f32.xlu0 %v3196_v13 }
 0x2a8   : > { %v2826_v63 = vpop.xlane.xlu1 %2825 }
 0x2a9   : > { %v2950_v13 = vsub.f32 %v11904_v28, %v2826_v63 }
 0x2ab   : > { %3194 = vadd.xlane.f32.xlu0 %v3193_v45  ;;  %v11905_v45 = vld [vmem:[#allocation39_spill] sm:$0xff] }
 0x2ac   : > { %v2832_v41 = vpop.xlane.xlu0 %2831  ;;  %v2823_v52 = vpop.xlane.xlu1 %2822 }
 0x2ad   : > { %v2952_v46 = vsub.f32 %v11901_v25, %v2832_v41 }
 0x2af   : > { %v3051_v7 = vmul.f32 1.442695, %v2952_v46  ;;  %v11907_v46 = vld [vmem:[#allocation35_spill] sm:$0xff] }
 0x2b0   : > { %v2949_v25 = vsub.f32 %v11907_v46, %v2823_v52 }
 0x2b1   : > { %9134 = vpow2.f32 %v3051_v7  ;;  %v3047_v7 = vmul.f32 1.442695, %v2950_v13 }
 0x2b2   : > { %v3045_v28 = vmul.f32 1.442695, %v2949_v25 }
 0x2b4   : > { %v2844_v20 = vpop.xlane.xlu0 %2843 }
 0x2b5   : > { %v2956_v5 = vsub.f32 %v11902_v34, %v2844_v20 }
 0x2b7   : > { %v3059_v30 = vmul.f32 1.442695, %v2956_v5 }
 0x2b8   : > { %v2829_v29 = vpop.xlane.xlu0 %2828 }
 0x2b9   : > { %9136 = vpow2.f32 %v3059_v30  ;;  %v2951_v16 = vsub.f32 %v11903_v44, %v2829_v29 }
 0x2bb   : > { %v3049_v36 = vmul.f32 1.442695, %v2951_v16 }
 0x2bc   : > { %v2841_v62 = vpop.xlane.xlu0 %2840 }
 0x2bd   : > { %9138 = vpow2.f32 %v3049_v36  ;;  %v2955_v12 = vsub.f32 %v11905_v45, %v2841_v62 }
 0x2be   : > { %v10901_v41 = vpop.eup %9134 }
 0x2bf   : > { %11906 = vst [vmem:[#allocation31_spill] sm:$0xff] %v10901_v41  ;;  %v3057_v34 = vmul.f32 1.442695, %v2955_v12  ;;  %v3214_v5 = vsel %vm980_vm0, %v10901_v41, 0.0 }
 0x2c0   : > { %v2838_v20 = vpop.xlane.xlu0 %2837  ;;  %3215 = vadd.xlane.f32.xlu1 %v3214_v5 }
 0x2c1   : > { %9140 = vpow2.f32 %v3057_v34  ;;  %v2856_v29 = vpop.xlane.xlu1 %2855  ;;  %v2954_v16 = vsub.f32 %v10433_v26, %v2838_v20 }
 0x2c2   : > { %9142 = vpow2.f32 %v3047_v7  ;;  %v2960_v36 = vsub.f32 %v10444_v17, %v2856_v29 }
 0x2c3   : > { %v3055_v63 = vmul.f32 1.442695, %v2954_v16 }
 0x2c4   : > { %v2835_v44 = vpop.xlane.xlu0 %2834  ;;  %v3067_v13 = vmul.f32 1.442695, %v2960_v36 }
 0x2c5   : > { %9144 = vpow2.f32 %v3055_v63  ;;  %v2853_v62 = vpop.xlane.xlu1 %2852  ;;  %v2953_v52 = vsub.f32 %v10449_v4, %v2835_v44 }
 0x2c6   : > { %v10909_v12 = vpop.eup %9136  ;;  %v2959_v30 = vsub.f32 %v10456_v59, %v2853_v62  ;;  %9146 = vpow2.f32 %v3045_v28 }
 0x2c7   : > { %v3053_v45 = vmul.f32 1.442695, %v2953_v52  ;;  %v3226_v26 = vsel %vm980_vm0, %v10909_v12, 0.0 }
 0x2c8   : > { %3227 = vadd.xlane.f32.xlu0 %v3226_v26  ;;  %v2868_v7 = vpop.xlane.xlu0 %2867  ;;  %v3065_v34 = vmul.f32 1.442695, %v2959_v30 }
 0x2c9   : > { %9148 = vpow2.f32 %v3053_v45  ;;  %v2850_v17 = vpop.xlane.xlu1 %2849  ;;  %v2964_v46 = vsub.f32 %v10468_v61, %v2868_v7 }
 0x2ca   : > { %v10915_v25 = vpop.eup %9138  ;;  %9150 = vpow2.f32 %v3067_v13  ;;  %v2958_v5 = vsub.f32 %v10476_v1, %v2850_v17 }
 0x2cb   : > { %11908 = vst [vmem:[#allocation21_spill] sm:$0xff] %v10915_v25  ;;  %v3075_v4 = vmul.f32 1.442695, %v2964_v46  ;;  %v3211_v59 = vsel %vm980_vm0, %v10915_v25, 0.0 }
 0x2cc   : > { %3212 = vadd.xlane.f32.xlu1 %v3211_v59  ;;  %v2865_v20 = vpop.xlane.xlu0 %2864  ;;  %v3063_v44 = vmul.f32 1.442695, %v2958_v5 }
 0x2cd   : > { %9152 = vpow2.f32 %v3075_v4  ;;  %v3120_v29 = vpop.xlane.xlu1 %3119  ;;  %v2963_v16 = vsub.f32 %v10485_v37, %v2865_v20 }
 0x2ce   : > { %v10921_v28 = vpop.eup %9140  ;;  %9154 = vpow2.f32 %v3065_v34 }
 0x2cf   : > { %11909 = vst [vmem:[#allocation25_spill] sm:$0xff] %v10921_v28  ;;  %9156 = vrcp.f32 %v3120_v29  ;;  %v3073_v61 = vmul.f32 1.442695, %v2963_v16  ;;  %v3223_v36 = vsel %vm980_vm0, %v10921_v28, 0.0  ;;  %v10925_v63 = vpop.eup %9142 }
 0x2d0   : > { %11910 = vst [vmem:[#allocation32_spill] sm:$0xff] %v10925_v63  ;;  %3224 = vadd.xlane.f32.xlu0 %v3223_v36  ;;  %v2862_v62 = vpop.xlane.xlu0 %2861  ;;  %v3208_v45 = vsel %vm980_vm0, %v10925_v63, 0.0 }
 0x2d1   : > { %9158 = vpow2.f32 %v3073_v61  ;;  %v2847_v1 = vpop.xlane.xlu1 %2846  ;;  %v2962_v52 = vsub.f32 %v10504_v60, %v2862_v62 }
 0x2d2   : > { %v10928_v30 = vpop.eup %9144  ;;  %v2957_v37 = vsub.f32 %v10515_v49, %v2847_v1  ;;  %9160 = vpow2.f32 %v3063_v44 }
 0x2d3   : > { %11911 = vst [vmem:[#allocation23_spill] sm:$0xff] %v10928_v30  ;;  %v3071_v13 = vmul.f32 1.442695, %v2962_v52  ;;  %v3220_v26 = vsel %vm980_vm0, %v10928_v30, 0.0  ;;  %v10935_v7 = vpop.eup %9146 }
 0x2d4   : > { %11912 = vst [vmem:[#allocation24_spill] sm:$0xff] %v10935_v7  ;;  %v3061_v17 = vmul.f32 1.442695, %v2957_v37  ;;  %3209 = vadd.xlane.f32.xlu0 %v3208_v45  ;;  %3221 = vadd.xlane.f32.xlu1 %v3220_v26  ;;  %v3132_v46 = vpop.xlane.xlu0 %3131  ;;  %v3205_v49 = vsel %vm980_vm0, %v10935_v7, 0.0 }
 0x2d5   : > { %9162 = vpow2.f32 %v3071_v13  ;;  %v3117_v60 = vpop.xlane.xlu1 %3116 }
 0x2d6   : > { %v10937_v34 = vpop.eup %9148  ;;  %9164 = vpow2.f32 %v3061_v17 }
 0x2d7   : > { %11913 = vst [vmem:[#allocation36_spill] sm:$0xff] %v10937_v34  ;;  %9166 = vrcp.f32 %v3117_v60  ;;  %v3217_v4 = vsel %vm980_vm0, %v10937_v34, 0.0  ;;  %v10943_v59 = vpop.eup %9150 }
 0x2d8   : > { %11914 = vst [vmem:[#allocation37_spill] sm:$0xff] %v10943_v59  ;;  %9168 = vrcp.f32 %v3132_v46  ;;  %3206 = vadd.xlane.f32.xlu1 %v3205_v49  ;;  %3218 = vadd.xlane.f32.xlu0 %v3217_v4  ;;  %v2859_v5 = vpop.xlane.xlu0 %2858  ;;  %v3238_v62 = vsel %vm980_vm0, %v10943_v59, 0.0 }
 0x2d9   : > { %v2880_v20 = vpop.xlane.xlu1 %2879  ;;  %v2961_v29 = vsub.f32 %v10542_v38, %v2859_v5 }
 0x2da   : > { %v10946_v16 = vpop.eup %9152  ;;  %v2968_v61 = vsub.f32 %v10548_v6, %v2880_v20 }
 0x2db   : > { %11915 = vst [vmem:[#allocation38_spill] sm:$0xff] %v10946_v16  ;;  %v10949_v36 = vpop.eup %9154  ;;  %v3069_v44 = vmul.f32 1.442695, %v2961_v29  ;;  %v3250_v1 = vsel %vm980_vm0, %v10946_v16, 0.0 }
 0x2dc   : > { %11916 = vst [vmem:[#allocation34_spill] sm:$0xff] %v10949_v36  ;;  %v9157_v52 = vpop.eup %9156  ;;  %v3083_v37 = vmul.f32 1.442695, %v2968_v61  ;;  %3239 = vadd.xlane.f32.xlu1 %v3238_v62  ;;  %3251 = vadd.xlane.f32.xlu0 %v3250_v1  ;;  %v3129_v13 = vpop.xlane.xlu0 %3128  ;;  %v3235_v6 = vsel %vm980_vm0, %v10949_v36, 0.0 }
 0x2dd   : > { %9170 = vpow2.f32 %v3069_v44  ;;  %v3114_v38 = vpop.xlane.xlu1 %3113  ;;  %v3368_v45 = vmul.f32 %v9157_v52, %v10495_v42 }
 0x2de   : > { %v10956_v26 = vpop.eup %9158  ;;  %9172 = vpow2.f32 %v3083_v37 }
 0x2df   : > { %11917 = vst [vmem:[#allocation39_spill] sm:$0xff] %v10956_v26  ;;  %9174 = vrcp.f32 %v3114_v38  ;;  %8782 = vmatprep.subr.msk.mxu0 %vm980_vm0, %v3368_v45  ;;  %v3247_v17 = vsel %vm980_vm0, %v10956_v26, 0.0  ;;  %v10964_v60 = vpop.eup %9160 }
 0x2e0   : > { %9176 = vrcp.f32 %v3129_v13  ;;  %8783 = vmatpush3.xpose.msk.msra.mxu0 %vm980_vm0, %v3368_v45  ;;  %3236 = vadd.xlane.f32.xlu1 %v3235_v6  ;;  %v2892_v46 = vpop.xlane.xlu0 %2891  ;;  %11918 = vst [vmem:[#allocation35_spill] sm:$0xff] %v10964_v60  ;;  %v3232_v1 = vsel %vm980_vm0, %v10964_v60, 0.0 }
 0x2e1   : > { %v2877_v42 = vpop.xlane.xlu1 %2876  ;;  %3248 = vadd.xlane.f32.xlu0 %v3247_v17  ;;  %v2972_v49 = vsub.f32 %v10575_v0, %v2892_v46 }
 0x2e2   : > { %v10967_v4 = vpop.eup %9162  ;;  %v2967_v5 = vsub.f32 %v10584_v3, %v2877_v42 }
 0x2e3   : > { %11919 = vst [vmem:[#allocation40_spill] sm:$0xff] %v10967_v4  ;;  %v10970_v20 = vpop.eup %9164  ;;  %v3091_v29 = vmul.f32 1.442695, %v2972_v49  ;;  %v3244_v61 = vsel %vm980_vm0, %v10967_v4, 0.0 }
 0x2e4   : > { %11920 = vst [vmem:[#allocation41_spill] sm:$0xff] %v10970_v20  ;;  %v9167_v44 = vpop.eup %9166  ;;  %v3081_v62 = vmul.f32 1.442695, %v2967_v5  ;;  %3245 = vadd.xlane.f32.xlu1 %v3244_v61  ;;  %v3126_v52 = vpop.xlane.xlu0 %3125  ;;  %v3229_v38 = vsel %vm980_vm0, %v10970_v20, 0.0 }
 0x2e5   : > { %v9169_v37 = vpop.eup %9168  ;;  %9178 = vpow2.f32 %v3091_v29  ;;  %v3111_v0 = vpop.xlane.xlu1 %3110  ;;  %3233 = vadd.xlane.f32.xlu0 %v3232_v1  ;;  %v3367_v13 = vmul.f32 %v9167_v44, %v10532_v39 }
 0x2e6   : > { %9180 = vpow2.f32 %v3081_v62  ;;  %v3372_v3 = vmul.f32 %v9169_v37, %v10527_v48 }
 0x2e7   : > { %9182 = vrcp.f32 %v3111_v0  ;;  %8784 = vmatprep.subr.msk.mxu0 %vm980_vm0, %v3367_v13 }
 0x2e8   : > { %9184 = vrcp.f32 %v3126_v52  ;;  %8796 = vmatprep.subr.msk.mxu1 %vm980_vm0, %v3372_v3  ;;  %8785 = vmatpush3.xpose.msk.msra.mxu0 %vm980_vm0, %v3367_v13  ;;  %v2889_v45 = vpop.xlane.xlu0 %2888 }
 0x2e9   : > { %8797 = vmatpush3.xpose.msk.msra.mxu1 %vm980_vm0, %v3372_v3  ;;  %v2874_v6 = vpop.xlane.xlu1 %2873  ;;  %3230 = vadd.xlane.f32.xlu1 %v3229_v38  ;;  %v2971_v39 = vsub.f32 %v10606_v8, %v2889_v45 }
 0x2ea   : > { %v10985_v17 = vpop.eup %9170  ;;  %v2966_v48 = vsub.f32 %v10617_v43, %v2874_v6 }
 0x2eb   : > { %11921 = vst [vmem:[#allocation42_spill] sm:$0xff] %v10985_v17  ;;  %v10988_v46 = vpop.eup %9172  ;;  %v3089_v42 = vmul.f32 1.442695, %v2971_v39  ;;  %v3241_v49 = vsel %vm980_vm0, %v10985_v17, 0.0 }
 0x2ec   : > { %11922 = vst [vmem:[#allocation43_spill] sm:$0xff] %v10988_v46  ;;  %v9175_v5 = vpop.eup %9174  ;;  %v3079_v29 = vmul.f32 1.442695, %v2966_v48  ;;  %v3262_v61 = vsel %vm980_vm0, %v10988_v46, 0.0  ;;  %3242 = vadd.xlane.f32.xlu0 %v3241_v49  ;;  %v3123_v44 = vpop.xlane.xlu0 %3122 }
 0x2ed   : > { %v9177_v62 = vpop.eup %9176  ;;  %9186 = vpow2.f32 %v3089_v42  ;;  %v3144_v8 = vpop.xlane.xlu1 %3143  ;;  %3263 = vadd.xlane.f32.xlu1 %v3262_v61  ;;  %v3366_v1 = vmul.f32 %v9175_v5, %v10570_v22 }
 0x2ee   : > { %9188 = vpow2.f32 %v3079_v29  ;;  %v3371_v43 = vmul.f32 %v9177_v62, %v10563_v31 }
 0x2ef   : > { %9190 = vrcp.f32 %v3144_v8  ;;  %8786 = vmatprep.subr.msk.mxu0 %vm980_vm0, %v3366_v1 }
 0x2f0   : > { %9192 = vrcp.f32 %v3123_v44  ;;  %8798 = vmatprep.subr.msk.mxu1 %vm980_vm0, %v3371_v43  ;;  %8787 = vmatpush3.xpose.msk.msra.mxu0 %vm980_vm0, %v3366_v1  ;;  %v2886_v52 = vpop.xlane.xlu0 %2885 }
 0x2f1   : > { %8799 = vmatpush3.xpose.msk.msra.mxu1 %vm980_vm0, %v3371_v43  ;;  %v2871_v37 = vpop.xlane.xlu1 %2870  ;;  %v2970_v0 = vsub.f32 %v10642_v27, %v2886_v52 }
 0x2f2   : > { %v11001_v13 = vpop.eup %9178  ;;  %v2965_v22 = vsub.f32 %v10653_v14, %v2871_v37 }
 0x2f3   : > { %11923 = vst [vmem:[#allocation44_spill] sm:$0xff] %v11001_v13  ;;  %v11004_v3 = vpop.eup %9180  ;;  %v3087_v31 = vmul.f32 1.442695, %v2970_v0  ;;  %v3274_v38 = vsel %vm980_vm0, %v11001_v13, 0.0 }
 0x2f4   : > { %11924 = vst [vmem:[#allocation45_spill] sm:$0xff] %v11004_v3  ;;  %v9183_v45 = vpop.eup %9182  ;;  %v3077_v6 = vmul.f32 1.442695, %v2965_v22  ;;  %v3259_v39 = vsel %vm980_vm0, %v11004_v3, 0.0  ;;  %3275 = vadd.xlane.f32.xlu0 %v3274_v38  ;;  %v3156_v48 = vpop.xlane.xlu0 %3155 }
 0x2f5   : > { %v9185_v42 = vpop.eup %9184  ;;  %9194 = vpow2.f32 %v3087_v31  ;;  %v11010_v27 = vpop.xlane.xlu1 %3140  ;;  %3260 = vadd.xlane.f32.xlu1 %v3259_v39  ;;  %v3365_v14 = vmul.f32 %v9183_v45, %v10601_v24 }
 0x2f6   : > { %v3370_v49 = vmul.f32 %v9185_v42, %v10594_v53  ;;  %9196 = vpow2.f32 %v3077_v6 }
 0x2f7   : > { %8788 = vmatprep.subr.msk.mxu0 %vm980_vm0, %v3365_v14  ;;  %9198 = vrcp.f32 %v3156_v48 }
 0x2f8   : > { %8800 = vmatprep.subr.msk.mxu1 %vm980_vm0, %v3370_v49  ;;  %8789 = vmatpush3.xpose.msk.msra.mxu0 %vm980_vm0, %v3365_v14  ;;  %v2883_v5 = vpop.xlane.xlu0 %2882 }
 0x2f9   : > { %8801 = vmatpush3.xpose.msk.msra.mxu1 %vm980_vm0, %v3370_v49  ;;  %v2904_v29 = vpop.xlane.xlu1 %2903  ;;  %v2969_v61 = vsub.f32 %v10680_v54, %v2883_v5 }
 0x2fa   : > { %v11019_v44 = vpop.eup %9186  ;;  %v2976_v24 = vsub.f32 %v10692_v10, %v2904_v29 }
 0x2fb   : > { %11925 = vst [vmem:[#allocation46_spill] sm:$0xff] %v11019_v44  ;;  %v11022_v62 = vpop.eup %9188  ;;  %v3085_v53 = vmul.f32 1.442695, %v2969_v61  ;;  %v3271_v8 = vsel %vm980_vm0, %v11019_v44, 0.0 }
 0x2fc   : > { %11926 = vst [vmem:[#allocation47_spill] sm:$0xff] %v11022_v62  ;;  %v9191_v1 = vpop.eup %9190  ;;  %v3099_v43 = vmul.f32 1.442695, %v2976_v24  ;;  %3272 = vadd.xlane.f32.xlu0 %v3271_v8  ;;  %v11026_v52 = vpop.xlane.xlu0 %3152  ;;  %v3256_v22 = vsel %vm980_vm0, %v11022_v62, 0.0 }
 0x2fd   : > { %v9193_v37 = vpop.eup %9192  ;;  %9200 = vpow2.f32 %v3085_v53  ;;  %v11028_v0 = vpop.xlane.xlu1 %3137  ;;  %v11031_v54 = vmul.f32 %v9191_v1, %v10634_v40 }
 0x2fe   : > { %9202 = vpow2.f32 %v3099_v43  ;;  %v3369_v10 = vmul.f32 %v9193_v37, %v10627_v35 }
 0x2ff   : > { %8810 = vmatprep.subr.msk.mxu0 %vm980_vm0, %v11031_v54 }
 0x300   : > { %8802 = vmatprep.subr.msk.mxu1 %vm980_vm0, %v3369_v10  ;;  %3257 = vadd.xlane.f32.xlu0 %v3256_v22  ;;  %v2916_v31 = vpop.xlane.xlu0 %2915 }
 0x301   : > { %8803 = vmatpush3.xpose.msk.msra.mxu1 %vm980_vm0, %v3369_v10  ;;  %v2901_v38 = vpop.xlane.xlu1 %2900  ;;  %v2980_v45 = vsub.f32 %v10714_v56, %v2916_v31 }
 0x302   : > { %v11041_v40 = vpop.eup %9194  ;;  %v2975_v6 = vsub.f32 %v10724_v18, %v2901_v38 }
 0x303   : > { %11927 = vst [vmem:[#allocation48_spill] sm:$0xff] %v11041_v40  ;;  %v3107_v35 = vmul.f32 1.442695, %v2980_v45  ;;  %v3268_v39 = vsel %vm980_vm0, %v11041_v40, 0.0  ;;  %v11046_v48 = vpop.eup %9196 }
 0x304   : > { %11928 = vst [vmem:[#allocation49_spill] sm:$0xff] %v11046_v48  ;;  %v3097_v42 = vmul.f32 1.442695, %v2975_v6  ;;  %3269 = vadd.xlane.f32.xlu1 %v3268_v39  ;;  %v11048_v14 = vpop.xlane.xlu0 %3149  ;;  %v9199_v49 = vpop.eup %9198  ;;  %v3253_v18 = vsel %vm980_vm0, %v11046_v48, 0.0 }
 0x305   : > { %9204 = vpow2.f32 %v3107_v35  ;;  %v11050_v5 = vpop.xlane.xlu1 %3134  ;;  %v11053_v56 = vmul.f32 %v9199_v49, %v10665_v15 }
 0x306   : > { %9206 = vpow2.f32 %v3097_v42 }
 0x307   : > { %8824 = vmatprep.subr.msk.mxu1 %vm980_vm0, %v11053_v56 }
 0x308   : > { %3254 = vadd.xlane.f32.xlu1 %v3253_v18  ;;  %v2913_v29 = vpop.xlane.xlu0 %2912 }
 0x309   : > { %v2898_v61 = vpop.xlane.xlu1 %2897  ;;  %v2979_v24 = vsub.f32 %v10750_v2, %v2913_v29 }
 0x30a   : > { %v11060_v53 = vpop.eup %9200  ;;  %v2974_v8 = vsub.f32 %v10759_v33, %v2898_v61 }
 0x30b   : > { %11929 = vst [vmem:[#allocation50_spill] sm:$0xff] %v11060_v53  ;;  %v11063_v1 = vpop.eup %9202  ;;  %v3105_v43 = vmul.f32 1.442695, %v2979_v24  ;;  %v3265_v15 = vsel %vm980_vm0, %v11060_v53, 0.0 }
 0x30c   : > { %11930 = vst [vmem:[#allocation51_spill] sm:$0xff] %v11063_v1  ;;  %v3095_v37 = vmul.f32 1.442695, %v2974_v8  ;;  %v3286_v10 = vsel %vm980_vm0, %v11063_v1, 0.0  ;;  %3266 = vadd.xlane.f32.xlu0 %v3265_v15  ;;  %v11069_v22 = vpop.xlane.xlu0 %3146 }
 0x30d   : > { %9208 = vpow2.f32 %v3105_v43  ;;  %v11071_v31 = vpop.xlane.xlu1 %3167  ;;  %3287 = vadd.xlane.f32.xlu1 %v3286_v10 }
 0x30e   : > { %9210 = vpow2.f32 %v3095_v37 }
 0x310   : > { %v2910_v2 = vpop.xlane.xlu0 %2909 }
 0x311   : > { %v2895_v33 = vpop.xlane.xlu1 %2894  ;;  %v2978_v38 = vsub.f32 %v10787_v32, %v2910_v2 }
 0x312   : > { %v11074_v45 = vpop.eup %9204  ;;  %v2973_v6 = vsub.f32 %v10797_v9, %v2895_v33 }
 0x313   : > { %11931 = vst [vmem:[#allocation52_spill] sm:$0xff] %v11074_v45  ;;  %v11077_v35 = vpop.eup %9206  ;;  %v3103_v39 = vmul.f32 1.442695, %v2978_v38  ;;  %v3298_v42 = vsel %vm980_vm0, %v11074_v45, 0.0 }
 0x314   : > { %11932 = vst [vmem:[#allocation53_spill] sm:$0xff] %v11077_v35  ;;  %v3093_v49 = vmul.f32 1.442695, %v2973_v6  ;;  %v3283_v18 = vsel %vm980_vm0, %v11077_v35, 0.0  ;;  %3299 = vadd.xlane.f32.xlu0 %v3298_v42  ;;  %v11083_v29 = vpop.xlane.xlu0 %3179  ;;  %v8582_v6 = vpop.f32.mrf.mxu1  ;;  %v11109_v42 = vld [vmem:[%s11752_s5] sm:$0xff] }
 0x315   : > { %9212 = vpow2.f32 %v3103_v39  ;;  %3284 = vadd.xlane.f32.xlu1 %v3283_v18  ;;  %v8568_v39 = vpop.f32.mrf.mxu0 }
 0x316   : > { %9214 = vpow2.f32 %v3093_v49  ;;  %v3736_v49 = vpop.f32.mrf.mxu1 }
 0x317   : > { %v3737_v18 = vadd.f32 %v3736_v49, %v11109_v42  ;;  %v11124_v49 = vpop.xlane.xlu1 %3164 }
 0x318   : > { %v2907_v32 = vpop.xlane.xlu0 %2906 }
 0x319   : > { %v2977_v61 = vsub.f32 %v10823_v55, %v2907_v32  ;;  %v3639_v32 = vpop.f32.mrf.mxu0 }
 0x31a   : > { %v11086_v9 = vpop.eup %9208 }
 0x31b   : > { %11933 = vst [vmem:[#allocation54_spill] sm:$0xff] %v11086_v9  ;;  %v3101_v24 = vmul.f32 1.442695, %v2977_v61  ;;  %v3295_v8 = vsel %vm980_vm0, %v11086_v9, 0.0  ;;  %v11090_v43 = vpop.eup %9210  ;;  %v8585_v61 = vpop.f32.mrf.mxu1 }
 0x31c   : > { %11934 = vst [vmem:[#allocation55_spill] sm:$0xff] %v11090_v43  ;;  %3296 = vadd.xlane.f32.xlu0 %v3295_v8  ;;  %v3280_v15 = vsel %vm980_vm0, %v11090_v43, 0.0  ;;  %v3640_v8 = vadd.f32 %v3639_v32, %v11109_v42  ;;  %v11133_v43 = vld [vmem:[%s11752_s5 + $0x18] sm:$0xff]  ;;  %v11136_v35 = vpop.xlane.xlu1 %3161 }
 0x31d   : > { %9216 = vpow2.f32 %v3101_v24  ;;  %v11115_v24 = vld [vmem:[%s11752_s5 + $0x8] sm:$0xff] }
 0x31e   : > { %9218 = vrcp.f32 %v11026_v52 }
 0x31f   : > { %9220 = vrcp.f32 %v11010_v27 }
 0x320   : > { %3281 = vadd.xlane.f32.xlu0 %v3280_v15  ;;  %v8571_v15 = vpop.f32.mrf.mxu0  ;;  %v11143_v53 = vpop.xlane.xlu1 %3158  ;;  %9222 = vrcp.f32 %v11048_v14 }
 0x321   : > { %9224 = vrcp.f32 %v11028_v0 }
 0x322   : > { %v11094_v37 = vpop.eup %9212  ;;  %9226 = vrcp.f32 %v11069_v22 }
 0x323   : > { %11935 = vst [vmem:[#allocation56_spill] sm:$0xff] %v11094_v37  ;;  %v3292_v10 = vsel %vm980_vm0, %v11094_v37, 0.0  ;;  %v11098_v55 = vpop.eup %9214  ;;  %v3649_v37 = vpop.f32.mrf.mxu0  ;;  %9228 = vrcp.f32 %v11050_v5 }
 0x324   : > { %11936 = vst [vmem:[#allocation57_spill] sm:$0xff] %v11098_v55  ;;  %3293 = vadd.xlane.f32.xlu1 %v3292_v10  ;;  %v3277_v2 = vsel %vm980_vm0, %v11098_v55, 0.0  ;;  %v11121_v10 = vld [vmem:[%s11752_s5 + $0x10] sm:$0xff]  ;;  %9230 = vrcp.f32 %v11083_v29 }
 0x325   : > { %9232 = vrcp.f32 %v11071_v31 }
 0x328   : > { %3278 = vadd.xlane.f32.xlu1 %v3277_v2  ;;  %v3746_v2 = vpop.f32.mrf.mxu1 }
 0x329   : > { %v3747_v55 = vadd.f32 %v3746_v2, %v11121_v10 }
 0x32a   : > { %v11102_v33 = vpop.eup %9216  ;;  %v8610_v32 = vpop.f32.mrf.mxu1 }
 0x32b   : > { %11937 = vst [vmem:[#allocation58_spill] sm:$0xff] %v11102_v33  ;;  %v3289_v38 = vsel %vm980_vm0, %v11102_v33, 0.0  ;;  %v3645_v33 = vadd.f32 %v8568_v39, %v11115_v24  ;;  %v3752_v39 = vadd.f32 %v8585_v61, %v11133_v43  ;;  %v3936_v61 = vadd.f32 %v8610_v32, %v11115_v24  ;;  %v9219_v0 = vpop.eup %9218 }
 0x32c   : > { %3290 = vadd.xlane.f32.xlu0 %v3289_v38  ;;  %v3742_v38 = vadd.f32 %v8582_v6, %v11115_v24  ;;  %v3650_v6 = vadd.f32 %v3649_v37, %v11121_v10  ;;  %v3930_v9 = vpop.f32.mrf.mxu1  ;;  %v9221_v22 = vpop.eup %9220  ;;  %v3379_v5 = vmul.f32 %v9219_v0, %v10702_v11  ;;  %v11956_v0 = vld [vmem:[#allocation27_spill] sm:$0xff] }
 0x32d   : > { %v3375_v31 = vmul.f32 %v9221_v22, %v10674_v58 }
 0x32e   : > { %v8613_v1 = vpop.f32.mrf.mxu1 }
 0x32f   : > { %v3946_v32 = vadd.f32 %v8613_v1, %v11133_v43 }
 0x330   : > { %v3940_v48 = vpop.f32.mrf.mxu1 }
 0x359   : > { %5254 = vxpose.xlu0.b32.start [1/4] (short) (narrow) %v3737_v18, 32  ;;  %v11128_v18 = vpop.xlane.xlu0 %3176 }
 0x35a   : > { %9234 = vrcp.f32 %v11128_v18 }
 0x35b   : > { %5113 = vxpose.xlu1.b32.start [1/4] (short) (narrow) %v3640_v8, 32  ;;  %v8596_v8 = vpop.f32.mrf.mxu0  ;;  %9236 = vrcp.f32 %v11124_v49 }
 0x35d   : > { %5255 = vxpose.xlu0.b32.cont [2/4] (short) (narrow) %v3742_v38, 32  ;;  %v11139_v2 = vpop.xlane.xlu0 %3173  ;;  %v3655_v38 = vadd.f32 %v8571_v15, %v11133_v43  ;;  %v3833_v45 = vpop.f32.mrf.mxu0  ;;  %v3839_v15 = vadd.f32 %v8596_v8, %v11115_v24 }
 0x35e   : > { %v3834_v37 = vadd.f32 %v3833_v45, %v11109_v42  ;;  %9238 = vrcp.f32 %v11139_v2 }
 0x35f   : > { %5114 = vxpose.xlu1.b32.cont [2/4] (short) (narrow) %v3645_v33, 32  ;;  %v3931_v33 = vadd.f32 %v3930_v9, %v11109_v42  ;;  %v3941_v9 = vadd.f32 %v3940_v48, %v11121_v10  ;;  %9240 = vrcp.f32 %v11136_v35 }
 0x361   : > { %5256 = vxpose.xlu0.b32.cont [3/4] (short) (narrow) %v3747_v55, 32  ;;  %v8599_v55 = vpop.f32.mrf.mxu0  ;;  %v11146_v40 = vpop.xlane.xlu0 %3170 }
 0x362   : > { %v3849_v8 = vadd.f32 %v8599_v55, %v11133_v43  ;;  %9242 = vrcp.f32 %v11146_v40 }
 0x363   : > { %5115 = vxpose.xlu1.b32.cont [3/4] (short) (narrow) %v3650_v6, 32  ;;  %v3843_v6 = vpop.f32.mrf.mxu0  ;;  %9244 = vrcp.f32 %v11143_v53 }
 0x364   : > { %v3844_v45 = vadd.f32 %v3843_v6, %v11121_v10 }
 0x365   : > { %5257 = vxpose.xlu0.b32.end [4/4] (short) (narrow) %v3752_v39, 32  ;;  %v8638_v39 = vpop.f32.mrf.mxu1  ;;  %v11153_v62 = vpop.xlane.xlu0 %3203 }
 0x366   : > { %v4130_v1 = vadd.f32 %v8638_v39, %v11115_v24  ;;  %9246 = vrcp.f32 %v11153_v62 }
 0x367   : > { %5116 = vxpose.xlu1.b32.end [4/4] (short) (narrow) %v3655_v38, 32  ;;  %v11151_v38 = vpop.xlane.xlu1 %3191  ;;  %v4124_v44 = vpop.f32.mrf.mxu1 }
 0x368   : > { %v4125_v48 = vadd.f32 %v4124_v44, %v11109_v42  ;;  %9248 = vrcp.f32 %v11151_v38 }
 0x369   : > { %5536 = vxpose.xlu0.b32.start [1/4] (short) (narrow) %v3931_v33, 32  ;;  %v8624_v33 = vpop.f32.mrf.mxu0  ;;  %v8641_v3 = vpop.f32.mrf.mxu1 }
 0x36a   : > { %v4033_v55 = vadd.f32 %v8624_v33, %v11115_v24  ;;  %v4140_v39 = vadd.f32 %v8641_v3, %v11133_v43 }
 0x36b   : > { %5395 = vxpose.xlu1.b32.start [1/4] (short) (narrow) %v3834_v37, 32  ;;  %v11157_v37 = vpop.xlane.xlu1 %3188  ;;  %v4134_v46 = vpop.f32.mrf.mxu1 }
 0x36c   : > { %v4135_v44 = vadd.f32 %v4134_v46, %v11121_v10 }
 0x36d   : > { %5537 = vxpose.xlu0.b32.cont [2/4] (short) (narrow) %v3936_v61, 32  ;;  %v4027_v61 = vpop.f32.mrf.mxu0  ;;  %v8666_v20 = vpop.f32.mrf.mxu1 }
 0x36e   : > { %v4028_v6 = vadd.f32 %v4027_v61, %v11109_v42  ;;  %v4324_v26 = vadd.f32 %v8666_v20, %v11115_v24 }
 0x36f   : > { %5396 = vxpose.xlu1.b32.cont [2/4] (short) (narrow) %v3839_v15, 32  ;;  %v11161_v15 = vpop.xlane.xlu0 %3200  ;;  %v11164_v13 = vpop.xlane.xlu1 %3185 }
 0x370   : > { %v4318_v17 = vpop.f32.mrf.mxu1  ;;  %9250 = vrcp.f32 %v11161_v15 }
 0x371   : > { %5538 = vxpose.xlu0.b32.cont [3/4] (short) (narrow) %v3941_v9, 32  ;;  %v8627_v9 = vpop.f32.mrf.mxu0  ;;  %v4319_v46 = vadd.f32 %v4318_v17, %v11109_v42  ;;  %9252 = vrcp.f32 %v11157_v37 }
 0x372   : > { %v4043_v33 = vadd.f32 %v8627_v9, %v11133_v43 }
 0x373   : > { %5397 = vxpose.xlu1.b32.cont [3/4] (short) (narrow) %v3844_v45, 32  ;;  %v11167_v45 = vpop.xlane.xlu0 %3197 }
 0x375   : > { %5539 = vxpose.xlu0.b32.end [4/4] (short) (narrow) %v3946_v32, 32  ;;  %v4037_v32 = vpop.f32.mrf.mxu0 }
 0x377   : > { %5398 = vxpose.xlu1.b32.end [4/4] (short) (narrow) %v3849_v8, 32  ;;  %v11171_v8 = vpop.xlane.xlu1 %3182  ;;  %v8652_v61 = vpop.f32.mrf.mxu0 }
 0x378   : > { %v11174_v60 = vpop.xlane.xlu0 %3194  ;;  %v4227_v17 = vadd.f32 %v8652_v61, %v11115_v24 }
 0x379   : > { %5818 = vxpose.xlu0.b32.start [1/4] (short) (narrow) %v4125_v48, 32  ;;  %v4038_v48 = vadd.f32 %v4037_v32, %v11121_v10 }
 0x37b   : > { %5677 = vxpose.xlu1.b32.start [1/4] (short) (narrow) %v4028_v6, 32  ;;  %v11177_v6 = vpop.xlane.xlu1 %3215 }
 0x37c   : > { %v11181_v4 = vpop.xlane.xlu0 %3227 }
 0x37d   : > { %5819 = vxpose.xlu0.b32.cont [2/4] (short) (narrow) %v4130_v1, 32  ;;  %v4221_v1 = vpop.f32.mrf.mxu0 }
 0x37e   : > { %v4222_v32 = vadd.f32 %v4221_v1, %v11109_v42 }
 0x37f   : > { %5678 = vxpose.xlu1.b32.cont [2/4] (short) (narrow) %v4033_v55, 32  ;;  %v8669_v55 = vpop.f32.mrf.mxu1  ;;  %v8655_v36 = vpop.f32.mrf.mxu0 }
 0x380   : > { %v4334_v20 = vadd.f32 %v8669_v55, %v11133_v43  ;;  %v4237_v61 = vadd.f32 %v8655_v36, %v11133_v43 }
 0x381   : > { %5820 = vxpose.xlu0.b32.cont [3/4] (short) (narrow) %v4135_v44, 32  ;;  %v11183_v44 = vpop.xlane.xlu1 %3212  ;;  %v4328_v3 = vpop.f32.mrf.mxu1 }
 0x383   : > { %5679 = vxpose.xlu1.b32.cont [3/4] (short) (narrow) %v4038_v48, 32  ;;  %v11186_v48 = vpop.xlane.xlu0 %3224  ;;  %v8694_v59 = vpop.f32.mrf.mxu1 }
 0x384   : > { %v4518_v55 = vadd.f32 %v8694_v59, %v11115_v24 }
 0x385   : > { %5821 = vxpose.xlu0.b32.end [4/4] (short) (narrow) %v4140_v39, 32  ;;  %v11189_v9 = vpop.xlane.xlu1 %3221  ;;  %v4329_v39 = vadd.f32 %v4328_v3, %v11121_v10  ;;  %v4512_v7 = vpop.f32.mrf.mxu1 }
 0x387   : > { %5680 = vxpose.xlu1.b32.end [4/4] (short) (narrow) %v4043_v33, 32  ;;  %v4231_v33 = vpop.f32.mrf.mxu0  ;;  %v11193_v16 = vpop.xlane.xlu0 %3209 }
 0x388   : > { %v8697_v3 = vpop.f32.mrf.mxu1 }
 0x389   : > { %6100 = vxpose.xlu0.b32.start [1/4] (short) (narrow) %v4319_v46, 32  ;;  %v4232_v46 = vadd.f32 %v4231_v33, %v11121_v10  ;;  %v8680_v1 = vpop.f32.mrf.mxu0  ;;  %v11196_v34 = vpop.xlane.xlu1 %3206  ;;  %v4528_v59 = vadd.f32 %v8697_v3, %v11133_v43 }
 0x38a   : > { %v4522_v30 = vpop.f32.mrf.mxu1 }
 0x38b   : > { %5959 = vxpose.xlu1.b32.start [1/4] (short) (narrow) %v4222_v32, 32  ;;  %v4415_v32 = vpop.f32.mrf.mxu0 }
 0x38d   : > { %6101 = vxpose.xlu0.b32.cont [2/4] (short) (narrow) %v4324_v26, 32  ;;  %v4513_v26 = vadd.f32 %v4512_v7, %v11109_v42  ;;  %v8683_v63 = vpop.f32.mrf.mxu0  ;;  %v11203_v33 = vpop.xlane.xlu1 %3239  ;;  %v4421_v7 = vadd.f32 %v8680_v1, %v11115_v24 }
 0x38e   : > { %11938 = vst [vmem:[#allocation59_spill] sm:$0xff] %v11203_v33  ;;  %v4431_v1 = vadd.f32 %v8683_v63, %v11133_v43 }
 0x38f   : > { %5960 = vxpose.xlu1.b32.cont [2/4] (short) (narrow) %v4227_v17, 32  ;;  %v11201_v17 = vpop.xlane.xlu0 %3218 }
 0x391   : > { %6102 = vxpose.xlu0.b32.cont [3/4] (short) (narrow) %v4329_v39, 32  ;;  %v4416_v39 = vadd.f32 %v4415_v32, %v11109_v42 }
 0x393   : > { %5961 = vxpose.xlu1.b32.cont [3/4] (short) (narrow) %v4232_v46, 32  ;;  %v4425_v46 = vpop.f32.mrf.mxu0  ;;  %v11207_v36 = vpop.xlane.xlu0 %3251 }
 0x394   : > { %v4426_v28 = vadd.f32 %v4425_v46, %v11121_v10 }
 0x395   : > { %6103 = vxpose.xlu0.b32.end [4/4] (short) (narrow) %v4334_v20, 32  ;;  %v4523_v20 = vadd.f32 %v4522_v30, %v11121_v10  ;;  %v8708_v25 = vpop.f32.mrf.mxu0 }
 0x397   : > { %5962 = vxpose.xlu1.b32.end [4/4] (short) (narrow) %v4237_v61, 32  ;;  %v11211_v61 = vpop.xlane.xlu1 %3236  ;;  %v4609_v32 = vpop.f32.mrf.mxu0 }
 0x398   : > { %11939 = vst [vmem:[#allocation60_spill] sm:$0xff] %v11211_v61  ;;  %v11214_v41 = vpop.xlane.xlu0 %3248  ;;  %v4610_v30 = vadd.f32 %v4609_v32, %v11109_v42 }
 0x399   : > { %6382 = vxpose.xlu0.b32.start [1/4] (short) (narrow) %v4513_v26, 32  ;;  %v8722_v26 = vpop.f32.mrf.mxu1  ;;  %11940 = vst [vmem:[#allocation61_spill] sm:$0xff] %v11214_v41  ;;  %v8711_v61 = vpop.f32.mrf.mxu0 }
 0x39a   : > { %v4712_v63 = vadd.f32 %v8722_v26, %v11115_v24 }
 0x39b   : > { %6241 = vxpose.xlu1.b32.start [1/4] (short) (narrow) %v4416_v39, 32  ;;  %v11217_v39 = vpop.xlane.xlu1 %3245  ;;  %v4619_v41 = vpop.f32.mrf.mxu0 }
 0x39c   : > { %11941 = vst [vmem:[#allocation62_spill] sm:$0xff] %v11217_v39  ;;  %v4620_v32 = vadd.f32 %v4619_v41, %v11121_v10 }
 0x39d   : > { %6383 = vxpose.xlu0.b32.cont [2/4] (short) (narrow) %v4518_v55, 32  ;;  %v4706_v55 = vpop.f32.mrf.mxu1 }
 0x39e   : > { %v4707_v46 = vadd.f32 %v4706_v55, %v11109_v42 }
 0x39f   : > { %6242 = vxpose.xlu1.b32.cont [2/4] (short) (narrow) %v4421_v7, 32  ;;  %v11221_v7 = vpop.xlane.xlu0 %3233  ;;  %v11224_v33 = vpop.xlane.xlu1 %3230 }
 0x3a0   : > { %11942 = vst [vmem:[#allocation63_spill] sm:$0xff] %v11221_v7  ;;  %11943 = vst [vmem:[#allocation64_spill] sm:$0xff] %v11224_v33 }
 0x3a1   : > { %6384 = vxpose.xlu0.b32.cont [3/4] (short) (narrow) %v4523_v20, 32  ;;  %v8725_v20 = vpop.f32.mrf.mxu1 }
 0x3a2   : > { %v4722_v41 = vadd.f32 %v8725_v20, %v11133_v43 }
 0x3a3   : > { %6243 = vxpose.xlu1.b32.cont [3/4] (short) (narrow) %v4426_v28, 32  ;;  %v4615_v28 = vadd.f32 %v8708_v25, %v11115_v24  ;;  %v11227_v3 = vpop.xlane.xlu0 %3242  ;;  %v11231_v7 = vpop.xlane.xlu1 %3263 }
 0x3a4   : > { %11944 = vst [vmem:[#allocation65_spill] sm:$0xff] %v11227_v3  ;;  %11945 = vst [vmem:[#allocation66_spill] sm:$0xff] %v11231_v7 }
 0x3a5   : > { %6385 = vxpose.xlu0.b32.end [4/4] (short) (narrow) %v4528_v59, 32  ;;  %v4716_v59 = vpop.f32.mrf.mxu1 }
 0x3a6   : > { %v4717_v55 = vadd.f32 %v4716_v59, %v11121_v10 }
 0x3a7   : > { %6244 = vxpose.xlu1.b32.end [4/4] (short) (narrow) %v4431_v1, 32  ;;  %v8736_v1 = vpop.f32.mrf.mxu0  ;;  %v8750_v33 = vpop.f32.mrf.mxu1 }
 0x3a8   : > { %v11237_v3 = vpop.xlane.xlu1 %3260  ;;  %v4906_v20 = vadd.f32 %v8750_v33, %v11115_v24 }
 0x3a9   : > { %6523 = vxpose.xlu0.b32.start [1/4] (short) (narrow) %v4610_v30, 32  ;;  %v11233_v30 = vpop.xlane.xlu0 %3275  ;;  %v4803_v25 = vpop.f32.mrf.mxu0  ;;  %11947 = vst [vmem:[#allocation68_spill] sm:$0xff] %v11237_v3  ;;  %v4809_v3 = vadd.f32 %v8736_v1, %v11115_v24 }
 0x3aa   : > { %11946 = vst [vmem:[#allocation67_spill] sm:$0xff] %v11233_v30 }
 0x3ab   : > { %6664 = vxpose.xlu1.b32.start [1/4] (short) (narrow) %v4707_v46, 32  ;;  %v4625_v46 = vadd.f32 %v8711_v61, %v11133_v43  ;;  %v8739_v7 = vpop.f32.mrf.mxu0 }
 0x3ac   : > { %v11243_v30 = vpop.xlane.xlu1 %3269  ;;  %v4819_v1 = vadd.f32 %v8739_v7, %v11133_v43 }
 0x3ad   : > { %6524 = vxpose.xlu0.b32.cont [2/4] (short) (narrow) %v4615_v28, 32  ;;  %v11239_v26 = vpop.xlane.xlu0 %3272  ;;  %v4804_v28 = vadd.f32 %v4803_v25, %v11109_v42  ;;  %11949 = vst [vmem:[#allocation70_spill] sm:$0xff] %v11243_v30  ;;  %v4813_v61 = vpop.f32.mrf.mxu0 }
 0x3ae   : > { %11948 = vst [vmem:[#allocation69_spill] sm:$0xff] %v11239_v26  ;;  %v4814_v25 = vadd.f32 %v4813_v61, %v11121_v10 }
 0x3af   : > { %6665 = vxpose.xlu1.b32.cont [2/4] (short) (narrow) %v4712_v63, 32  ;;  %v4900_v63 = vpop.f32.mrf.mxu1  ;;  %v8764_v26 = vpop.f32.mrf.mxu0 }
 0x3b1   : > { %6525 = vxpose.xlu0.b32.cont [3/4] (short) (narrow) %v4620_v32, 32  ;;  %v4901_v32 = vadd.f32 %v4900_v63, %v11109_v42  ;;  %v8753_v59 = vpop.f32.mrf.mxu1 }
 0x3b3   : > { %6666 = vxpose.xlu1.b32.cont [3/4] (short) (narrow) %v4717_v55, 32  ;;  %v11246_v55 = vpop.xlane.xlu0 %3257 }
 0x3b4   : > { %11950 = vst [vmem:[#allocation71_spill] sm:$0xff] %v11246_v55  ;;  %v4997_v55 = vpop.f32.mrf.mxu0 }
 0x3b5   : > { %6526 = vxpose.xlu0.b32.end [4/4] (short) (narrow) %v4625_v46, 32  ;;  %v4910_v46 = vpop.f32.mrf.mxu1 }
 0x3b7   : > { %6667 = vxpose.xlu1.b32.end [4/4] (short) (narrow) %v4722_v41, 32  ;;  %v11251_v41 = vpop.xlane.xlu1 %3254  ;;  %v11253_v30 = vpop.xlane.xlu0 %3266 }
 0x3b8   : > { %11951 = vst [vmem:[#allocation72_spill] sm:$0xff] %v11253_v30  ;;  %v8778_v63 = vpop.f32.mrf.mxu1  ;;  %v8767_v30 = vpop.f32.mrf.mxu0 }
 0x3b9   : > { %6805 = vxpose.xlu0.b32.start [1/4] (short) (narrow) %v4804_v28, 32  ;;  %v4911_v28 = vadd.f32 %v4910_v46, %v11121_v10 }
 0x3ba   : > { %v5094_v61 = vpop.f32.mrf.mxu1 }
 0x3bb   : > { %6946 = vxpose.xlu1.b32.start [1/4] (short) (narrow) %v4901_v32, 32  ;;  %v11256_v39 = vpop.xlane.xlu0 %3299  ;;  %v11259_v33 = vpop.xlane.xlu1 %3287  ;;  %v4998_v32 = vadd.f32 %v4997_v55, %v11109_v42  ;;  %v5095_v46 = vadd.f32 %v5094_v61, %v11109_v42 }
 0x3bc   : > { %11952 = vst [vmem:[#allocation73_spill] sm:$0xff] %v11256_v39  ;;  %v8781_v7 = vpop.f32.mrf.mxu1  ;;  %v5003_v39 = vadd.f32 %v8764_v26, %v11115_v24 }
 0x3bd   : > { %6806 = vxpose.xlu0.b32.cont [2/4] (short) (narrow) %v4809_v3, 32  ;;  %v4916_v3 = vadd.f32 %v8753_v59, %v11133_v43  ;;  %v5110_v14 = vadd.f32 %v8781_v7, %v11133_v43 }
 0x3be   : > { %v5104_v42 = vpop.f32.mrf.mxu1 }
 0x3bf   : > { %6947 = vxpose.xlu1.b32.cont [2/4] (short) (narrow) %v4906_v20, 32  ;;  %v11263_v20 = vpop.xlane.xlu0 %3296  ;;  %v5105_v26 = vadd.f32 %v5104_v42, %v11121_v10 }
 0x3c1   : > { %6807 = vxpose.xlu0.b32.cont [3/4] (short) (narrow) %v4814_v25, 32  ;;  %v11265_v25 = vpop.xlane.xlu1 %3284 }
 0x3c3   : > { %6948 = vxpose.xlu1.b32.cont [3/4] (short) (narrow) %v4911_v28, 32  ;;  %v5007_v28 = vpop.f32.mrf.mxu0  ;;  %v11271_v59 = vpop.xlane.xlu0 %3281 }
 0x3c5   : > { %6808 = vxpose.xlu0.b32.end [4/4] (short) (narrow) %v4819_v1, 32  ;;  %v11273_v55 = vpop.xlane.xlu1 %3293  ;;  %v5100_v1 = vadd.f32 %v8778_v63, %v11115_v24  ;;  %v5013_v24 = vadd.f32 %v8767_v30, %v11133_v43  ;;  %v9223_v43 = vpop.eup %9222  ;;  %9254 = vrcp.f32 %v11167_v45 }
 0x3c6   : > { %v9225_v63 = vpop.eup %9224  ;;  %v3378_v11 = vmul.f32 %v9223_v43, %v10734_v19  ;;  %9256 = vrcp.f32 %v11164_v13 }
 0x3c7   : > { %6949 = vxpose.xlu1.b32.end [4/4] (short) (narrow) %v4916_v3, 32  ;;  %v5008_v3 = vadd.f32 %v5007_v28, %v11121_v10  ;;  %v11279_v52 = vpop.xlane.xlu0 %3290  ;;  %v3374_v58 = vmul.f32 %v9225_v63, %v10709_v47 }
 0x3c9   : > { %7087 = vxpose.xlu0.b32.start [1/4] (short) (narrow) %v4998_v32, 32  ;;  %v11283_v27 = vpop.xlane.xlu1 %3278 }
 0x3cb   : > { %7228 = vxpose.xlu1.b32.start [1/4] (short) (narrow) %v5095_v46, 32 }
 0x3cd   : > { %7088 = vxpose.xlu0.b32.cont [2/4] (short) (narrow) %v5003_v39, 32 }
 0x3cf   : > { %7229 = vxpose.xlu1.b32.cont [2/4] (short) (narrow) %v5100_v1, 32 }
 0x3d1   : > { %7089 = vxpose.xlu0.b32.cont [3/4] (short) (narrow) %v5008_v3, 32 }
 0x3d3   : > { %7230 = vxpose.xlu1.b32.cont [3/4] (short) (narrow) %v5105_v26, 32 }
 0x3d5   : > { %7090 = vxpose.xlu0.b32.end [4/4] (short) (narrow) %v5013_v24, 32  ;;  %v5270_v39 = vpop.trf.xlu0  ;;  %v11955_v24 = vld [vmem:[#allocation26_spill] sm:$0xff] }
 0x3d6   : > { %8804 = vmatprep.mubr.msk.f32.mxu1 %vm980_vm0, %v5270_v39 }
 0x3d7   : > { %7231 = vxpose.xlu1.b32.end [4/4] (short) (narrow) %v5110_v14, 32  ;;  %v5129_v10 = vpop.trf.xlu1 }
 0x3d8   : > { %8790 = vmatprep.mubr.msk.f32.mxu0 %vm980_vm0, %v5129_v10 }
 0x3d9   : > { %v5271_v30 = vpop.trf.xlu0 }
 0x3da   : > { %8805 = vmatmul.mubr.msk.f32.vlgmr.msra.gmra.mxu1 %vm980_vm0, %v5271_v30  ;;  %v11957_v30 = vld [vmem:[#allocation15_spill] sm:$0xff] }
 0x3db   : > { %8825 = vmatpush3.xpose.msk.msra.mxu1 %vm980_vm0, %v11053_v56  ;;  %v5130_v29 = vpop.trf.xlu1  ;;  %v9227_v56 = vpop.eup %9226  ;;  %9258 = vrcp.f32 %v11174_v60 }
 0x3dc   : > { %8826 = vmatprep.subr.msk.mxu1 %vm980_vm0, %v3379_v5  ;;  %8791 = vmatmul.mubr.msk.f32.vlgmr.msra.gmra.mxu0 %vm980_vm0, %v5130_v29  ;;  %v3377_v19 = vmul.f32 %v9227_v56, %v10771_v21  ;;  %v11958_v29 = vld [vmem:[#allocation30_spill] sm:$0xff] }
 0x3dd   : > { %8811 = vmatpush3.xpose.msk.msra.mxu0 %vm980_vm0, %v11031_v54  ;;  %v5272_v18 = vpop.trf.xlu0  ;;  %v9229_v54 = vpop.eup %9228  ;;  %9260 = vrcp.f32 %v11171_v8 }
 0x3de   : > { %8812 = vmatprep.subr.msk.mxu0 %vm980_vm0, %v3375_v31  ;;  %8807 = vmatprep.mubr.msk.f32.mxu1 %vm980_vm0, %v5272_v18  ;;  %v9231_v32 = vpop.eup %9230  ;;  %v3373_v47 = vmul.f32 %v9229_v54, %v10743_v50  ;;  %9262 = vrcp.f32 %v11181_v4  ;;  %v11959_v18 = vld [vmem:[#allocation18_spill] sm:$0xff] }
 0x3df   : > { %8827 = vmatpush3.xpose.msk.msra.mxu1 %vm980_vm0, %v3379_v5  ;;  %v5131_v49 = vpop.trf.xlu1  ;;  %v9233_v61 = vpop.eup %9232  ;;  %v3388_v21 = vmul.f32 %v9231_v32, %v10810_v51  ;;  %9264 = vrcp.f32 %v11177_v6 }
 0x3e0   : > { %8828 = vmatprep.subr.msk.mxu1 %vm980_vm0, %v3378_v11  ;;  %8793 = vmatprep.mubr.msk.f32.mxu0 %vm980_vm0, %v5131_v49  ;;  %v9235_v46 = vpop.eup %9234  ;;  %v3384_v50 = vmul.f32 %v9233_v61, %v10779_v23  ;;  %v11953_v23 = vld [vmem:[#allocation16_spill] sm:$0xff]  ;;  %9266 = vrcp.f32 %v11186_v48  ;;  %v11960_v49 = vld [vmem:[#allocation29_spill] sm:$0xff] }
 0x3e1   : > { %8813 = vmatpush3.xpose.msk.msra.mxu0 %vm980_vm0, %v3375_v31  ;;  %v5273_v2 = vpop.trf.xlu0  ;;  %v9237_v7 = vpop.eup %9236  ;;  %v3387_v51 = vmul.f32 %v9235_v46, %v10835_v57  ;;  %v11954_v57 = vld [vmem:[#allocation28_spill] sm:$0xff]  ;;  %9268 = vrcp.f32 %v11183_v44 }
 0x3e2   : > { %8814 = vmatprep.subr.msk.mxu0 %vm980_vm0, %v3374_v58  ;;  %8808 = vmatmul.mubr.msk.f32.gmra.mxu1 %vm980_vm0, %v5273_v2  ;;  %v9239_v28 = vpop.eup %9238  ;;  %v3383_v1 = vmul.f32 %v9237_v7, %v11953_v23  ;;  %v11961_v2 = vld [vmem:[#allocation17_spill] sm:$0xff]  ;;  %9270 = vrcp.f32 %v11189_v9 }
 0x3e3   : > { %8829 = vmatpush3.xpose.msk.msra.mxu1 %vm980_vm0, %v3378_v11  ;;  %v5132_v35 = vpop.trf.xlu1  ;;  %v9241_v3 = vpop.eup %9240  ;;  %v3386_v42 = vmul.f32 %v9239_v28, %v11954_v57  ;;  %9272 = vrcp.f32 %v11193_v16 }
 0x3e4   : > { %8830 = vmatprep.subr.msk.mxu1 %vm980_vm0, %v3377_v19  ;;  %8794 = vmatmul.mubr.msk.f32.gmra.mxu0 %vm980_vm0, %v5132_v35  ;;  %v9243_v26 = vpop.eup %9242  ;;  %v3382_v14 = vmul.f32 %v9241_v3, %v11955_v24  ;;  %v11962_v35 = vld [vmem:[#allocation33_spill] sm:$0xff]  ;;  %9274 = vrcp.f32 %v11201_v17  ;;  %v11967_v3 = vld [vmem:[#allocation31_spill] sm:$0xff] }
 0x3e5   : > { %8815 = vmatpush3.xpose.msk.msra.mxu0 %vm980_vm0, %v3374_v58  ;;  %v5552_v40 = vpop.trf.xlu0  ;;  %v9245_v39 = vpop.eup %9244  ;;  %v3385_v10 = vmul.f32 %v9243_v26, %v11956_v0  ;;  %9276 = vrcp.f32 %v11196_v34 }
 0x3e6   : > { %8816 = vmatprep.subr.msk.mxu0 %vm980_vm0, %v3373_v47  ;;  %8832 = vmatprep.mubr.msk.f32.mxu1 %vm980_vm0, %v5552_v40  ;;  %v9247_v22 = vpop.eup %9246  ;;  %v3381_v5 = vmul.f32 %v9245_v39, %v11957_v30  ;;  %v11963_v40 = vld [vmem:[#allocation20_spill] sm:$0xff]  ;;  %9278 = vrcp.f32 %v11207_v36  ;;  %v11971_v39 = vld [vmem:[#allocation21_spill] sm:$0xff] }
 0x3e7   : > { %8831 = vmatpush3.xpose.msk.msra.mxu1 %vm980_vm0, %v3377_v19  ;;  %v5411_v53 = vpop.trf.xlu1  ;;  %v9249_v43 = vpop.eup %9248  ;;  %v3396_v31 = vmul.f32 %v9247_v22, %v11958_v29  ;;  %v11972_v22 = vld [vmem:[#allocation62_spill] sm:$0xff]  ;;  %v11975_v29 = vld [vmem:[#allocation32_spill] sm:$0xff] }
 0x3e8   : > { %8852 = vmatprep.subr.msk.mxu1 %vm980_vm0, %v3388_v21  ;;  %8818 = vmatprep.mubr.msk.f32.mxu0 %vm980_vm0, %v5411_v53  ;;  %v9251_v63 = vpop.eup %9250  ;;  %v3392_v11 = vmul.f32 %v9249_v43, %v11959_v18  ;;  %v11964_v53 = vld [vmem:[#allocation22_spill] sm:$0xff]  ;;  %v11976_v18 = vld [vmem:[#allocation65_spill] sm:$0xff] }
 0x3e9   : > { %8817 = vmatpush3.xpose.msk.msra.mxu0 %vm980_vm0, %v3373_v47  ;;  %v5553_v62 = vpop.trf.xlu0  ;;  %v9253_v56 = vpop.eup %9252  ;;  %v3395_v58 = vmul.f32 %v9251_v63, %v11960_v49 }
 0x3ea   : > { %8838 = vmatprep.subr.msk.mxu0 %vm980_vm0, %v3384_v50  ;;  %8833 = vmatmul.mubr.msk.f32.vlgmr.msra.gmra.mxu1 %vm980_vm0, %v5553_v62  ;;  %v9255_v54 = vpop.eup %9254  ;;  %v3391_v19 = vmul.f32 %v9253_v56, %v11961_v2  ;;  %v11965_v62 = vld [vmem:[#allocation19_spill] sm:$0xff] }
 0x3eb   : > { %8853 = vmatpush3.xpose.msk.msra.mxu1 %vm980_vm0, %v3388_v21  ;;  %v5412_v38 = vpop.trf.xlu1  ;;  %v9257_v32 = vpop.eup %9256  ;;  %v3394_v47 = vmul.f32 %v9255_v54, %v11962_v35  ;;  %v11979_v54 = vld [vmem:[#allocation24_spill] sm:$0xff] }
 0x3ec   : > { %8854 = vmatprep.subr.msk.mxu1 %vm980_vm0, %v3387_v51  ;;  %8819 = vmatmul.mubr.msk.f32.vlgmr.msra.gmra.mxu0 %vm980_vm0, %v5412_v38  ;;  %v9259_v61 = vpop.eup %9258  ;;  %v3390_v21 = vmul.f32 %v9257_v32, %v11963_v40  ;;  %v11980_v32 = vld [vmem:[#allocation67_spill] sm:$0xff]  ;;  %v11983_v40 = vld [vmem:[#allocation37_spill] sm:$0xff] }
 0x3ed   : > { %8839 = vmatpush3.xpose.msk.msra.mxu0 %vm980_vm0, %v3384_v50  ;;  %v5554_v15 = vpop.trf.xlu0  ;;  %v9261_v46 = vpop.eup %9260  ;;  %v3393_v50 = vmul.f32 %v9259_v61, %v11964_v53  ;;  %v11984_v53 = vld [vmem:[#allocation39_spill] sm:$0xff] }
 0x3ee   : > { %8840 = vmatprep.subr.msk.mxu0 %vm980_vm0, %v3383_v1  ;;  %8835 = vmatprep.mubr.msk.f32.mxu1 %vm980_vm0, %v5554_v15  ;;  %v9263_v7 = vpop.eup %9262 }
 0x3ef   : > { %8855 = vmatpush3.xpose.msk.msra.mxu1 %vm980_vm0, %v3387_v51  ;;  %v5413_v37 = vpop.trf.xlu1  ;;  %v3389_v51 = vmul.f32 %v9261_v46, %v11965_v62  ;;  %v9265_v28 = vpop.eup %9264  ;;  %v3404_v38 = vmul.f32 %v9263_v7, %v10909_v12  ;;  %v11969_v12 = vld [vmem:[#allocation25_spill] sm:$0xff] }
 0x3f0   : > { %8856 = vmatprep.subr.msk.mxu1 %vm980_vm0, %v3386_v42  ;;  %8821 = vmatprep.mubr.msk.f32.mxu0 %vm980_vm0, %v5413_v37  ;;  %v9267_v23 = vpop.eup %9266  ;;  %v3400_v15 = vmul.f32 %v9265_v28, %v11967_v3  ;;  %v11987_v28 = vld [vmem:[#allocation34_spill] sm:$0xff] }
 0x3f1   : > { %8841 = vmatpush3.xpose.msk.msra.mxu0 %vm980_vm0, %v3383_v1  ;;  %v5555_v45 = vpop.trf.xlu0  ;;  %v11966_v1 = vld [vmem:[#allocation59_spill] sm:$0xff]  ;;  %v9269_v57 = vpop.eup %9268  ;;  %v3403_v26 = vmul.f32 %v9267_v23, %v11969_v12 }
 0x3f2   : > { %8842 = vmatprep.subr.msk.mxu0 %vm980_vm0, %v3382_v14  ;;  %8836 = vmatmul.mubr.msk.f32.gmra.mxu1 %vm980_vm0, %v5555_v45  ;;  %9280 = vrcp.f32 %v11966_v1  ;;  %v9271_v37 = vpop.eup %9270  ;;  %v3399_v45 = vmul.f32 %v9269_v57, %v11971_v39 }
 0x3f3   : > { %8857 = vmatpush3.xpose.msk.msra.mxu1 %vm980_vm0, %v3386_v42  ;;  %v5414_v13 = vpop.trf.xlu1  ;;  %v11968_v42 = vld [vmem:[#allocation61_spill] sm:$0xff]  ;;  %v9273_v0 = vpop.eup %9272 }
 0x3f4   : > { %8858 = vmatprep.subr.msk.mxu1 %vm980_vm0, %v3385_v10  ;;  %8822 = vmatmul.mubr.msk.f32.gmra.mxu0 %vm980_vm0, %v5414_v13  ;;  %9282 = vrcp.f32 %v11968_v42  ;;  %v11973_v13 = vld [vmem:[#allocation23_spill] sm:$0xff] }
 0x3f5   : > { %8843 = vmatpush3.xpose.msk.msra.mxu0 %vm980_vm0, %v3382_v14  ;;  %v5834_v60 = vpop.trf.xlu0  ;;  %v11970_v14 = vld [vmem:[#allocation60_spill] sm:$0xff]  ;;  %v3402_v30 = vmul.f32 %v9271_v37, %v11973_v13  ;;  %v11991_v42 = vld [vmem:[#allocation35_spill] sm:$0xff] }
 0x3f6   : > { %8844 = vmatprep.subr.msk.mxu0 %vm980_vm0, %v3381_v5  ;;  %8860 = vmatprep.mubr.msk.f32.mxu1 %vm980_vm0, %v5834_v60  ;;  %9284 = vrcp.f32 %v11970_v14  ;;  %v11974_v60 = vld [vmem:[#allocation63_spill] sm:$0xff] }
 0x3f7   : > { %8859 = vmatpush3.xpose.msk.msra.mxu1 %vm980_vm0, %v3385_v10  ;;  %v5693_v8 = vpop.trf.xlu1  ;;  %9286 = vrcp.f32 %v11972_v22 }
 0x3f8   : > { %8880 = vmatprep.subr.msk.mxu1 %vm980_vm0, %v3396_v31  ;;  %8846 = vmatprep.mubr.msk.f32.mxu0 %vm980_vm0, %v5693_v8  ;;  %9288 = vrcp.f32 %v11974_v60 }
 0x3f9   : > { %8845 = vmatpush3.xpose.msk.msra.mxu0 %vm980_vm0, %v3381_v5  ;;  %v5835_v4 = vpop.trf.xlu0  ;;  %v9275_v5 = vpop.eup %9274  ;;  %9290 = vrcp.f32 %v11976_v18 }
 0x3fa   : > { %8866 = vmatprep.subr.msk.mxu0 %vm980_vm0, %v3392_v11  ;;  %8861 = vmatmul.mubr.msk.f32.vlgmr.msra.gmra.mxu1 %vm980_vm0, %v5835_v4  ;;  %v9277_v63 = vpop.eup %9276 }
 0x3fb   : > { %8881 = vmatpush3.xpose.msk.msra.mxu1 %vm980_vm0, %v3396_v31  ;;  %v5694_v6 = vpop.trf.xlu1  ;;  %v3398_v31 = vmul.f32 %v9273_v0, %v11975_v29  ;;  %v9279_v4 = vpop.eup %9278  ;;  %v11993_v0 = vld [vmem:[#allocation72_spill] sm:$0xff]  ;;  %v11996_v29 = vld [vmem:[#allocation73_spill] sm:$0xff] }
 0x3fc   : > { %8882 = vmatprep.subr.msk.mxu1 %vm980_vm0, %v3395_v58  ;;  %8847 = vmatmul.mubr.msk.f32.vlgmr.msra.gmra.mxu0 %vm980_vm0, %v5694_v6  ;;  %v3397_v6 = vmul.f32 %v9277_v63, %v11979_v54 }
 0x3fd   : > { %8867 = vmatpush3.xpose.msk.msra.mxu0 %vm980_vm0, %v3392_v11  ;;  %v5836_v48 = vpop.trf.xlu0  ;;  %v11977_v11 = vld [vmem:[#allocation36_spill] sm:$0xff] }
 0x3fe   : > { %8868 = vmatprep.subr.msk.mxu0 %vm980_vm0, %v3391_v19  ;;  %8863 = vmatprep.mubr.msk.f32.mxu1 %vm980_vm0, %v5836_v48  ;;  %v3401_v56 = vmul.f32 %v9275_v5, %v11977_v11  ;;  %v11981_v48 = vld [vmem:[#allocation38_spill] sm:$0xff]  ;;  %v11995_v5 = vld [vmem:[#allocation44_spill] sm:$0xff] }
 0x3ff   : > { %8883 = vmatpush3.xpose.msk.msra.mxu1 %vm980_vm0, %v3395_v58  ;;  %v5695_v44 = vpop.trf.xlu1  ;;  %v11978_v58 = vld [vmem:[#allocation64_spill] sm:$0xff]  ;;  %v9281_v2 = vpop.eup %9280  ;;  %v3412_v35 = vmul.f32 %v9279_v4, %v11981_v48 }
 0x400   : > { %8884 = vmatprep.subr.msk.mxu1 %vm980_vm0, %v3394_v47  ;;  %8849 = vmatprep.mubr.msk.f32.mxu0 %vm980_vm0, %v5695_v44  ;;  %9292 = vrcp.f32 %v11978_v58  ;;  %v11982_v44 = vld [vmem:[#allocation66_spill] sm:$0xff] }
 0x401   : > { %8869 = vmatpush3.xpose.msk.msra.mxu0 %vm980_vm0, %v3391_v19  ;;  %v5837_v9 = vpop.trf.xlu0  ;;  %9294 = vrcp.f32 %v11980_v32  ;;  %v12001_v32 = vld [vmem:[#allocation48_spill] sm:$0xff] }
 0x402   : > { %8870 = vmatprep.subr.msk.mxu0 %vm980_vm0, %v3390_v21  ;;  %8864 = vmatmul.mubr.msk.f32.gmra.mxu1 %vm980_vm0, %v5837_v9  ;;  %9296 = vrcp.f32 %v11982_v44 }
 0x403   : > { %8885 = vmatpush3.xpose.msk.msra.mxu1 %vm980_vm0, %v3394_v47  ;;  %v5696_v16 = vpop.trf.xlu1  ;;  %v9283_v47 = vpop.eup %9282 }
 0x404   : > { %8886 = vmatprep.subr.msk.mxu1 %vm980_vm0, %v3393_v50  ;;  %8850 = vmatmul.mubr.msk.f32.gmra.mxu0 %vm980_vm0, %v5696_v16  ;;  %v9285_v46 = vpop.eup %9284  ;;  %v11985_v16 = vld [vmem:[#allocation68_spill] sm:$0xff] }
 0x405   : > { %8871 = vmatpush3.xpose.msk.msra.mxu0 %vm980_vm0, %v3390_v21  ;;  %v6116_v17 = vpop.trf.xlu0  ;;  %v3408_v21 = vmul.f32 %v9281_v2, %v11983_v40  ;;  %v9287_v7 = vpop.eup %9286  ;;  %9298 = vrcp.f32 %v11985_v16  ;;  %v12000_v2 = vld [vmem:[#allocation47_spill] sm:$0xff]  ;;  %v12003_v40 = vld [vmem:[#allocation50_spill] sm:$0xff] }
 0x406   : > { %8872 = vmatprep.subr.msk.mxu0 %vm980_vm0, %v3389_v51  ;;  %8888 = vmatprep.mubr.msk.f32.mxu1 %vm980_vm0, %v6116_v17  ;;  %v3407_v17 = vmul.f32 %v9285_v46, %v11987_v28 }
 0x407   : > { %8887 = vmatpush3.xpose.msk.msra.mxu1 %vm980_vm0, %v3393_v50  ;;  %v5975_v34 = vpop.trf.xlu1  ;;  %v3411_v50 = vmul.f32 %v9283_v47, %v11984_v53  ;;  %v12004_v53 = vld [vmem:[#allocation51_spill] sm:$0xff] }
 0x408   : > { %8908 = vmatprep.subr.msk.mxu1 %vm980_vm0, %v3404_v38  ;;  %8874 = vmatprep.mubr.msk.f32.mxu0 %vm980_vm0, %v5975_v34  ;;  %v11988_v34 = vld [vmem:[#allocation40_spill] sm:$0xff] }
 0x409   : > { %8873 = vmatpush3.xpose.msk.msra.mxu0 %vm980_vm0, %v3389_v51  ;;  %v6117_v36 = vpop.trf.xlu0  ;;  %v11986_v51 = vld [vmem:[#allocation69_spill] sm:$0xff]  ;;  %v3410_v1 = vmul.f32 %v9287_v7, %v11988_v34  ;;  %v12005_v7 = vld [vmem:[#allocation52_spill] sm:$0xff]  ;;  %v12007_v34 = vld [vmem:[#allocation54_spill] sm:$0xff] }
 0x40a   : > { %8894 = vmatprep.subr.msk.mxu0 %vm980_vm0, %v3400_v15  ;;  %8889 = vmatmul.mubr.msk.f32.vlgmr.msra.gmra.mxu1 %vm980_vm0, %v6117_v36  ;;  %9300 = vrcp.f32 %v11986_v51  ;;  %v11990_v36 = vld [vmem:[#allocation70_spill] sm:$0xff] }
 0x40b   : > { %8909 = vmatpush3.xpose.msk.msra.mxu1 %vm980_vm0, %v3404_v38  ;;  %v5976_v24 = vpop.trf.xlu1  ;;  %v9289_v38 = vpop.eup %9288 }
 0x40c   : > { %8910 = vmatprep.subr.msk.mxu1 %vm980_vm0, %v3403_v26  ;;  %8875 = vmatmul.mubr.msk.f32.vlgmr.msra.gmra.mxu0 %vm980_vm0, %v5976_v24  ;;  %v9291_v3 = vpop.eup %9290  ;;  %v3406_v12 = vmul.f32 %v9289_v38, %v11991_v42  ;;  %v11992_v24 = vld [vmem:[#allocation42_spill] sm:$0xff]  ;;  %v12006_v38 = vld [vmem:[#allocation53_spill] sm:$0xff]  ;;  %v12008_v42 = vld [vmem:[#allocation55_spill] sm:$0xff] }
 0x40d   : > { %8895 = vmatpush3.xpose.msk.msra.mxu0 %vm980_vm0, %v3400_v15  ;;  %v6118_v10 = vpop.trf.xlu0  ;;  %v11989_v15 = vld [vmem:[#allocation71_spill] sm:$0xff]  ;;  %v3409_v14 = vmul.f32 %v9291_v3, %v11992_v24 }
 0x40e   : > { %8896 = vmatprep.subr.msk.mxu0 %vm980_vm0, %v3399_v45  ;;  %8891 = vmatprep.mubr.msk.f32.mxu1 %vm980_vm0, %v6118_v10  ;;  %9302 = vrcp.f32 %v11989_v15  ;;  %v11994_v10 = vld [vmem:[#allocation41_spill] sm:$0xff] }
 0x40f   : > { %8911 = vmatpush3.xpose.msk.msra.mxu1 %vm980_vm0, %v3403_v26  ;;  %v5977_v43 = vpop.trf.xlu1  ;;  %9304 = vrcp.f32 %v11990_v36  ;;  %v9293_v26 = vpop.eup %9292 }
 0x410   : > { %8912 = vmatprep.subr.msk.mxu1 %vm980_vm0, %v3402_v30  ;;  %8877 = vmatprep.mubr.msk.f32.mxu0 %vm980_vm0, %v5977_v43  ;;  %v9295_v39 = vpop.eup %9294  ;;  %9306 = vrcp.f32 %v11251_v41  ;;  %v3405_v22 = vmul.f32 %v9293_v26, %v11994_v10  ;;  %v12009_v26 = vld [vmem:[#allocation56_spill] sm:$0xff]  ;;  %v12011_v10 = vld [vmem:[#allocation58_spill] sm:$0xff] }
 0x411   : > { %8897 = vmatpush3.xpose.msk.msra.mxu0 %vm980_vm0, %v3399_v45  ;;  %v6119_v8 = vpop.trf.xlu0  ;;  %9308 = vrcp.f32 %v11993_v0  ;;  %v9297_v13 = vpop.eup %9296  ;;  %v3420_v43 = vmul.f32 %v9295_v39, %v11995_v5 }
 0x412   : > { %8898 = vmatprep.subr.msk.mxu0 %vm980_vm0, %v3398_v31  ;;  %8892 = vmatmul.mubr.msk.f32.gmra.mxu1 %vm980_vm0, %v6119_v8  ;;  %9310 = vrcp.f32 %v11259_v33  ;;  %v9299_v60 = vpop.eup %9298 }
 0x413   : > { %8913 = vmatpush3.xpose.msk.msra.mxu1 %vm980_vm0, %v3402_v30  ;;  %v5978_v49 = vpop.trf.xlu1  ;;  %9312 = vrcp.f32 %v11996_v29 }
 0x414   : > { %8914 = vmatprep.subr.msk.mxu1 %vm980_vm0, %v3401_v56  ;;  %8878 = vmatmul.mubr.msk.f32.gmra.mxu0 %vm980_vm0, %v5978_v49  ;;  %9314 = vrcp.f32 %v11265_v25  ;;  %v11999_v49 = vld [vmem:[#allocation46_spill] sm:$0xff] }
 0x415   : > { %8899 = vmatpush3.xpose.msk.msra.mxu0 %vm980_vm0, %v3398_v31  ;;  %v6398_v19 = vpop.trf.xlu0  ;;  %v11997_v31 = vld [vmem:[#allocation43_spill] sm:$0xff]  ;;  %9316 = vrcp.f32 %v11263_v20 }
 0x416   : > { %8900 = vmatprep.subr.msk.mxu0 %vm980_vm0, %v3397_v6  ;;  %8916 = vmatprep.mubr.msk.f32.mxu1 %vm980_vm0, %v6398_v19  ;;  %v3416_v63 = vmul.f32 %v9297_v13, %v11997_v31  ;;  %9318 = vrcp.f32 %v11271_v59 }
 0x417   : > { %8915 = vmatpush3.xpose.msk.msra.mxu1 %vm980_vm0, %v3401_v56  ;;  %v6257_v61 = vpop.trf.xlu1  ;;  %v9301_v8 = vpop.eup %9300  ;;  %v11998_v56 = vld [vmem:[#allocation45_spill] sm:$0xff]  ;;  %9320 = vrcp.f32 %v11273_v55 }
 0x418   : > { %8936 = vmatprep.subr.msk.mxu1 %vm980_vm0, %v3412_v35  ;;  %8902 = vmatprep.mubr.msk.f32.mxu0 %vm980_vm0, %v6257_v61  ;;  %v3415_v4 = vmul.f32 %v9299_v60, %v11998_v56  ;;  %v3419_v58 = vmul.f32 %v9301_v8, %v11999_v49  ;;  %9322 = vrcp.f32 %v11283_v27  ;;  %v12002_v61 = vld [vmem:[#allocation49_spill] sm:$0xff] }
 0x419   : > { %8901 = vmatpush3.xpose.msk.msra.mxu0 %vm980_vm0, %v3397_v6  ;;  %v6399_v9 = vpop.trf.xlu0  ;;  %9324 = vrcp.f32 %v11279_v52 }
 0x41a   : > { %8922 = vmatprep.subr.msk.mxu0 %vm980_vm0, %v3408_v21  ;;  %8917 = vmatmul.mubr.msk.f32.vlgmr.msra.gmra.mxu1 %vm980_vm0, %v6399_v9 }
 0x41b   : > { %8937 = vmatpush3.xpose.msk.msra.mxu1 %vm980_vm0, %v3412_v35  ;;  %v6258_v62 = vpop.trf.xlu1  ;;  %v9303_v11 = vpop.eup %9302 }
 0x41c   : > { %8938 = vmatprep.subr.msk.mxu1 %vm980_vm0, %v3411_v50  ;;  %8903 = vmatmul.mubr.msk.f32.vlgmr.msra.gmra.mxu0 %vm980_vm0, %v6258_v62  ;;  %v9305_v54 = vpop.eup %9304  ;;  %v3414_v19 = vmul.f32 %v9303_v11, %v12000_v2 }
 0x41d   : > { %8923 = vmatpush3.xpose.msk.msra.mxu0 %vm980_vm0, %v3408_v21  ;;  %v6400_v23 = vpop.trf.xlu0  ;;  %v9307_v25 = vpop.eup %9306  ;;  %v3418_v48 = vmul.f32 %v9305_v54, %v12001_v32 }
 0x41e   : > { %8924 = vmatprep.subr.msk.mxu0 %vm980_vm0, %v3407_v17  ;;  %8919 = vmatprep.mubr.msk.f32.mxu1 %vm980_vm0, %v6400_v23  ;;  %v9309_v35 = vpop.eup %9308  ;;  %v3413_v44 = vmul.f32 %v9307_v25, %v12002_v61 }
 0x41f   : > { %8939 = vmatpush3.xpose.msk.msra.mxu1 %vm980_vm0, %v3411_v50  ;;  %v6259_v57 = vpop.trf.xlu1  ;;  %v9311_v55 = vpop.eup %9310  ;;  %v3417_v21 = vmul.f32 %v9309_v35, %v12003_v40 }
 0x420   : > { %8940 = vmatprep.subr.msk.mxu1 %vm980_vm0, %v3410_v1  ;;  %8905 = vmatprep.mubr.msk.f32.mxu0 %vm980_vm0, %v6259_v57  ;;  %v9313_v46 = vpop.eup %9312  ;;  %v3424_v50 = vmul.f32 %v9311_v55, %v12004_v53 }
 0x421   : > { %8925 = vmatpush3.xpose.msk.msra.mxu0 %vm980_vm0, %v3407_v17  ;;  %v6401_v37 = vpop.trf.xlu0  ;;  %v9315_v52 = vpop.eup %9314  ;;  %v3428_v16 = vmul.f32 %v9313_v46, %v12005_v7 }
 0x422   : > { %8926 = vmatprep.subr.msk.mxu0 %vm980_vm0, %v3406_v12  ;;  %8920 = vmatmul.mubr.msk.f32.gmra.mxu1 %vm980_vm0, %v6401_v37  ;;  %v9317_v62 = vpop.eup %9316  ;;  %v3423_v23 = vmul.f32 %v9315_v52, %v12006_v38 }
 0x423   : > { %8941 = vmatpush3.xpose.msk.msra.mxu1 %vm980_vm0, %v3410_v1  ;;  %v6260_v45 = vpop.trf.xlu1  ;;  %v9319_v17 = vpop.eup %9318  ;;  %v3427_v1 = vmul.f32 %v9317_v62, %v12007_v34 }
 0x424   : > { %8942 = vmatprep.subr.msk.mxu1 %vm980_vm0, %v3409_v14  ;;  %8906 = vmatmul.mubr.msk.f32.gmra.mxu0 %vm980_vm0, %v6260_v45  ;;  %v9321_v3 = vpop.eup %9320  ;;  %v12010_v45 = vld [vmem:[#allocation57_spill] sm:$0xff] }
 0x425   : > { %8927 = vmatpush3.xpose.msk.msra.mxu0 %vm980_vm0, %v3406_v12  ;;  %v6539_v30 = vpop.trf.xlu0  ;;  %v9323_v36 = vpop.eup %9322  ;;  %v3422_v12 = vmul.f32 %v9319_v17, %v12008_v42  ;;  %v3426_v37 = vmul.f32 %v9321_v3, %v12009_v26 }
 0x426   : > { %8928 = vmatprep.subr.msk.mxu0 %vm980_vm0, %v3405_v22  ;;  %8930 = vmatprep.mubr.msk.f32.mxu0 %vm980_vm0, %v6539_v30  ;;  %v9325_v24 = vpop.eup %9324  ;;  %v3421_v0 = vmul.f32 %v9323_v36, %v12010_v45 }
 0x427   : > { %8943 = vmatpush3.xpose.msk.msra.mxu1 %vm980_vm0, %v3409_v14  ;;  %v6680_v41 = vpop.trf.xlu1 }
 0x428   : > { %8964 = vmatprep.subr.msk.mxu1 %vm980_vm0, %v3420_v43  ;;  %8944 = vmatprep.mubr.msk.f32.mxu1 %vm980_vm0, %v6680_v41 }
 0x429   : > { %8929 = vmatpush3.xpose.msk.msra.mxu0 %vm980_vm0, %v3405_v22  ;;  %v6540_v18 = vpop.trf.xlu0  ;;  %v3425_v22 = vmul.f32 %v9325_v24, %v12011_v10 }
 0x42a   : > { %8950 = vmatprep.subr.msk.mxu0 %vm980_vm0, %v3416_v63 }
 0x42b   : > { %v6681_v33 = vpop.trf.xlu1 }
 0x42c   : > { %8931 = vmatmul.mubr.msk.f32.vlgmr.msra.gmra.mxu0 %vm980_vm0, %v6540_v18  ;;  %8945 = vmatmul.mubr.msk.f32.vlgmr.msra.gmra.mxu1 %vm980_vm0, %v6681_v33 }
 0x42d   : > { %8951 = vmatpush3.xpose.msk.msra.mxu0 %vm980_vm0, %v3416_v63  ;;  %8965 = vmatpush3.xpose.msk.msra.mxu1 %vm980_vm0, %v3420_v43  ;;  %v6541_v6 = vpop.trf.xlu0 }
 0x42e   : > { %8952 = vmatprep.subr.msk.mxu0 %vm980_vm0, %v3415_v4  ;;  %8966 = vmatprep.subr.msk.mxu1 %vm980_vm0, %v3419_v58 }
 0x42f   : > { %v6682_v20 = vpop.trf.xlu1  ;;  %8933 = vmatprep.mubr.msk.f32.mxu0 %vm980_vm0, %v6541_v6 }
 0x430   : > { %8947 = vmatprep.mubr.msk.f32.mxu1 %vm980_vm0, %v6682_v20 }
 0x431   : > { %8953 = vmatpush3.xpose.msk.msra.mxu0 %vm980_vm0, %v3415_v4  ;;  %8967 = vmatpush3.xpose.msk.msra.mxu1 %vm980_vm0, %v3419_v58  ;;  %v6542_v47 = vpop.trf.xlu0 }
 0x432   : > { %8954 = vmatprep.subr.msk.mxu0 %vm980_vm0, %v3414_v19  ;;  %8968 = vmatprep.subr.msk.mxu1 %vm980_vm0, %v3418_v48 }
 0x433   : > { %8934 = vmatmul.mubr.msk.f32.gmra.mxu0 %vm980_vm0, %v6542_v47  ;;  %v6683_v59 = vpop.trf.xlu1 }
 0x434   : > { %8948 = vmatmul.mubr.msk.f32.gmra.mxu1 %vm980_vm0, %v6683_v59 }
 0x435   : > { %8955 = vmatpush3.xpose.msk.msra.mxu0 %vm980_vm0, %v3414_v19  ;;  %8969 = vmatpush3.xpose.msk.msra.mxu1 %vm980_vm0, %v3418_v48  ;;  %v6821_v9 = vpop.trf.xlu0 }
 0x436   : > { %8956 = vmatprep.subr.msk.mxu0 %vm980_vm0, %v3413_v44  ;;  %8970 = vmatprep.subr.msk.mxu1 %vm980_vm0, %v3417_v21 }
 0x437   : > { %v6962_v27 = vpop.trf.xlu1  ;;  %8958 = vmatprep.mubr.msk.f32.mxu0 %vm980_vm0, %v6821_v9 }
 0x438   : > { %8972 = vmatprep.mubr.msk.f32.mxu1 %vm980_vm0, %v6962_v27 }
 0x439   : > { %8957 = vmatpush3.xpose.msk.msra.mxu0 %vm980_vm0, %v3413_v44  ;;  %8971 = vmatpush3.xpose.msk.msra.mxu1 %vm980_vm0, %v3417_v21  ;;  %v6822_v51 = vpop.trf.xlu0 }
 0x43a   : > { %8978 = vmatprep.subr.msk.mxu0 %vm980_vm0, %v3424_v50  ;;  %8992 = vmatprep.subr.msk.mxu1 %vm980_vm0, %v3428_v16 }
 0x43b   : > { %v6963_v28 = vpop.trf.xlu1 }
 0x43c   : > { %8959 = vmatmul.mubr.msk.f32.vlgmr.msra.gmra.mxu0 %vm980_vm0, %v6822_v51  ;;  %8973 = vmatmul.mubr.msk.f32.vlgmr.msra.gmra.mxu1 %vm980_vm0, %v6963_v28 }
 0x43d   : > { %8979 = vmatpush3.xpose.msk.msra.mxu0 %vm980_vm0, %v3424_v50  ;;  %8993 = vmatpush3.xpose.msk.msra.mxu1 %vm980_vm0, %v3428_v16  ;;  %v6823_v15 = vpop.trf.xlu0 }
 0x43e   : > { %8980 = vmatprep.subr.msk.mxu0 %vm980_vm0, %v3423_v23  ;;  %8994 = vmatprep.subr.msk.mxu1 %vm980_vm0, %v3427_v1 }
 0x43f   : > { %v6964_v57 = vpop.trf.xlu1  ;;  %8961 = vmatprep.mubr.msk.f32.mxu0 %vm980_vm0, %v6823_v15 }
 0x440   : > { %8975 = vmatprep.mubr.msk.f32.mxu1 %vm980_vm0, %v6964_v57 }
 0x441   : > { %8981 = vmatpush3.xpose.msk.msra.mxu0 %vm980_vm0, %v3423_v23  ;;  %8995 = vmatpush3.xpose.msk.msra.mxu1 %vm980_vm0, %v3427_v1  ;;  %v6824_v14 = vpop.trf.xlu0 }
 0x442   : > { %8982 = vmatprep.subr.msk.mxu0 %vm980_vm0, %v3422_v12  ;;  %8996 = vmatprep.subr.msk.mxu1 %vm980_vm0, %v3426_v37 }
 0x443   : > { %8962 = vmatmul.mubr.msk.f32.gmra.mxu0 %vm980_vm0, %v6824_v14  ;;  %v6965_v39 = vpop.trf.xlu1 }
 0x444   : > { %8976 = vmatmul.mubr.msk.f32.gmra.mxu1 %vm980_vm0, %v6965_v39 }
 0x445   : > { %8983 = vmatpush3.xpose.msk.msra.mxu0 %vm980_vm0, %v3422_v12  ;;  %8997 = vmatpush3.xpose.msk.msra.mxu1 %vm980_vm0, %v3426_v37  ;;  %v7103_v13 = vpop.trf.xlu0 }
 0x446   : > { %8984 = vmatprep.subr.msk.mxu0 %vm980_vm0, %v3421_v0  ;;  %8998 = vmatprep.subr.msk.mxu1 %vm980_vm0, %v3425_v22 }
 0x447   : > { %v7244_v30 = vpop.trf.xlu1  ;;  %8986 = vmatprep.mubr.msk.f32.mxu0 %vm980_vm0, %v7103_v13 }
 0x448   : > { %9000 = vmatprep.mubr.msk.f32.mxu1 %vm980_vm0, %v7244_v30 }
 0x449   : > { %8985 = vmatpush3.xpose.msk.msra.mxu0 %vm980_vm0, %v3421_v0  ;;  %8999 = vmatpush3.xpose.msk.msra.mxu1 %vm980_vm0, %v3425_v22  ;;  %v7104_v5 = vpop.trf.xlu0 }
 0x44b   : > { %v7245_v43 = vpop.trf.xlu1 }
 0x44c   : > { %8987 = vmatmul.mubr.msk.f32.vlgmr.msra.gmra.mxu0 %vm980_vm0, %v7104_v5  ;;  %9001 = vmatmul.mubr.msk.f32.vlgmr.msra.gmra.mxu1 %vm980_vm0, %v7245_v43 }
 0x44d   : > { %v7105_v41 = vpop.trf.xlu0 }
 0x44e   : > { %8989 = vmatprep.mubr.msk.f32.mxu0 %vm980_vm0, %v7105_v41 }
 0x44f   : > { %v7246_v60 = vpop.trf.xlu1 }
 0x450   : > { %9003 = vmatprep.mubr.msk.f32.mxu1 %vm980_vm0, %v7246_v60 }
 0x451   : > { %v7106_v29 = vpop.trf.xlu0 }
 0x452   : > { %8990 = vmatmul.mubr.msk.f32.gmra.mxu0 %vm980_vm0, %v7106_v29 }
 0x453   : > { %v7247_v31 = vpop.trf.xlu1 }
 0x454   : > { %9004 = vmatmul.mubr.msk.f32.gmra.mxu1 %vm980_vm0, %v7247_v31 }
 0x49a   : > { %v8806_v63 = vpop.f32.mrf.mxu1 }
 0x49b   : > { %7374 = vst.msk [vmem:[%s11567_s27 + $0x28] sm:$0xff] %vm980_vm0, %v8806_v63 }
 0x49c   : > { %v8792_v8 = vpop.f32.mrf.mxu0  ;;  %v5376_v18 = vpop.f32.mrf.mxu1 }
 0x49d   : > { %7370 = vst.msk [vmem:[%s11567_s27 + $0x8] sm:$0xff] %vm980_vm0, %v8792_v8  ;;  %7373 = vst.msk [vmem:[%s11567_s27 + $0x20] sm:$0xff] %vm980_vm0, %v5376_v18 }
 0x49e   : > { %v5235_v33 = vpop.f32.mrf.mxu0 }
 0x49f   : > { %7369 = vst.msk [vmem:[%s11567_s27] sm:$0xff] %vm980_vm0, %v5235_v33 }
 0x4a2   : > { %v8809_v11 = vpop.f32.mrf.mxu1 }
 0x4a3   : > { %7376 = vst.msk [vmem:[%s11567_s27 + $0x38] sm:$0xff] %vm980_vm0, %v8809_v11 }
 0x4a4   : > { %v8795_v56 = vpop.f32.mrf.mxu0  ;;  %v5386_v4 = vpop.f32.mrf.mxu1 }
 0x4a5   : > { %7372 = vst.msk [vmem:[%s11567_s27 + $0x18] sm:$0xff] %vm980_vm0, %v8795_v56  ;;  %7375 = vst.msk [vmem:[%s11567_s27 + $0x30] sm:$0xff] %vm980_vm0, %v5386_v4 }
 0x4a6   : > { %v5245_v49 = vpop.f32.mrf.mxu0 }
 0x4a7   : > { %7371 = vst.msk [vmem:[%s11567_s27 + $0x10] sm:$0xff] %vm980_vm0, %v5245_v49 }
 0x4aa   : > { %v8834_v58 = vpop.f32.mrf.mxu1 }
 0x4ab   : > { %7382 = vst.msk [vmem:[%s11567_s27 + $0x68] sm:$0xff] %vm980_vm0, %v8834_v58 }
 0x4ac   : > { %v8820_v54 = vpop.f32.mrf.mxu0  ;;  %v5658_v6 = vpop.f32.mrf.mxu1 }
 0x4ad   : > { %7378 = vst.msk [vmem:[%s11567_s27 + $0x48] sm:$0xff] %vm980_vm0, %v8820_v54  ;;  %7381 = vst.msk [vmem:[%s11567_s27 + $0x60] sm:$0xff] %vm980_vm0, %v5658_v6 }
 0x4ae   : > { %v5517_v20 = vpop.f32.mrf.mxu0 }
 0x4af   : > { %7377 = vst.msk [vmem:[%s11567_s27 + $0x40] sm:$0xff] %vm980_vm0, %v5517_v20 }
 0x4b2   : > { %v8837_v25 = vpop.f32.mrf.mxu1 }
 0x4b3   : > { %7384 = vst.msk [vmem:[%s11567_s27 + $0x78] sm:$0xff] %vm980_vm0, %v8837_v25 }
 0x4b4   : > { %v8823_v2 = vpop.f32.mrf.mxu0  ;;  %v5668_v19 = vpop.f32.mrf.mxu1 }
 0x4b5   : > { %7380 = vst.msk [vmem:[%s11567_s27 + $0x58] sm:$0xff] %vm980_vm0, %v8823_v2  ;;  %7383 = vst.msk [vmem:[%s11567_s27 + $0x70] sm:$0xff] %vm980_vm0, %v5668_v19 }
 0x4b6   : > { %v5527_v32 = vpop.f32.mrf.mxu0 }
 0x4b7   : > { %7379 = vst.msk [vmem:[%s11567_s27 + $0x50] sm:$0xff] %vm980_vm0, %v5527_v32 }
 0x4ba   : > { %v8862_v48 = vpop.f32.mrf.mxu1 }
 0x4bb   : > { %7390 = vst.msk [vmem:[%s11567_s27 + $0xa8] sm:$0xff] %vm980_vm0, %v8862_v48 }
 0x4bc   : > { %v8848_v35 = vpop.f32.mrf.mxu0  ;;  %v5940_v47 = vpop.f32.mrf.mxu1 }
 0x4bd   : > { %7386 = vst.msk [vmem:[%s11567_s27 + $0x88] sm:$0xff] %vm980_vm0, %v8848_v35  ;;  %7389 = vst.msk [vmem:[%s11567_s27 + $0xa0] sm:$0xff] %vm980_vm0, %v5940_v47 }
 0x4be   : > { %v5799_v59 = vpop.f32.mrf.mxu0 }
 0x4bf   : > { %7385 = vst.msk [vmem:[%s11567_s27 + $0x80] sm:$0xff] %vm980_vm0, %v5799_v59 }
 0x4c2   : > { %v8865_v55 = vpop.f32.mrf.mxu1 }
 0x4c3   : > { %7392 = vst.msk [vmem:[%s11567_s27 + $0xb8] sm:$0xff] %vm980_vm0, %v8865_v55 }
 0x4c4   : > { %v8851_v61 = vpop.f32.mrf.mxu0  ;;  %v5950_v44 = vpop.f32.mrf.mxu1 }
 0x4c5   : > { %7388 = vst.msk [vmem:[%s11567_s27 + $0x98] sm:$0xff] %vm980_vm0, %v8851_v61  ;;  %7391 = vst.msk [vmem:[%s11567_s27 + $0xb0] sm:$0xff] %vm980_vm0, %v5950_v44 }
 0x4c6   : > { %v5809_v40 = vpop.f32.mrf.mxu0 }
 0x4c7   : > { %7387 = vst.msk [vmem:[%s11567_s27 + $0x90] sm:$0xff] %vm980_vm0, %v5809_v40 }
 0x4ca   : > { %v8890_v21 = vpop.f32.mrf.mxu1 }
 0x4cb   : > { %7398 = vst.msk [vmem:[%s11567_s27 + $0xe8] sm:$0xff] %vm980_vm0, %v8890_v21 }
 0x4cc   : > { %v8876_v46 = vpop.f32.mrf.mxu0  ;;  %v6222_v9 = vpop.f32.mrf.mxu1 }
 0x4cd   : > { %7394 = vst.msk [vmem:[%s11567_s27 + $0xc8] sm:$0xff] %vm980_vm0, %v8876_v46  ;;  %7397 = vst.msk [vmem:[%s11567_s27 + $0xe0] sm:$0xff] %vm980_vm0, %v6222_v9 }
 0x4ce   : > { %v6081_v27 = vpop.f32.mrf.mxu0 }
 0x4cf   : > { %7393 = vst.msk [vmem:[%s11567_s27 + $0xc0] sm:$0xff] %vm980_vm0, %v6081_v27 }
 0x4d2   : > { %v8893_v52 = vpop.f32.mrf.mxu1 }
 0x4d3   : > { %7400 = vst.msk [vmem:[%s11567_s27 + $0xf8] sm:$0xff] %vm980_vm0, %v8893_v52 }
 0x4d4   : > { %v8879_v53 = vpop.f32.mrf.mxu0  ;;  %v6232_v50 = vpop.f32.mrf.mxu1 }
 0x4d5   : > { %7396 = vst.msk [vmem:[%s11567_s27 + $0xd8] sm:$0xff] %vm980_vm0, %v8879_v53  ;;  %7399 = vst.msk [vmem:[%s11567_s27 + $0xf0] sm:$0xff] %vm980_vm0, %v6232_v50 }
 0x4d6   : > { %v6091_v7 = vpop.f32.mrf.mxu0 }
 0x4d7   : > { %7395 = vst.msk [vmem:[%s11567_s27 + $0xd0] sm:$0xff] %vm980_vm0, %v6091_v7 }
 0x4da   : > { %v8918_v16 = vpop.f32.mrf.mxu1 }
 0x4db   : > { %7406 = vst.msk [vmem:[%s11567_s27 + $0x128] sm:$0xff] %vm980_vm0, %v8918_v16 }
 0x4dc   : > { %v8904_v62 = vpop.f32.mrf.mxu0  ;;  %v6504_v51 = vpop.f32.mrf.mxu1 }
 0x4dd   : > { %7402 = vst.msk [vmem:[%s11567_s27 + $0x108] sm:$0xff] %vm980_vm0, %v8904_v62  ;;  %7405 = vst.msk [vmem:[%s11567_s27 + $0x120] sm:$0xff] %vm980_vm0, %v6504_v51 }
 0x4de   : > { %v6363_v28 = vpop.f32.mrf.mxu0 }
 0x4df   : > { %7401 = vst.msk [vmem:[%s11567_s27 + $0x100] sm:$0xff] %vm980_vm0, %v6363_v28 }
 0x4e2   : > { %v8921_v17 = vpop.f32.mrf.mxu1 }
 0x4e3   : > { %7408 = vst.msk [vmem:[%s11567_s27 + $0x138] sm:$0xff] %vm980_vm0, %v8921_v17 }
 0x4e4   : > { %v8907_v38 = vpop.f32.mrf.mxu0  ;;  %v6514_v23 = vpop.f32.mrf.mxu1 }
 0x4e5   : > { %7404 = vst.msk [vmem:[%s11567_s27 + $0x118] sm:$0xff] %vm980_vm0, %v8907_v38  ;;  %7407 = vst.msk [vmem:[%s11567_s27 + $0x130] sm:$0xff] %vm980_vm0, %v6514_v23 }
 0x4e6   : > { %v6373_v34 = vpop.f32.mrf.mxu0 }
 0x4e7   : > { %7403 = vst.msk [vmem:[%s11567_s27 + $0x110] sm:$0xff] %vm980_vm0, %v6373_v34 }
 0x4ec   : > { %v8932_v1 = vpop.f32.mrf.mxu0  ;;  %v8946_v3 = vpop.f32.mrf.mxu1 }
 0x4ed   : > { %7410 = vst.msk [vmem:[%s11567_s27 + $0x148] sm:$0xff] %vm980_vm0, %v8932_v1  ;;  %7414 = vst.msk [vmem:[%s11567_s27 + $0x168] sm:$0xff] %vm980_vm0, %v8946_v3 }
 0x4ee   : > { %v6645_v15 = vpop.f32.mrf.mxu0  ;;  %v6786_v57 = vpop.f32.mrf.mxu1 }
 0x4ef   : > { %7409 = vst.msk [vmem:[%s11567_s27 + $0x140] sm:$0xff] %vm980_vm0, %v6645_v15  ;;  %7413 = vst.msk [vmem:[%s11567_s27 + $0x160] sm:$0xff] %vm980_vm0, %v6786_v57 }
 0x4f3   : > { %v8935_v36 = vpop.f32.mrf.mxu0 }
 0x4f4   : > { %7412 = vst.msk [vmem:[%s11567_s27 + $0x158] sm:$0xff] %vm980_vm0, %v8935_v36  ;;  %v8949_v42 = vpop.f32.mrf.mxu1 }
 0x4f5   : > { %v6655_v12 = vpop.f32.mrf.mxu0  ;;  %7416 = vst.msk [vmem:[%s11567_s27 + $0x178] sm:$0xff] %vm980_vm0, %v8949_v42 }
 0x4f6   : > { %7411 = vst.msk [vmem:[%s11567_s27 + $0x150] sm:$0xff] %vm980_vm0, %v6655_v12  ;;  %v6796_v26 = vpop.f32.mrf.mxu1 }
 0x4f7   : > { %7415 = vst.msk [vmem:[%s11567_s27 + $0x170] sm:$0xff] %vm980_vm0, %v6796_v26 }
 0x4fc   : > { %v8960_v37 = vpop.f32.mrf.mxu0  ;;  %v8974_v24 = vpop.f32.mrf.mxu1 }
 0x4fd   : > { %7418 = vst.msk [vmem:[%s11567_s27 + $0x188] sm:$0xff] %vm980_vm0, %v8960_v37  ;;  %7422 = vst.msk [vmem:[%s11567_s27 + $0x1a8] sm:$0xff] %vm980_vm0, %v8974_v24 }
 0x4fe   : > { %v6927_v14 = vpop.f32.mrf.mxu0  ;;  %v7068_v39 = vpop.f32.mrf.mxu1 }
 0x4ff   : > { %7417 = vst.msk [vmem:[%s11567_s27 + $0x180] sm:$0xff] %vm980_vm0, %v6927_v14  ;;  %7421 = vst.msk [vmem:[%s11567_s27 + $0x1a0] sm:$0xff] %vm980_vm0, %v7068_v39 }
 0x503   : > { %v8963_v45 = vpop.f32.mrf.mxu0 }
 0x504   : > { %7420 = vst.msk [vmem:[%s11567_s27 + $0x198] sm:$0xff] %vm980_vm0, %v8963_v45  ;;  %v8977_v0 = vpop.f32.mrf.mxu1 }
 0x505   : > { %v6937_v10 = vpop.f32.mrf.mxu0  ;;  %7424 = vst.msk [vmem:[%s11567_s27 + $0x1b8] sm:$0xff] %vm980_vm0, %v8977_v0 }
 0x506   : > { %7419 = vst.msk [vmem:[%s11567_s27 + $0x190] sm:$0xff] %vm980_vm0, %v6937_v10  ;;  %v7078_v22 = vpop.f32.mrf.mxu1 }
 0x507   : > { %7423 = vst.msk [vmem:[%s11567_s27 + $0x1b0] sm:$0xff] %vm980_vm0, %v7078_v22 }
 0x50c   : > { %v8988_v13 = vpop.f32.mrf.mxu0  ;;  %v9002_v30 = vpop.f32.mrf.mxu1 }
 0x50d   : > { %7426 = vst.msk [vmem:[%s11567_s27 + $0x1c8] sm:$0xff] %vm980_vm0, %v8988_v13  ;;  %7430 = vst.msk [vmem:[%s11567_s27 + $0x1e8] sm:$0xff] %vm980_vm0, %v9002_v30 }
 0x50e   : > { %v7209_v5 = vpop.f32.mrf.mxu0  ;;  %v7350_v43 = vpop.f32.mrf.mxu1 }
 0x50f   : > { %7425 = vst.msk [vmem:[%s11567_s27 + $0x1c0] sm:$0xff] %vm980_vm0, %v7209_v5  ;;  %7429 = vst.msk [vmem:[%s11567_s27 + $0x1e0] sm:$0xff] %vm980_vm0, %v7350_v43 }
 0x512   : > { %v8991_v41 = vpop.f32.mrf.mxu0 }
 0x513   : > { %7428 = vst.msk [vmem:[%s11567_s27 + $0x1d8] sm:$0xff] %vm980_vm0, %v8991_v41 }
 0x514   : > { %v7219_v60 = vpop.f32.mrf.mxu0  ;;  %v9005_v29 = vpop.f32.mrf.mxu1 }
 0x515   : > { %7427 = vst.msk [vmem:[%s11567_s27 + $0x1d0] sm:$0xff] %vm980_vm0, %v7219_v60  ;;  %7432 = vst.msk [vmem:[%s11567_s27 + $0x1f8] sm:$0xff] %vm980_vm0, %v9005_v29 }
 0x516   : > { %v7360_v31 = vpop.f32.mrf.mxu1 }
 0x517   : > { %7431 = vst.msk [vmem:[%s11567_s27 + $0x1f0] sm:$0xff] %vm980_vm0, %v7360_v31 }
 0x518   : > { %9423 = shalt.err (!%p9420_p12)
}
 0x519   : > { %s9424_s17 = scalar_lea.hbm %s11696_s30, 8192  ;;  %s9428_s26 = scalar_lea.hbm %s11753_s6, 16384 }
 0x51a   : > { %p9425_p0 = scmp.ne.s32.totalorder %s11696_s30, %s9424_s17  ;;  %p9429_p2 = scmp.lt.s32.totalorder %s11696_s30, %s11753_s6 }
 0x51b   : > { %p9430_p5 = scmp.lt.s32.totalorder %s9428_s26, %s9424_s17 }
 0x51c   : > { %p9426_p11 = pnand %p9425_p0, %p12012_p8 }
 0x51d   : > { %p9431_p13 = por %p9430_p5, %p9429_p2 }
 0x51e   : > { %p9427_p4 = pneg %p9426_p11 }
 0x520   : > { %p9432_p7 = pnand %p9431_p13, %p9427_p4 }
 0x522   : > { %9435 = shalt.err (!%p9432_p7)
}
 0x523   : > { %s9487_s13 = smov 128   ;;  %s9488_s20 = smov 8  }
 0x524   : > { %9012 = dma.vmem_to_hbm [thread:$0]  (%p12012_p8), %s11698_s10, 8192, %s11696_s30, %s7434_s25, %s9487_s13, %s9487_s13, %s9488_s20  }
 0x525 PF: > { %s7463_s14 = sand.u32 1, %s9466_s21   ;;  %p12013_p10 = scmp.ne.s32.totalorder %s11832_s9, 0 }
 0x526   : > { %p12014_p1 = scmp.ge.s32.totalorder %s9478_s24, 2  ;;  %s7464_s27 = scalar_lea.sflag [#allocation4], %s7463_s14 }
 0x528   : > { %p9025_p3 = pnand %p12014_p1, %p12013_p10 }
 0x52a   : > { %p9026_p9 = pneg %p9025_p3 }
 0x52c   : > { %9461 = dma.done.wait (%p9026_p9), %s7464_s27, 8192  }
 0x52d   : > { %9463 = vsyncadd (%p9026_p9), %s7464_s27, 4294959104  ;;  %s12015_s24 = sld [smem:[#allocation13_spill]]  ;;  %s12018_s21 = smov %s9470_s22 }
 0x52e   : > { %s12016_s23 = sld [smem:[#allocation12_spill]] }
 0x52f   : > { %s12017_s29 = sld [smem:[#allocation14_spill]] }
 0x533   : > { %p22_p6 = scmp.ge.s32.totalorder %s12015_s24, 4  }
 0x534   : > { %s12019_s22 = smov %s12016_s23 }
 0x535   : > { %s12020_s23 = smov %s12017_s29  ;;  %24 = sbr.rel (!%p22_p6) target bundleno = 10 (0xa), region = 119 }
 0x53a   :  { %7469 = vsyncpa [#allocation3], 1 }
 0x53b   :  { %7471 = vsyncpa [#allocation3 + $0x1], 1 }
 0x53c   :  { %7472 = vsyncpa [#allocation6], 1 }
 0x53d   :  { %7474 = vsyncpa [#allocation6 + $0x1], 1 }
 0x53e   :  { %7475 = vsyncpa [#allocation4], 1 }
 0x53f   :  { %7477 = vsyncpa [#allocation4 + $0x1], 1 }

</bundles_post_ra>
